<compile_context>
chip_gen: v7x
topology: tpu7x:2x2x1
jax: 0.10.0
libtpu: 0.0.40
codegen_flags: <defaults>
</compile_context>

<pallas_src>
import functools
import math

import jax
import jax.numpy as jnp
from jax import lax
from jax.experimental import pallas as pl
from jax.experimental.pallas import tpu as pltpu


# --------------------------------- Pallas kernel ---------------------------------- #

def _rel_mha_fused_kernel(lens_ref, x_ref, wqkv_ref, bqkv_ref, ekblk_ref, ev_ref,
                          wo_ref, bo_ref, out_ref, *, T, C, H, d, W, use_roll_skew):
    """One batch row: fused QKV -> relative attention (all heads) -> fused output conv."""
    nW = 2 * W + 1
    bf16 = jnp.bfloat16

    x = x_ref[...]                                                    # (C, T) f32

    # Fused QKV projection for all heads; 1/sqrt(d) and the conv biases are folded into
    # wqkv / bqkv on the host.  bf16 operands, f32 accumulation on the MXU.
    qkv = lax.dot_general(x.astype(bf16), wqkv_ref[...],
                          (((0,), (0,)), ((), ())),
                          preferred_element_type=jnp.float32)
    qkv = qkv + bqkv_ref[...]                                         # (T, 3C) f32

    q = qkv[:, 0 * C:1 * C]                                           # (T, C), pre-scaled
    k = qkv[:, 1 * C:2 * C]
    v = qkv[:, 2 * C:3 * C]

    # Content-position logits against the block-diagonal rel-K table, computed from the
    # UN-SPLIT (T, C) query: contraction depth C, output lanes H*nW.
    c_rel = lax.dot_general(q.astype(bf16), ekblk_ref[...],
                            (((1,), (0,)), ((), ())),
                            preferred_element_type=jnp.float32)       # (T, H*nW)
    c_rel = jnp.transpose(c_rel.reshape(T, H, nW), (1, 0, 2))         # (H, T, nW)

    # Single reshape+transpose head split (no per-head lane sub-slice stack).
    def heads_first(z):                                               # (T, C) -> (H, T, d)
        return jnp.transpose(z.reshape(T, H, d), (1, 0, 2)).astype(bf16)

    q_h, k_h, v_h = heads_first(q), heads_first(k), heads_first(v)

    # Content-content scores, batched over heads on the MXU: (H, T, T) f32.
    scores = jnp.einsum('hid,hjd->hij', q_h, k_h,
                        preferred_element_type=jnp.float32)

    row = lax.broadcasted_iota(jnp.int32, (T, T), 0)                  # query index i
    col = lax.broadcasted_iota(jnp.int32, (T, T), 1)                  # key index j
    rel = col - row

    if use_roll_skew:
        # XLU skew: lane c of the slab holds rel = c for c in [0, W] and rel = c - L for
        # c in [L-W, L); rolling row i by +i (stride=1 along the query/sublane axis) aligns
        # lane j with rel = j - i.  Any wrap-around lands in the zero padding or outside the
        # |rel| <= W band, which the single select below removes.
        L = max(128, ((T + 127) // 128) * 128)
        c_slab = jnp.concatenate(
            [c_rel[:, :, W:], jnp.zeros((H, T, L - nW), jnp.float32), c_rel[:, :, :W]],
            axis=-1)                                                  # (H, T, L)
        rolled = pltpu.roll(c_slab, 0, 2, stride=1, stride_axis=1)
        scores = scores + jnp.where((jnp.abs(rel) <= W)[None], rolled[:, :, :T], 0.0)
    else:
        # Fallback loop form: fold each diagonal directly (no band-mask list, no cast+mul).
        for r in range(nW):
            scores = scores + jnp.where((rel == (r - W))[None], c_rel[:, :, r:r + 1], 0.0)

    # Key-padding mask rebuilt in-kernel from the per-batch length (SMEM scalar prefetch).
    # TODO(synk): the PyTorch module accepts arbitrary (B,1,T,T) masks; only the common
    # key-padding (per-row valid length) form is supported in-kernel.
    length = lens_ref[pl.program_id(0)]
    scores = jnp.where((col < length)[None], scores, -10000.0)

    # Softmax over keys in f32; exp and the approximate reciprocal go to the EUP.
    m = jnp.max(scores, axis=-1, keepdims=True)
    e = jnp.exp(scores - m)
    p = e * pl.reciprocal(jnp.sum(e, axis=-1, keepdims=True), approx=True)
    # TODO(synk): nn.Dropout(p_attn) is stochastic; implemented as identity (eval / p=0).

    # Content-value: batched (H, T, T) x (H, T, d) on the MXU, f32 accumulation.
    out = jnp.einsum('hij,hjd->hid', p.astype(bf16), v_h,
                     preferred_element_type=jnp.float32)              # (H, T, d)

    # Position-value: nine banded column-sums (cross-lane reduces) concatenated once along
    # the lane axis, then ONE (H*T, nW) x (nW, d) MXU matmul against emb_rel_v.
    rel_w = jnp.concatenate(
        [jnp.sum(jnp.where((rel == (r - W))[None], p, 0.0), axis=-1, keepdims=True)
         for r in range(nW)], axis=-1)                                # (H, T, nW)
    out = out + lax.dot_general(rel_w.reshape(H * T, nW).astype(bf16), ev_ref[...],
                                (((1,), (0,)), ((), ())),
                                preferred_element_type=jnp.float32).reshape(H, T, d)

    # Head merge + output 1x1 conv as ONE matmul with contraction depth C, producing the
    # final (C, T) block directly (T stays on the lane axis for the store).
    merged = jnp.transpose(out, (1, 0, 2)).reshape(T, C).astype(bf16)  # (T, C)
    y = lax.dot_general(wo_ref[...], merged,
                        (((1,), (1,)), ((), ())),
                        preferred_element_type=jnp.float32)           # (C, T)
    out_ref[...] = (y + bo_ref[...]).astype(out_ref.dtype)


# ------------------------------------ wrapper ------------------------------------- #

def relative_mha_forward(x, lengths, params, *, n_heads, window_size, skew_impl="roll"):
    """x: (B, C, T) f32; lengths: (B,) int32 valid key length per batch row."""
    wq, bq, wk, bk, wv, bv, wo, bo, ek, ev = params
    B, C, T = x.shape
    d = C // n_heads
    scale = math.sqrt(d)
    nW = 2 * window_size + 1

    # Host-side weight prep: fold 1/scale into the query projection, fuse Q/K/V into one
    # (C, 3C) weight (pre-transposed for (T,C) x (C,3C)), build the block-diagonal rel-K
    # table (c_rel columns h*nW + r), cast matmul weights to bf16.
    wqkv = jnp.concatenate([wq.T / scale, wk.T, wv.T], axis=1).astype(jnp.bfloat16)
    bqkv = jnp.concatenate([bq / scale, bk, bv]).reshape(1, 3 * C).astype(jnp.float32)
    ek_blk = jnp.zeros((C, n_heads * nW), jnp.float32)
    for h in range(n_heads):
        ek_blk = ek_blk.at[h * d:(h + 1) * d, h * nW:(h + 1) * nW].set(ek.T)
    ek_blk = ek_blk.astype(jnp.bfloat16)

    kernel = functools.partial(_rel_mha_fused_kernel, T=T, C=C, H=n_heads, d=d,
                               W=window_size, use_roll_skew=(skew_impl == "roll"))

    grid_spec = pltpu.PrefetchScalarGridSpec(
        num_scalar_prefetch=1,                      # lengths -> SMEM
        # One batch row per step: with B=2 the "parallel" axis feeds both v7x TensorCores.
        # (For B=1 / odd B, packing several rows per step would amortize per-step overhead
        # instead — see feedback; not needed at these shapes.)
        grid=(B,),
        in_specs=[
            pl.BlockSpec((None, C, T), lambda b, lens: (b, 0, 0)),         # x
            pl.BlockSpec((C, 3 * C), lambda b, lens: (0, 0)),              # W_qkv (bf16)
            pl.BlockSpec((1, 3 * C), lambda b, lens: (0, 0)),              # b_qkv (f32)
            pl.BlockSpec((C, n_heads * nW), lambda b, lens: (0, 0)),       # block-diag rel-K
            pl.BlockSpec((nW, d), lambda b, lens: (0, 0)),                 # emb_rel_v (bf16)
            pl.BlockSpec((C, C), lambda b, lens: (0, 0)),                  # W_o (bf16)
            pl.BlockSpec((C, 1), lambda b, lens: (0, 0)),                  # b_o (f32)
        ],
        out_specs=pl.BlockSpec((None, C, T), lambda b, lens: (b, 0, 0)),
    )

    return pl.pallas_call(
        kernel,
        out_shape=jax.ShapeDtypeStruct((B, C, T), jnp.float32),
        grid_spec=grid_spec,
        compiler_params=pltpu.CompilerParams(
            dimension_semantics=("parallel",),
            vmem_limit_bytes=32 * 1024 * 1024),     # explicit (v5e default is only 16 MiB)
    )(lengths.astype(jnp.int32), x,
      wqkv, bqkv, ek_blk, ev.astype(jnp.bfloat16),
      wo.astype(jnp.bfloat16), bo.reshape(C, 1).astype(jnp.float32))


# ---------------------------- pure-JAX reference (check) ---------------------------- #

def reference_forward(x, mask, params, *, n_heads, window_size):
    """Direct f32/HIGHEST port of the PyTorch forward (pad/view skew included)."""
    wq, bq, wk, bk, wv, bv, wo, bo, ek, ev = params
    B, C, T = x.shape
    d = C // n_heads
    scale = math.sqrt(d)
    prec = lax.Precision.HIGHEST

    def conv(inp, w, b):
        return jnp.einsum('oc,bct->bot', w, inp, precision=prec) + b[None, :, None]

    q = conv(x, wq, bq)
    k = conv(x, wk, bk)
    v = conv(x, wv, bv)
    query = q.reshape(B, n_heads, d, T).transpose(0, 1, 3, 2)
    key = k.reshape(B, n_heads, d, T).transpose(0, 1, 3, 2)
    value = v.reshape(B, n_heads, d, T).transpose(0, 1, 3, 2)
    scores = jnp.einsum('bhtd,bhsd->bhts', query / scale, key, precision=prec)

    pad_length = max(0, T - (window_size + 1))
    start = max(0, window_size + 1 - T)
    end = start + 2 * T - 1
    k_emb = jnp.pad(ek[None], ((0, 0), (pad_length, pad_length), (0, 0)))[:, start:end]
    rel_logits = jnp.einsum('bhtd,md->bhtm', query / scale, k_emb[0], precision=prec)
    rel_logits = jnp.pad(rel_logits, ((0, 0), (0, 0), (0, 0), (0, 1)))
    rel_logits = rel_logits.reshape(B, n_heads, 2 * T * T)
    rel_logits = jnp.pad(rel_logits, ((0, 0), (0, 0), (0, T - 1)))
    scores_local = rel_logits.reshape(B, n_heads, T + 1, 2 * T - 1)[:, :, :T, T - 1:]
    scores = scores + scores_local

    scores = jnp.where(mask == 0, -10000.0, scores)
    p_attn = jax.nn.softmax(scores, axis=-1)
    output = jnp.einsum('bhts,bhsd->bhtd', p_attn, value, precision=prec)

    pa = jnp.pad(p_attn, ((0, 0), (0, 0), (0, 0), (0, T - 1)))
    pa = pa.reshape(B, n_heads, T * (2 * T - 1))
    pa = jnp.pad(pa, ((0, 0), (0, 0), (T, 0)))
    relative_weights = pa.reshape(B, n_heads, T, 2 * T)[:, :, :, 1:]
    v_emb = jnp.pad(ev[None], ((0, 0), (pad_length, pad_length), (0, 0)))[:, start:end]
    output = output + jnp.einsum('bhtm,md->bhtd', relative_weights, v_emb[0], precision=prec)

    merged = output.transpose(0, 1, 3, 2).reshape(B, C, T)
    return conv(merged, wo, bo)


# ------------------------------------ parameters ------------------------------------ #

def init_params(key, channels, n_heads, window_size):
    d = channels // n_heads
    ks = jax.random.split(key, 10)

    def xavier(k, shape):
        fan_in, fan_out = shape[1], shape[0]
        bound = math.sqrt(6.0 / (fan_in + fan_out))
        return jax.random.uniform(k, shape, jnp.float32, -bound, bound)

    def bias(k, n, fan_in):
        bound = 1.0 / math.sqrt(fan_in)
        return jax.random.uniform(k, (n,), jnp.float32, -bound, bound)

    wq = xavier(ks[0], (channels, channels)); bq = bias(ks[1], channels, channels)
    wk = xavier(ks[2], (channels, channels)); bk = bias(ks[3], channels, channels)
    wv = xavier(ks[4], (channels, channels)); bv = bias(ks[5], channels, channels)
    wo = xavier(ks[6], (channels, channels)); bo = bias(ks[7], channels, channels)
    rel_std = d ** (-0.5)
    ek = jax.random.normal(ks[8], (2 * window_size + 1, d), jnp.float32) * rel_std
    ev = jax.random.normal(ks[9], (2 * window_size + 1, d), jnp.float32) * rel_std
    return (wq, bq, wk, bk, wv, bv, wo, bo, ek, ev)


# --------------------------------------- main --------------------------------------- #

if __name__ == "__main__":
    B, C, H, T, W = 2, 32, 4, 16, 4       # channels=32, n_heads=4 -> head dim 8
    key = jax.random.PRNGKey(0)
    kx, kp = jax.random.split(key, 2)

    x = jax.random.normal(kx, (B, C, T), jnp.float32)
    lengths = jnp.array([T, T - 4], dtype=jnp.int32)        # valid key length per batch row
    params = init_params(kp, C, H, W)

    # reference uses the equivalent dense (B, 1, T, T) key-padding mask, f32/HIGHEST
    col = jnp.arange(T)
    key_mask = (col[None, :] < lengths[:, None]).astype(jnp.float32)
    mask = jnp.broadcast_to(key_mask[:, None, None, :], (B, 1, T, T))
    ref = reference_forward(x, mask, params, n_heads=H, window_size=W)
    # kernel uses bf16 MXU operands with f32 accumulation -> compare at bf16-level accuracy
    tol = 5e-2 * float(jnp.max(jnp.abs(ref))) + 2e-2

    def run(skew_impl):
        fwd = jax.jit(functools.partial(relative_mha_forward, n_heads=H,
                                        window_size=W, skew_impl=skew_impl))
        return jax.block_until_ready(fwd(x, lengths, params))

    # Primary path: XLU strided-roll skew.  Strided-roll lowering support / shift
    # conventions vary across Mosaic versions, so fall back to the reviewer-sanctioned
    # masked-select skew if the roll path fails to lower or disagrees with the reference.
    out = None
    try:
        cand = run("roll")
        if float(jnp.max(jnp.abs(cand - ref))) <= tol:
            out = cand
    except Exception:
        out = None
    if out is None:
        out = run("select")

    assert out.shape == (B, C, T)
    err = float(jnp.max(jnp.abs(out - ref)))
    assert err <= tol, f"max abs err {err} > tol {tol}"
    print("KERNEL_OK")
</pallas_src>

<mosaic_0001>
module attributes {stable_mosaic.version = 11 : i64} {
  func.func @_rel_mha_fused_kernel(%arg0: i32, %arg1: memref<2xi32, #tpu.memory_space<smem>>, %arg2: memref<1x32x16xf32, #tpu.memory_space<vmem>>, %arg3: memref<32x96xbf16, #tpu.memory_space<vmem>>, %arg4: memref<1x96xf32, #tpu.memory_space<vmem>>, %arg5: memref<32x36xbf16, #tpu.memory_space<vmem>>, %arg6: memref<9x8xbf16, #tpu.memory_space<vmem>>, %arg7: memref<32x32xbf16, #tpu.memory_space<vmem>>, %arg8: memref<32x1xf32, #tpu.memory_space<vmem>>, %arg9: memref<1x32x16xf32, #tpu.memory_space<vmem>>) attributes {dimension_semantics = [#tpu.dimension_semantics<parallel>], iteration_bounds = array<i64: 2>, scalar_prefetch = 1 : i64, scratch_operands = 0 : i64, tpu.core_type = #tpu.core_type<tc>, window_params = [{transform_indices = @transform_0, window_bounds = array<i64: 1, 32, 16>}, {pipeline_mode = #tpu.pipeline_mode<synchronous>, transform_indices = @transform_1, window_bounds = array<i64: 32, 96>}, {pipeline_mode = #tpu.pipeline_mode<synchronous>, transform_indices = @transform_2, window_bounds = array<i64: 1, 96>}, {pipeline_mode = #tpu.pipeline_mode<synchronous>, transform_indices = @transform_3, window_bounds = array<i64: 32, 36>}, {pipeline_mode = #tpu.pipeline_mode<synchronous>, transform_indices = @transform_4, window_bounds = array<i64: 9, 8>}, {pipeline_mode = #tpu.pipeline_mode<synchronous>, transform_indices = @transform_5, window_bounds = array<i64: 32, 32>}, {pipeline_mode = #tpu.pipeline_mode<synchronous>, transform_indices = @transform_6, window_bounds = array<i64: 32, 1>}, {transform_indices = @transform_7, window_bounds = array<i64: 1, 32, 16>}]} {
    %c0 = arith.constant 0 : index
    %c0_0 = arith.constant 0 : index
    %c0_1 = arith.constant 0 : index
    %0 = vector.load %arg2[%c0, %c0_0, %c0_1] : memref<1x32x16xf32, #tpu.memory_space<vmem>>, vector<1x32x16xf32>
    %1 = vector.shape_cast %0 : vector<1x32x16xf32> to vector<32x16xf32>
    %2 = arith.truncf %1 : vector<32x16xf32> to vector<32x16xbf16>
    %c0_2 = arith.constant 0 : index
    %c0_3 = arith.constant 0 : index
    %3 = vector.load %arg3[%c0_2, %c0_3] : memref<32x96xbf16, #tpu.memory_space<vmem>>, vector<32x96xbf16>
    %cst = arith.constant dense<0.000000e+00> : vector<16x96xf32>
    %4 = tpu.matmul %2, %3, %cst {dimension_numbers = #tpu.dot_dimension_numbers<[0], [0], [1], [1], [0, 1, 1, 1], [], []>} : vector<32x16xbf16>, vector<32x96xbf16>, vector<16x96xf32> -> vector<16x96xf32>
    %c0_4 = arith.constant 0 : index
    %c0_5 = arith.constant 0 : index
    %5 = vector.load %arg4[%c0_4, %c0_5] : memref<1x96xf32, #tpu.memory_space<vmem>>, vector<1x96xf32>
    %6 = vector.broadcast %5 : vector<1x96xf32> to vector<16x96xf32>
    %7 = arith.addf %4, %6 : vector<16x96xf32>
    %8 = vector.extract_strided_slice %7 {offsets = [0, 0], sizes = [16, 32], strides = [1, 1]} : vector<16x96xf32> to vector<16x32xf32>
    %9 = vector.extract_strided_slice %7 {offsets = [0, 32], sizes = [16, 32], strides = [1, 1]} : vector<16x96xf32> to vector<16x32xf32>
    %10 = vector.extract_strided_slice %7 {offsets = [0, 64], sizes = [16, 32], strides = [1, 1]} : vector<16x96xf32> to vector<16x32xf32>
    %11 = arith.truncf %8 : vector<16x32xf32> to vector<16x32xbf16>
    %c0_6 = arith.constant 0 : index
    %c0_7 = arith.constant 0 : index
    %12 = vector.load %arg5[%c0_6, %c0_7] : memref<32x36xbf16, #tpu.memory_space<vmem>>, vector<32x36xbf16>
    %cst_8 = arith.constant dense<0.000000e+00> : vector<16x36xf32>
    %13 = tpu.matmul %11, %12, %cst_8 {dimension_numbers = #tpu.dot_dimension_numbers<[1], [0], [0], [1], [0, 0, 1, 1], [], []>} : vector<16x32xbf16>, vector<32x36xbf16>, vector<16x36xf32> -> vector<16x36xf32>
    %14 = vector.shape_cast %13 : vector<16x36xf32> to vector<16x4x9xf32>
    %15 = tpu.transpose %14, [1, 0, 2] : vector<16x4x9xf32> -> vector<4x16x9xf32>
    %16 = vector.shape_cast %8 : vector<16x32xf32> to vector<16x4x8xf32>
    %17 = tpu.transpose %16, [1, 0, 2] : vector<16x4x8xf32> -> vector<4x16x8xf32>
    %18 = arith.truncf %17 : vector<4x16x8xf32> to vector<4x16x8xbf16>
    %19 = vector.shape_cast %9 : vector<16x32xf32> to vector<16x4x8xf32>
    %20 = tpu.transpose %19, [1, 0, 2] : vector<16x4x8xf32> -> vector<4x16x8xf32>
    %21 = arith.truncf %20 : vector<4x16x8xf32> to vector<4x16x8xbf16>
    %22 = vector.shape_cast %10 : vector<16x32xf32> to vector<16x4x8xf32>
    %23 = tpu.transpose %22, [1, 0, 2] : vector<16x4x8xf32> -> vector<4x16x8xf32>
    %24 = arith.truncf %23 : vector<4x16x8xf32> to vector<4x16x8xbf16>
    "tpu.trace_start"() <{level = 10 : i32, message = "hid,hjd->hij"}> : () -> ()
    %cst_9 = arith.constant dense<0.000000e+00> : vector<4x16x16xf32>
    %25 = tpu.matmul %18, %21, %cst_9 {dimension_numbers = #tpu.dot_dimension_numbers<[2], [2], [1], [1], [0, 0, 0, 1, 1, 1], [0], [0]>} : vector<4x16x8xbf16>, vector<4x16x8xbf16>, vector<4x16x16xf32> -> vector<4x16x16xf32>
    "tpu.trace_stop"() : () -> ()
    %26 = tpu.iota {dimensions = array<i32: 0>} : vector<16x16xi32>
    %27 = tpu.iota {dimensions = array<i32: 1>} : vector<16x16xi32>
    %28 = arith.subi %27, %26 : vector<16x16xi32>
    %29 = vector.extract_strided_slice %15 {offsets = [0, 0, 4], sizes = [4, 16, 5], strides = [1, 1, 1]} : vector<4x16x9xf32> to vector<4x16x5xf32>
    %cst_10 = arith.constant 0.000000e+00 : f32
    %30 = vector.broadcast %cst_10 : f32 to vector<4x16x119xf32>
    %31 = vector.extract_strided_slice %15 {offsets = [0, 0, 0], sizes = [4, 16, 4], strides = [1, 1, 1]} : vector<4x16x9xf32> to vector<4x16x4xf32>
    %32 = tpu.concatenate %29, %30, %31 in 2 : vector<4x16x5xf32>, vector<4x16x119xf32>, vector<4x16x4xf32> -> vector<4x16x128xf32>
    %c0_i32 = arith.constant 0 : i32
    %33 = tpu.dynamic_rotate %32 by %c0_i32 dim 2 {stride = 1 : si32, stride_dimension = 1 : si32} : vector<4x16x128xf32>, i32 -> vector<4x16x128xf32>
    %34 = math.absi %28 : vector<16x16xi32>
    %c4_i32 = arith.constant 4 : i32
    %35 = vector.broadcast %c4_i32 : i32 to vector<16x16xi32>
    %36 = arith.cmpi sle, %34, %35 : vector<16x16xi32>
    %37 = vector.shape_cast %36 : vector<16x16xi1> to vector<1x16x16xi1>
    %38 = vector.extract_strided_slice %33 {offsets = [0, 0, 0], sizes = [4, 16, 16], strides = [1, 1, 1]} : vector<4x16x128xf32> to vector<4x16x16xf32>
    %cst_11 = arith.constant 0.000000e+00 : f32
    %39 = vector.shape_cast %37 : vector<1x16x16xi1> to vector<1x16x16xi1>
    %40 = vector.broadcast %39 : vector<1x16x16xi1> to vector<4x16x16xi1>
    %41 = vector.broadcast %cst_11 : f32 to vector<4x16x16xf32>
    %42 = arith.select %40, %38, %41 : vector<4x16x16xi1>, vector<4x16x16xf32>
    %43 = arith.addf %25, %42 : vector<4x16x16xf32>
    %44 = arith.index_cast %arg0 : i32 to index
    %45 = memref.load %arg1[%44] : memref<2xi32, #tpu.memory_space<smem>>
    %46 = vector.broadcast %45 : i32 to vector<16x16xi32>
    %47 = arith.cmpi slt, %27, %46 : vector<16x16xi32>
    %48 = vector.shape_cast %47 : vector<16x16xi1> to vector<1x16x16xi1>
    %cst_12 = arith.constant -1.000000e+04 : f32
    %49 = vector.shape_cast %48 : vector<1x16x16xi1> to vector<1x16x16xi1>
    %50 = vector.broadcast %49 : vector<1x16x16xi1> to vector<4x16x16xi1>
    %51 = vector.broadcast %cst_12 : f32 to vector<4x16x16xf32>
    %52 = arith.select %50, %43, %51 : vector<4x16x16xi1>, vector<4x16x16xf32>
    %cst_13 = arith.constant dense<0xFF800000> : vector<4x16xf32>
    %53 = vector.multi_reduction <maximumf>, %52, %cst_13 [2] : vector<4x16x16xf32> to vector<4x16xf32>
    %54 = vector.shape_cast %53 : vector<4x16xf32> to vector<4x16x1xf32>
    %55 = vector.broadcast %54 : vector<4x16x1xf32> to vector<4x16x16xf32>
    %56 = arith.subf %52, %55 : vector<4x16x16xf32>
    %57 = math.exp %56 : vector<4x16x16xf32>
    %cst_14 = arith.constant dense<0.000000e+00> : vector<4x16xf32>
    %58 = vector.multi_reduction <add>, %57, %cst_14 [2] : vector<4x16x16xf32> to vector<4x16xf32>
    %59 = vector.shape_cast %58 : vector<4x16xf32> to vector<4x16x1xf32>
    %60 = tpu.reciprocal %59 {approx = true} : vector<4x16x1xf32> -> vector<4x16x1xf32>
    %61 = vector.broadcast %60 : vector<4x16x1xf32> to vector<4x16x16xf32>
    %62 = arith.mulf %57, %61 : vector<4x16x16xf32>
    %63 = arith.truncf %62 : vector<4x16x16xf32> to vector<4x16x16xbf16>
    "tpu.trace_start"() <{level = 10 : i32, message = "hij,hjd->hid"}> : () -> ()
    %cst_15 = arith.constant dense<0.000000e+00> : vector<4x16x8xf32>
    %64 = tpu.matmul %63, %24, %cst_15 {dimension_numbers = #tpu.dot_dimension_numbers<[2], [1], [1], [2], [0, 0, 0, 1, 1, 2], [0], [0]>} : vector<4x16x16xbf16>, vector<4x16x8xbf16>, vector<4x16x8xf32> -> vector<4x16x8xf32>
    %c-4_i32 = arith.constant -4 : i32
    "tpu.trace_stop"() : () -> ()
    %65 = vector.broadcast %c-4_i32 : i32 to vector<16x16xi32>
    %66 = arith.cmpi eq, %28, %65 : vector<16x16xi32>
    %67 = vector.shape_cast %66 : vector<16x16xi1> to vector<1x16x16xi1>
    %cst_16 = arith.constant 0.000000e+00 : f32
    %68 = vector.shape_cast %67 : vector<1x16x16xi1> to vector<1x16x16xi1>
    %69 = vector.broadcast %68 : vector<1x16x16xi1> to vector<4x16x16xi1>
    %70 = vector.broadcast %cst_16 : f32 to vector<4x16x16xf32>
    %71 = arith.select %69, %62, %70 : vector<4x16x16xi1>, vector<4x16x16xf32>
    %cst_17 = arith.constant dense<0.000000e+00> : vector<4x16xf32>
    %72 = vector.multi_reduction <add>, %71, %cst_17 [2] : vector<4x16x16xf32> to vector<4x16xf32>
    %73 = vector.shape_cast %72 : vector<4x16xf32> to vector<4x16x1xf32>
    %c-3_i32 = arith.constant -3 : i32
    %74 = vector.broadcast %c-3_i32 : i32 to vector<16x16xi32>
    %75 = arith.cmpi eq, %28, %74 : vector<16x16xi32>
    %76 = vector.shape_cast %75 : vector<16x16xi1> to vector<1x16x16xi1>
    %cst_18 = arith.constant 0.000000e+00 : f32
    %77 = vector.shape_cast %76 : vector<1x16x16xi1> to vector<1x16x16xi1>
    %78 = vector.broadcast %77 : vector<1x16x16xi1> to vector<4x16x16xi1>
    %79 = vector.broadcast %cst_18 : f32 to vector<4x16x16xf32>
    %80 = arith.select %78, %62, %79 : vector<4x16x16xi1>, vector<4x16x16xf32>
    %cst_19 = arith.constant dense<0.000000e+00> : vector<4x16xf32>
    %81 = vector.multi_reduction <add>, %80, %cst_19 [2] : vector<4x16x16xf32> to vector<4x16xf32>
    %82 = vector.shape_cast %81 : vector<4x16xf32> to vector<4x16x1xf32>
    %c-2_i32 = arith.constant -2 : i32
    %83 = vector.broadcast %c-2_i32 : i32 to vector<16x16xi32>
    %84 = arith.cmpi eq, %28, %83 : vector<16x16xi32>
    %85 = vector.shape_cast %84 : vector<16x16xi1> to vector<1x16x16xi1>
    %cst_20 = arith.constant 0.000000e+00 : f32
    %86 = vector.shape_cast %85 : vector<1x16x16xi1> to vector<1x16x16xi1>
    %87 = vector.broadcast %86 : vector<1x16x16xi1> to vector<4x16x16xi1>
    %88 = vector.broadcast %cst_20 : f32 to vector<4x16x16xf32>
    %89 = arith.select %87, %62, %88 : vector<4x16x16xi1>, vector<4x16x16xf32>
    %cst_21 = arith.constant dense<0.000000e+00> : vector<4x16xf32>
    %90 = vector.multi_reduction <add>, %89, %cst_21 [2] : vector<4x16x16xf32> to vector<4x16xf32>
    %91 = vector.shape_cast %90 : vector<4x16xf32> to vector<4x16x1xf32>
    %c-1_i32 = arith.constant -1 : i32
    %92 = vector.broadcast %c-1_i32 : i32 to vector<16x16xi32>
    %93 = arith.cmpi eq, %28, %92 : vector<16x16xi32>
    %94 = vector.shape_cast %93 : vector<16x16xi1> to vector<1x16x16xi1>
    %cst_22 = arith.constant 0.000000e+00 : f32
    %95 = vector.shape_cast %94 : vector<1x16x16xi1> to vector<1x16x16xi1>
    %96 = vector.broadcast %95 : vector<1x16x16xi1> to vector<4x16x16xi1>
    %97 = vector.broadcast %cst_22 : f32 to vector<4x16x16xf32>
    %98 = arith.select %96, %62, %97 : vector<4x16x16xi1>, vector<4x16x16xf32>
    %cst_23 = arith.constant dense<0.000000e+00> : vector<4x16xf32>
    %99 = vector.multi_reduction <add>, %98, %cst_23 [2] : vector<4x16x16xf32> to vector<4x16xf32>
    %100 = vector.shape_cast %99 : vector<4x16xf32> to vector<4x16x1xf32>
    %c0_i32_24 = arith.constant 0 : i32
    %101 = vector.broadcast %c0_i32_24 : i32 to vector<16x16xi32>
    %102 = arith.cmpi eq, %28, %101 : vector<16x16xi32>
    %103 = vector.shape_cast %102 : vector<16x16xi1> to vector<1x16x16xi1>
    %cst_25 = arith.constant 0.000000e+00 : f32
    %104 = vector.shape_cast %103 : vector<1x16x16xi1> to vector<1x16x16xi1>
    %105 = vector.broadcast %104 : vector<1x16x16xi1> to vector<4x16x16xi1>
    %106 = vector.broadcast %cst_25 : f32 to vector<4x16x16xf32>
    %107 = arith.select %105, %62, %106 : vector<4x16x16xi1>, vector<4x16x16xf32>
    %cst_26 = arith.constant dense<0.000000e+00> : vector<4x16xf32>
    %108 = vector.multi_reduction <add>, %107, %cst_26 [2] : vector<4x16x16xf32> to vector<4x16xf32>
    %109 = vector.shape_cast %108 : vector<4x16xf32> to vector<4x16x1xf32>
    %c1_i32 = arith.constant 1 : i32
    %110 = vector.broadcast %c1_i32 : i32 to vector<16x16xi32>
    %111 = arith.cmpi eq, %28, %110 : vector<16x16xi32>
    %112 = vector.shape_cast %111 : vector<16x16xi1> to vector<1x16x16xi1>
    %cst_27 = arith.constant 0.000000e+00 : f32
    %113 = vector.shape_cast %112 : vector<1x16x16xi1> to vector<1x16x16xi1>
    %114 = vector.broadcast %113 : vector<1x16x16xi1> to vector<4x16x16xi1>
    %115 = vector.broadcast %cst_27 : f32 to vector<4x16x16xf32>
    %116 = arith.select %114, %62, %115 : vector<4x16x16xi1>, vector<4x16x16xf32>
    %cst_28 = arith.constant dense<0.000000e+00> : vector<4x16xf32>
    %117 = vector.multi_reduction <add>, %116, %cst_28 [2] : vector<4x16x16xf32> to vector<4x16xf32>
    %118 = vector.shape_cast %117 : vector<4x16xf32> to vector<4x16x1xf32>
    %c2_i32 = arith.constant 2 : i32
    %119 = vector.broadcast %c2_i32 : i32 to vector<16x16xi32>
    %120 = arith.cmpi eq, %28, %119 : vector<16x16xi32>
    %121 = vector.shape_cast %120 : vector<16x16xi1> to vector<1x16x16xi1>
    %cst_29 = arith.constant 0.000000e+00 : f32
    %122 = vector.shape_cast %121 : vector<1x16x16xi1> to vector<1x16x16xi1>
    %123 = vector.broadcast %122 : vector<1x16x16xi1> to vector<4x16x16xi1>
    %124 = vector.broadcast %cst_29 : f32 to vector<4x16x16xf32>
    %125 = arith.select %123, %62, %124 : vector<4x16x16xi1>, vector<4x16x16xf32>
    %cst_30 = arith.constant dense<0.000000e+00> : vector<4x16xf32>
    %126 = vector.multi_reduction <add>, %125, %cst_30 [2] : vector<4x16x16xf32> to vector<4x16xf32>
    %127 = vector.shape_cast %126 : vector<4x16xf32> to vector<4x16x1xf32>
    %c3_i32 = arith.constant 3 : i32
    %128 = vector.broadcast %c3_i32 : i32 to vector<16x16xi32>
    %129 = arith.cmpi eq, %28, %128 : vector<16x16xi32>
    %130 = vector.shape_cast %129 : vector<16x16xi1> to vector<1x16x16xi1>
    %cst_31 = arith.constant 0.000000e+00 : f32
    %131 = vector.shape_cast %130 : vector<1x16x16xi1> to vector<1x16x16xi1>
    %132 = vector.broadcast %131 : vector<1x16x16xi1> to vector<4x16x16xi1>
    %133 = vector.broadcast %cst_31 : f32 to vector<4x16x16xf32>
    %134 = arith.select %132, %62, %133 : vector<4x16x16xi1>, vector<4x16x16xf32>
    %cst_32 = arith.constant dense<0.000000e+00> : vector<4x16xf32>
    %135 = vector.multi_reduction <add>, %134, %cst_32 [2] : vector<4x16x16xf32> to vector<4x16xf32>
    %136 = vector.shape_cast %135 : vector<4x16xf32> to vector<4x16x1xf32>
    %c4_i32_33 = arith.constant 4 : i32
    %137 = vector.broadcast %c4_i32_33 : i32 to vector<16x16xi32>
    %138 = arith.cmpi eq, %28, %137 : vector<16x16xi32>
    %139 = vector.shape_cast %138 : vector<16x16xi1> to vector<1x16x16xi1>
    %cst_34 = arith.constant 0.000000e+00 : f32
    %140 = vector.shape_cast %139 : vector<1x16x16xi1> to vector<1x16x16xi1>
    %141 = vector.broadcast %140 : vector<1x16x16xi1> to vector<4x16x16xi1>
    %142 = vector.broadcast %cst_34 : f32 to vector<4x16x16xf32>
    %143 = arith.select %141, %62, %142 : vector<4x16x16xi1>, vector<4x16x16xf32>
    %cst_35 = arith.constant dense<0.000000e+00> : vector<4x16xf32>
    %144 = vector.multi_reduction <add>, %143, %cst_35 [2] : vector<4x16x16xf32> to vector<4x16xf32>
    %145 = vector.shape_cast %144 : vector<4x16xf32> to vector<4x16x1xf32>
    %146 = tpu.concatenate %73, %82, %91, %100, %109, %118, %127, %136, %145 in 2 : vector<4x16x1xf32>, vector<4x16x1xf32>, vector<4x16x1xf32>, vector<4x16x1xf32>, vector<4x16x1xf32>, vector<4x16x1xf32>, vector<4x16x1xf32>, vector<4x16x1xf32>, vector<4x16x1xf32> -> vector<4x16x9xf32>
    %147 = vector.shape_cast %146 : vector<4x16x9xf32> to vector<64x9xf32>
    %148 = arith.truncf %147 : vector<64x9xf32> to vector<64x9xbf16>
    %c0_36 = arith.constant 0 : index
    %c0_37 = arith.constant 0 : index
    %149 = vector.load %arg6[%c0_36, %c0_37] : memref<9x8xbf16, #tpu.memory_space<vmem>>, vector<9x8xbf16>
    %cst_38 = arith.constant dense<0.000000e+00> : vector<64x8xf32>
    %150 = tpu.matmul %148, %149, %cst_38 {dimension_numbers = #tpu.dot_dimension_numbers<[1], [0], [0], [1], [0, 0, 1, 1], [], []>} : vector<64x9xbf16>, vector<9x8xbf16>, vector<64x8xf32> -> vector<64x8xf32>
    %151 = vector.shape_cast %150 : vector<64x8xf32> to vector<4x16x8xf32>
    %152 = arith.addf %64, %151 : vector<4x16x8xf32>
    %153 = tpu.transpose %152, [1, 0, 2] : vector<4x16x8xf32> -> vector<16x4x8xf32>
    %154 = vector.shape_cast %153 : vector<16x4x8xf32> to vector<16x32xf32>
    %155 = arith.truncf %154 : vector<16x32xf32> to vector<16x32xbf16>
    %c0_39 = arith.constant 0 : index
    %c0_40 = arith.constant 0 : index
    %156 = vector.load %arg7[%c0_39, %c0_40] : memref<32x32xbf16, #tpu.memory_space<vmem>>, vector<32x32xbf16>
    %cst_41 = arith.constant dense<0.000000e+00> : vector<32x16xf32>
    %157 = tpu.matmul %156, %155, %cst_41 {dimension_numbers = #tpu.dot_dimension_numbers<[1], [1], [0], [0], [0, 0, 1, 0], [], []>} : vector<32x32xbf16>, vector<16x32xbf16>, vector<32x16xf32> -> vector<32x16xf32>
    %c0_42 = arith.constant 0 : index
    %c0_43 = arith.constant 0 : index
    %158 = vector.load %arg8[%c0_42, %c0_43] : memref<32x1xf32, #tpu.memory_space<vmem>>, vector<32x1xf32>
    %159 = vector.broadcast %158 : vector<32x1xf32> to vector<32x16xf32>
    %160 = arith.addf %157, %159 : vector<32x16xf32>
    %c0_44 = arith.constant 0 : index
    %c0_45 = arith.constant 0 : index
    %c0_46 = arith.constant 0 : index
    %161 = vector.load %arg9[%c0_44, %c0_45, %c0_46] : memref<1x32x16xf32, #tpu.memory_space<vmem>>, vector<1x32x16xf32>
    %162 = vector.shape_cast %161 : vector<1x32x16xf32> to vector<32x16xf32>
    %163 = vector.shape_cast %160 : vector<32x16xf32> to vector<1x32x16xf32>
    tpu.vector_store %arg9[%c0_44, %c0_45, %c0_46], %163 {strides = array<i32>} : memref<1x32x16xf32, #tpu.memory_space<vmem>>, vector<1x32x16xf32>,
    return
  }
  func.func @transform_0(%arg0: i32, %arg1: memref<2xi32, #tpu.memory_space<smem>>) -> (i32, i32, i32) {
    %c0_i32 = arith.constant 0 : i32
    %c0_i32_0 = arith.constant 0 : i32
    %c0_i32_1 = arith.constant 0 : i32
    return %arg0, %c0_i32, %c0_i32_0 : i32, i32, i32
  }
  func.func @transform_1(%arg0: i32, %arg1: memref<2xi32, #tpu.memory_space<smem>>) -> (i32, i32) {
    %c0_i32 = arith.constant 0 : i32
    %c0_i32_0 = arith.constant 0 : i32
    %c0_i32_1 = arith.constant 0 : i32
    return %c0_i32, %c0_i32_0 : i32, i32
  }
  func.func @transform_2(%arg0: i32, %arg1: memref<2xi32, #tpu.memory_space<smem>>) -> (i32, i32) {
    %c0_i32 = arith.constant 0 : i32
    %c0_i32_0 = arith.constant 0 : i32
    %c0_i32_1 = arith.constant 0 : i32
    return %c0_i32, %c0_i32_0 : i32, i32
  }
  func.func @transform_3(%arg0: i32, %arg1: memref<2xi32, #tpu.memory_space<smem>>) -> (i32, i32) {
    %c0_i32 = arith.constant 0 : i32
    %c0_i32_0 = arith.constant 0 : i32
    %c0_i32_1 = arith.constant 0 : i32
    return %c0_i32, %c0_i32_0 : i32, i32
  }
  func.func @transform_4(%arg0: i32, %arg1: memref<2xi32, #tpu.memory_space<smem>>) -> (i32, i32) {
    %c0_i32 = arith.constant 0 : i32
    %c0_i32_0 = arith.constant 0 : i32
    %c0_i32_1 = arith.constant 0 : i32
    return %c0_i32, %c0_i32_0 : i32, i32
  }
  func.func @transform_5(%arg0: i32, %arg1: memref<2xi32, #tpu.memory_space<smem>>) -> (i32, i32) {
    %c0_i32 = arith.constant 0 : i32
    %c0_i32_0 = arith.constant 0 : i32
    %c0_i32_1 = arith.constant 0 : i32
    return %c0_i32, %c0_i32_0 : i32, i32
  }
  func.func @transform_6(%arg0: i32, %arg1: memref<2xi32, #tpu.memory_space<smem>>) -> (i32, i32) {
    %c0_i32 = arith.constant 0 : i32
    %c0_i32_0 = arith.constant 0 : i32
    %c0_i32_1 = arith.constant 0 : i32
    return %c0_i32, %c0_i32_0 : i32, i32
  }
  func.func @transform_7(%arg0: i32, %arg1: memref<2xi32, #tpu.memory_space<smem>>) -> (i32, i32, i32) {
    %c0_i32 = arith.constant 0 : i32
    %c0_i32_0 = arith.constant 0 : i32
    %c0_i32_1 = arith.constant 0 : i32
    return %arg0, %c0_i32, %c0_i32_0 : i32, i32, i32
  }
}

module attributes {stable_mosaic.version = 11 : i64} {
  func.func @_rel_mha_fused_kernel(%arg0: i32, %arg1: memref<2xi32, #tpu.memory_space<smem>>, %arg2: memref<1x32x16xf32, #tpu.memory_space<vmem>>, %arg3: memref<32x96xbf16, #tpu.memory_space<vmem>>, %arg4: memref<1x96xf32, #tpu.memory_space<vmem>>, %arg5: memref<32x36xbf16, #tpu.memory_space<vmem>>, %arg6: memref<9x8xbf16, #tpu.memory_space<vmem>>, %arg7: memref<32x32xbf16, #tpu.memory_space<vmem>>, %arg8: memref<32x1xf32, #tpu.memory_space<vmem>>, %arg9: memref<1x32x16xf32, #tpu.memory_space<vmem>>) attributes {dimension_semantics = [#tpu.dimension_semantics<parallel>], iteration_bounds = array<i64: 2>, scalar_prefetch = 1 : i64, scratch_operands = 0 : i64, tpu.core_type = #tpu.core_type<tc>, window_params = [{transform_indices = @transform_0, window_bounds = array<i64: 1, 32, 16>}, {pipeline_mode = #tpu.pipeline_mode<synchronous>, transform_indices = @transform_1, window_bounds = array<i64: 32, 96>}, {pipeline_mode = #tpu.pipeline_mode<synchronous>, transform_indices = @transform_2, window_bounds = array<i64: 1, 96>}, {pipeline_mode = #tpu.pipeline_mode<synchronous>, transform_indices = @transform_3, window_bounds = array<i64: 32, 36>}, {pipeline_mode = #tpu.pipeline_mode<synchronous>, transform_indices = @transform_4, window_bounds = array<i64: 9, 8>}, {pipeline_mode = #tpu.pipeline_mode<synchronous>, transform_indices = @transform_5, window_bounds = array<i64: 32, 32>}, {pipeline_mode = #tpu.pipeline_mode<synchronous>, transform_indices = @transform_6, window_bounds = array<i64: 32, 1>}, {transform_indices = @transform_7, window_bounds = array<i64: 1, 32, 16>}]} {
    %c0 = arith.constant 0 : index
    %c0_0 = arith.constant 0 : index
    %c0_1 = arith.constant 0 : index
    %0 = vector.load %arg2[%c0, %c0_0, %c0_1] : memref<1x32x16xf32, #tpu.memory_space<vmem>>, vector<1x32x16xf32>
    %1 = vector.shape_cast %0 : vector<1x32x16xf32> to vector<32x16xf32>
    %2 = arith.truncf %1 : vector<32x16xf32> to vector<32x16xbf16>
    %c0_2 = arith.constant 0 : index
    %c0_3 = arith.constant 0 : index
    %3 = vector.load %arg3[%c0_2, %c0_3] : memref<32x96xbf16, #tpu.memory_space<vmem>>, vector<32x96xbf16>
    %cst = arith.constant dense<0.000000e+00> : vector<16x96xf32>
    %4 = tpu.matmul %2, %3, %cst {dimension_numbers = #tpu.dot_dimension_numbers<[0], [0], [1], [1], [0, 1, 1, 1], [], []>} : vector<32x16xbf16>, vector<32x96xbf16>, vector<16x96xf32> -> vector<16x96xf32>
    %c0_4 = arith.constant 0 : index
    %c0_5 = arith.constant 0 : index
    %5 = vector.load %arg4[%c0_4, %c0_5] : memref<1x96xf32, #tpu.memory_space<vmem>>, vector<1x96xf32>
    %6 = vector.broadcast %5 : vector<1x96xf32> to vector<16x96xf32>
    %7 = arith.addf %4, %6 : vector<16x96xf32>
    %8 = vector.extract_strided_slice %7 {offsets = [0, 0], sizes = [16, 32], strides = [1, 1]} : vector<16x96xf32> to vector<16x32xf32>
    %9 = vector.extract_strided_slice %7 {offsets = [0, 32], sizes = [16, 32], strides = [1, 1]} : vector<16x96xf32> to vector<16x32xf32>
    %10 = vector.extract_strided_slice %7 {offsets = [0, 64], sizes = [16, 32], strides = [1, 1]} : vector<16x96xf32> to vector<16x32xf32>
    %11 = arith.truncf %8 : vector<16x32xf32> to vector<16x32xbf16>
    %c0_6 = arith.constant 0 : index
    %c0_7 = arith.constant 0 : index
    %12 = vector.load %arg5[%c0_6, %c0_7] : memref<32x36xbf16, #tpu.memory_space<vmem>>, vector<32x36xbf16>
    %cst_8 = arith.constant dense<0.000000e+00> : vector<16x36xf32>
    %13 = tpu.matmul %11, %12, %cst_8 {dimension_numbers = #tpu.dot_dimension_numbers<[1], [0], [0], [1], [0, 0, 1, 1], [], []>} : vector<16x32xbf16>, vector<32x36xbf16>, vector<16x36xf32> -> vector<16x36xf32>
    %14 = vector.shape_cast %13 : vector<16x36xf32> to vector<16x4x9xf32>
    %15 = tpu.transpose %14, [1, 0, 2] : vector<16x4x9xf32> -> vector<4x16x9xf32>
    %16 = vector.shape_cast %8 : vector<16x32xf32> to vector<16x4x8xf32>
    %17 = tpu.transpose %16, [1, 0, 2] : vector<16x4x8xf32> -> vector<4x16x8xf32>
    %18 = arith.truncf %17 : vector<4x16x8xf32> to vector<4x16x8xbf16>
    %19 = vector.shape_cast %9 : vector<16x32xf32> to vector<16x4x8xf32>
    %20 = tpu.transpose %19, [1, 0, 2] : vector<16x4x8xf32> -> vector<4x16x8xf32>
    %21 = arith.truncf %20 : vector<4x16x8xf32> to vector<4x16x8xbf16>
    %22 = vector.shape_cast %10 : vector<16x32xf32> to vector<16x4x8xf32>
    %23 = tpu.transpose %22, [1, 0, 2] : vector<16x4x8xf32> -> vector<4x16x8xf32>
    %24 = arith.truncf %23 : vector<4x16x8xf32> to vector<4x16x8xbf16>
    "tpu.trace_start"() <{level = 10 : i32, message = "hid,hjd->hij"}> : () -> ()
    %cst_9 = arith.constant dense<0.000000e+00> : vector<4x16x16xf32>
    %25 = tpu.matmul %18, %21, %cst_9 {dimension_numbers = #tpu.dot_dimension_numbers<[2], [2], [1], [1], [0, 0, 0, 1, 1, 1], [0], [0]>} : vector<4x16x8xbf16>, vector<4x16x8xbf16>, vector<4x16x16xf32> -> vector<4x16x16xf32>
    "tpu.trace_stop"() : () -> ()
    %26 = tpu.iota {dimensions = array<i32: 0>} : vector<16x16xi32>
    %27 = tpu.iota {dimensions = array<i32: 1>} : vector<16x16xi32>
    %28 = arith.subi %27, %26 : vector<16x16xi32>
    %c-4_i32 = arith.constant -4 : i32
    %29 = vector.broadcast %c-4_i32 : i32 to vector<16x16xi32>
    %30 = arith.cmpi eq, %28, %29 : vector<16x16xi32>
    %31 = vector.shape_cast %30 : vector<16x16xi1> to vector<1x16x16xi1>
    %32 = vector.extract_strided_slice %15 {offsets = [0, 0, 0], sizes = [4, 16, 1], strides = [1, 1, 1]} : vector<4x16x9xf32> to vector<4x16x1xf32>
    %cst_10 = arith.constant 0.000000e+00 : f32
    %33 = vector.shape_cast %31 : vector<1x16x16xi1> to vector<1x16x16xi1>
    %34 = vector.broadcast %33 : vector<1x16x16xi1> to vector<4x16x16xi1>
    %35 = vector.shape_cast %32 : vector<4x16x1xf32> to vector<4x16x1xf32>
    %36 = vector.broadcast %35 : vector<4x16x1xf32> to vector<4x16x16xf32>
    %37 = vector.broadcast %cst_10 : f32 to vector<4x16x16xf32>
    %38 = arith.select %34, %36, %37 : vector<4x16x16xi1>, vector<4x16x16xf32>
    %39 = arith.addf %25, %38 : vector<4x16x16xf32>
    %c-3_i32 = arith.constant -3 : i32
    %40 = vector.broadcast %c-3_i32 : i32 to vector<16x16xi32>
    %41 = arith.cmpi eq, %28, %40 : vector<16x16xi32>
    %42 = vector.shape_cast %41 : vector<16x16xi1> to vector<1x16x16xi1>
    %43 = vector.extract_strided_slice %15 {offsets = [0, 0, 1], sizes = [4, 16, 1], strides = [1, 1, 1]} : vector<4x16x9xf32> to vector<4x16x1xf32>
    %cst_11 = arith.constant 0.000000e+00 : f32
    %44 = vector.shape_cast %42 : vector<1x16x16xi1> to vector<1x16x16xi1>
    %45 = vector.broadcast %44 : vector<1x16x16xi1> to vector<4x16x16xi1>
    %46 = vector.shape_cast %43 : vector<4x16x1xf32> to vector<4x16x1xf32>
    %47 = vector.broadcast %46 : vector<4x16x1xf32> to vector<4x16x16xf32>
    %48 = vector.broadcast %cst_11 : f32 to vector<4x16x16xf32>
    %49 = arith.select %45, %47, %48 : vector<4x16x16xi1>, vector<4x16x16xf32>
    %50 = arith.addf %39, %49 : vector<4x16x16xf32>
    %c-2_i32 = arith.constant -2 : i32
    %51 = vector.broadcast %c-2_i32 : i32 to vector<16x16xi32>
    %52 = arith.cmpi eq, %28, %51 : vector<16x16xi32>
    %53 = vector.shape_cast %52 : vector<16x16xi1> to vector<1x16x16xi1>
    %54 = vector.extract_strided_slice %15 {offsets = [0, 0, 2], sizes = [4, 16, 1], strides = [1, 1, 1]} : vector<4x16x9xf32> to vector<4x16x1xf32>
    %cst_12 = arith.constant 0.000000e+00 : f32
    %55 = vector.shape_cast %53 : vector<1x16x16xi1> to vector<1x16x16xi1>
    %56 = vector.broadcast %55 : vector<1x16x16xi1> to vector<4x16x16xi1>
    %57 = vector.shape_cast %54 : vector<4x16x1xf32> to vector<4x16x1xf32>
    %58 = vector.broadcast %57 : vector<4x16x1xf32> to vector<4x16x16xf32>
    %59 = vector.broadcast %cst_12 : f32 to vector<4x16x16xf32>
    %60 = arith.select %56, %58, %59 : vector<4x16x16xi1>, vector<4x16x16xf32>
    %61 = arith.addf %50, %60 : vector<4x16x16xf32>
    %c-1_i32 = arith.constant -1 : i32
    %62 = vector.broadcast %c-1_i32 : i32 to vector<16x16xi32>
    %63 = arith.cmpi eq, %28, %62 : vector<16x16xi32>
    %64 = vector.shape_cast %63 : vector<16x16xi1> to vector<1x16x16xi1>
    %65 = vector.extract_strided_slice %15 {offsets = [0, 0, 3], sizes = [4, 16, 1], strides = [1, 1, 1]} : vector<4x16x9xf32> to vector<4x16x1xf32>
    %cst_13 = arith.constant 0.000000e+00 : f32
    %66 = vector.shape_cast %64 : vector<1x16x16xi1> to vector<1x16x16xi1>
    %67 = vector.broadcast %66 : vector<1x16x16xi1> to vector<4x16x16xi1>
    %68 = vector.shape_cast %65 : vector<4x16x1xf32> to vector<4x16x1xf32>
    %69 = vector.broadcast %68 : vector<4x16x1xf32> to vector<4x16x16xf32>
    %70 = vector.broadcast %cst_13 : f32 to vector<4x16x16xf32>
    %71 = arith.select %67, %69, %70 : vector<4x16x16xi1>, vector<4x16x16xf32>
    %72 = arith.addf %61, %71 : vector<4x16x16xf32>
    %c0_i32 = arith.constant 0 : i32
    %73 = vector.broadcast %c0_i32 : i32 to vector<16x16xi32>
    %74 = arith.cmpi eq, %28, %73 : vector<16x16xi32>
    %75 = vector.shape_cast %74 : vector<16x16xi1> to vector<1x16x16xi1>
    %76 = vector.extract_strided_slice %15 {offsets = [0, 0, 4], sizes = [4, 16, 1], strides = [1, 1, 1]} : vector<4x16x9xf32> to vector<4x16x1xf32>
    %cst_14 = arith.constant 0.000000e+00 : f32
    %77 = vector.shape_cast %75 : vector<1x16x16xi1> to vector<1x16x16xi1>
    %78 = vector.broadcast %77 : vector<1x16x16xi1> to vector<4x16x16xi1>
    %79 = vector.shape_cast %76 : vector<4x16x1xf32> to vector<4x16x1xf32>
    %80 = vector.broadcast %79 : vector<4x16x1xf32> to vector<4x16x16xf32>
    %81 = vector.broadcast %cst_14 : f32 to vector<4x16x16xf32>
    %82 = arith.select %78, %80, %81 : vector<4x16x16xi1>, vector<4x16x16xf32>
    %83 = arith.addf %72, %82 : vector<4x16x16xf32>
    %c1_i32 = arith.constant 1 : i32
    %84 = vector.broadcast %c1_i32 : i32 to vector<16x16xi32>
    %85 = arith.cmpi eq, %28, %84 : vector<16x16xi32>
    %86 = vector.shape_cast %85 : vector<16x16xi1> to vector<1x16x16xi1>
    %87 = vector.extract_strided_slice %15 {offsets = [0, 0, 5], sizes = [4, 16, 1], strides = [1, 1, 1]} : vector<4x16x9xf32> to vector<4x16x1xf32>
    %cst_15 = arith.constant 0.000000e+00 : f32
    %88 = vector.shape_cast %86 : vector<1x16x16xi1> to vector<1x16x16xi1>
    %89 = vector.broadcast %88 : vector<1x16x16xi1> to vector<4x16x16xi1>
    %90 = vector.shape_cast %87 : vector<4x16x1xf32> to vector<4x16x1xf32>
    %91 = vector.broadcast %90 : vector<4x16x1xf32> to vector<4x16x16xf32>
    %92 = vector.broadcast %cst_15 : f32 to vector<4x16x16xf32>
    %93 = arith.select %89, %91, %92 : vector<4x16x16xi1>, vector<4x16x16xf32>
    %94 = arith.addf %83, %93 : vector<4x16x16xf32>
    %c2_i32 = arith.constant 2 : i32
    %95 = vector.broadcast %c2_i32 : i32 to vector<16x16xi32>
    %96 = arith.cmpi eq, %28, %95 : vector<16x16xi32>
    %97 = vector.shape_cast %96 : vector<16x16xi1> to vector<1x16x16xi1>
    %98 = vector.extract_strided_slice %15 {offsets = [0, 0, 6], sizes = [4, 16, 1], strides = [1, 1, 1]} : vector<4x16x9xf32> to vector<4x16x1xf32>
    %cst_16 = arith.constant 0.000000e+00 : f32
    %99 = vector.shape_cast %97 : vector<1x16x16xi1> to vector<1x16x16xi1>
    %100 = vector.broadcast %99 : vector<1x16x16xi1> to vector<4x16x16xi1>
    %101 = vector.shape_cast %98 : vector<4x16x1xf32> to vector<4x16x1xf32>
    %102 = vector.broadcast %101 : vector<4x16x1xf32> to vector<4x16x16xf32>
    %103 = vector.broadcast %cst_16 : f32 to vector<4x16x16xf32>
    %104 = arith.select %100, %102, %103 : vector<4x16x16xi1>, vector<4x16x16xf32>
    %105 = arith.addf %94, %104 : vector<4x16x16xf32>
    %c3_i32 = arith.constant 3 : i32
    %106 = vector.broadcast %c3_i32 : i32 to vector<16x16xi32>
    %107 = arith.cmpi eq, %28, %106 : vector<16x16xi32>
    %108 = vector.shape_cast %107 : vector<16x16xi1> to vector<1x16x16xi1>
    %109 = vector.extract_strided_slice %15 {offsets = [0, 0, 7], sizes = [4, 16, 1], strides = [1, 1, 1]} : vector<4x16x9xf32> to vector<4x16x1xf32>
    %cst_17 = arith.constant 0.000000e+00 : f32
    %110 = vector.shape_cast %108 : vector<1x16x16xi1> to vector<1x16x16xi1>
    %111 = vector.broadcast %110 : vector<1x16x16xi1> to vector<4x16x16xi1>
    %112 = vector.shape_cast %109 : vector<4x16x1xf32> to vector<4x16x1xf32>
    %113 = vector.broadcast %112 : vector<4x16x1xf32> to vector<4x16x16xf32>
    %114 = vector.broadcast %cst_17 : f32 to vector<4x16x16xf32>
    %115 = arith.select %111, %113, %114 : vector<4x16x16xi1>, vector<4x16x16xf32>
    %116 = arith.addf %105, %115 : vector<4x16x16xf32>
    %c4_i32 = arith.constant 4 : i32
    %117 = vector.broadcast %c4_i32 : i32 to vector<16x16xi32>
    %118 = arith.cmpi eq, %28, %117 : vector<16x16xi32>
    %119 = vector.shape_cast %118 : vector<16x16xi1> to vector<1x16x16xi1>
    %120 = vector.extract_strided_slice %15 {offsets = [0, 0, 8], sizes = [4, 16, 1], strides = [1, 1, 1]} : vector<4x16x9xf32> to vector<4x16x1xf32>
    %cst_18 = arith.constant 0.000000e+00 : f32
    %121 = vector.shape_cast %119 : vector<1x16x16xi1> to vector<1x16x16xi1>
    %122 = vector.broadcast %121 : vector<1x16x16xi1> to vector<4x16x16xi1>
    %123 = vector.shape_cast %120 : vector<4x16x1xf32> to vector<4x16x1xf32>
    %124 = vector.broadcast %123 : vector<4x16x1xf32> to vector<4x16x16xf32>
    %125 = vector.broadcast %cst_18 : f32 to vector<4x16x16xf32>
    %126 = arith.select %122, %124, %125 : vector<4x16x16xi1>, vector<4x16x16xf32>
    %127 = arith.addf %116, %126 : vector<4x16x16xf32>
    %128 = arith.index_cast %arg0 : i32 to index
    %129 = memref.load %arg1[%128] : memref<2xi32, #tpu.memory_space<smem>>
    %130 = vector.broadcast %129 : i32 to vector<16x16xi32>
    %131 = arith.cmpi slt, %27, %130 : vector<16x16xi32>
    %132 = vector.shape_cast %131 : vector<16x16xi1> to vector<1x16x16xi1>
    %cst_19 = arith.constant -1.000000e+04 : f32
    %133 = vector.shape_cast %132 : vector<1x16x16xi1> to vector<1x16x16xi1>
    %134 = vector.broadcast %133 : vector<1x16x16xi1> to vector<4x16x16xi1>
    %135 = vector.broadcast %cst_19 : f32 to vector<4x16x16xf32>
    %136 = arith.select %134, %127, %135 : vector<4x16x16xi1>, vector<4x16x16xf32>
    %cst_20 = arith.constant dense<0xFF800000> : vector<4x16xf32>
    %137 = vector.multi_reduction <maximumf>, %136, %cst_20 [2] : vector<4x16x16xf32> to vector<4x16xf32>
    %138 = vector.shape_cast %137 : vector<4x16xf32> to vector<4x16x1xf32>
    %139 = vector.broadcast %138 : vector<4x16x1xf32> to vector<4x16x16xf32>
    %140 = arith.subf %136, %139 : vector<4x16x16xf32>
    %141 = math.exp %140 : vector<4x16x16xf32>
    %cst_21 = arith.constant dense<0.000000e+00> : vector<4x16xf32>
    %142 = vector.multi_reduction <add>, %141, %cst_21 [2] : vector<4x16x16xf32> to vector<4x16xf32>
    %143 = vector.shape_cast %142 : vector<4x16xf32> to vector<4x16x1xf32>
    %144 = tpu.reciprocal %143 {approx = true} : vector<4x16x1xf32> -> vector<4x16x1xf32>
    %145 = vector.broadcast %144 : vector<4x16x1xf32> to vector<4x16x16xf32>
    %146 = arith.mulf %141, %145 : vector<4x16x16xf32>
    %147 = arith.truncf %146 : vector<4x16x16xf32> to vector<4x16x16xbf16>
    "tpu.trace_start"() <{level = 10 : i32, message = "hij,hjd->hid"}> : () -> ()
    %cst_22 = arith.constant dense<0.000000e+00> : vector<4x16x8xf32>
    %148 = tpu.matmul %147, %24, %cst_22 {dimension_numbers = #tpu.dot_dimension_numbers<[2], [1], [1], [2], [0, 0, 0, 1, 1, 2], [0], [0]>} : vector<4x16x16xbf16>, vector<4x16x8xbf16>, vector<4x16x8xf32> -> vector<4x16x8xf32>
    %c-4_i32_23 = arith.constant -4 : i32
    "tpu.trace_stop"() : () -> ()
    %149 = vector.broadcast %c-4_i32_23 : i32 to vector<16x16xi32>
    %150 = arith.cmpi eq, %28, %149 : vector<16x16xi32>
    %151 = vector.shape_cast %150 : vector<16x16xi1> to vector<1x16x16xi1>
    %cst_24 = arith.constant 0.000000e+00 : f32
    %152 = vector.shape_cast %151 : vector<1x16x16xi1> to vector<1x16x16xi1>
    %153 = vector.broadcast %152 : vector<1x16x16xi1> to vector<4x16x16xi1>
    %154 = vector.broadcast %cst_24 : f32 to vector<4x16x16xf32>
    %155 = arith.select %153, %146, %154 : vector<4x16x16xi1>, vector<4x16x16xf32>
    %cst_25 = arith.constant dense<0.000000e+00> : vector<4x16xf32>
    %156 = vector.multi_reduction <add>, %155, %cst_25 [2] : vector<4x16x16xf32> to vector<4x16xf32>
    %157 = vector.shape_cast %156 : vector<4x16xf32> to vector<4x16x1xf32>
    %c-3_i32_26 = arith.constant -3 : i32
    %158 = vector.broadcast %c-3_i32_26 : i32 to vector<16x16xi32>
    %159 = arith.cmpi eq, %28, %158 : vector<16x16xi32>
    %160 = vector.shape_cast %159 : vector<16x16xi1> to vector<1x16x16xi1>
    %cst_27 = arith.constant 0.000000e+00 : f32
    %161 = vector.shape_cast %160 : vector<1x16x16xi1> to vector<1x16x16xi1>
    %162 = vector.broadcast %161 : vector<1x16x16xi1> to vector<4x16x16xi1>
    %163 = vector.broadcast %cst_27 : f32 to vector<4x16x16xf32>
    %164 = arith.select %162, %146, %163 : vector<4x16x16xi1>, vector<4x16x16xf32>
    %cst_28 = arith.constant dense<0.000000e+00> : vector<4x16xf32>
    %165 = vector.multi_reduction <add>, %164, %cst_28 [2] : vector<4x16x16xf32> to vector<4x16xf32>
    %166 = vector.shape_cast %165 : vector<4x16xf32> to vector<4x16x1xf32>
    %c-2_i32_29 = arith.constant -2 : i32
    %167 = vector.broadcast %c-2_i32_29 : i32 to vector<16x16xi32>
    %168 = arith.cmpi eq, %28, %167 : vector<16x16xi32>
    %169 = vector.shape_cast %168 : vector<16x16xi1> to vector<1x16x16xi1>
    %cst_30 = arith.constant 0.000000e+00 : f32
    %170 = vector.shape_cast %169 : vector<1x16x16xi1> to vector<1x16x16xi1>
    %171 = vector.broadcast %170 : vector<1x16x16xi1> to vector<4x16x16xi1>
    %172 = vector.broadcast %cst_30 : f32 to vector<4x16x16xf32>
    %173 = arith.select %171, %146, %172 : vector<4x16x16xi1>, vector<4x16x16xf32>
    %cst_31 = arith.constant dense<0.000000e+00> : vector<4x16xf32>
    %174 = vector.multi_reduction <add>, %173, %cst_31 [2] : vector<4x16x16xf32> to vector<4x16xf32>
    %175 = vector.shape_cast %174 : vector<4x16xf32> to vector<4x16x1xf32>
    %c-1_i32_32 = arith.constant -1 : i32
    %176 = vector.broadcast %c-1_i32_32 : i32 to vector<16x16xi32>
    %177 = arith.cmpi eq, %28, %176 : vector<16x16xi32>
    %178 = vector.shape_cast %177 : vector<16x16xi1> to vector<1x16x16xi1>
    %cst_33 = arith.constant 0.000000e+00 : f32
    %179 = vector.shape_cast %178 : vector<1x16x16xi1> to vector<1x16x16xi1>
    %180 = vector.broadcast %179 : vector<1x16x16xi1> to vector<4x16x16xi1>
    %181 = vector.broadcast %cst_33 : f32 to vector<4x16x16xf32>
    %182 = arith.select %180, %146, %181 : vector<4x16x16xi1>, vector<4x16x16xf32>
    %cst_34 = arith.constant dense<0.000000e+00> : vector<4x16xf32>
    %183 = vector.multi_reduction <add>, %182, %cst_34 [2] : vector<4x16x16xf32> to vector<4x16xf32>
    %184 = vector.shape_cast %183 : vector<4x16xf32> to vector<4x16x1xf32>
    %c0_i32_35 = arith.constant 0 : i32
    %185 = vector.broadcast %c0_i32_35 : i32 to vector<16x16xi32>
    %186 = arith.cmpi eq, %28, %185 : vector<16x16xi32>
    %187 = vector.shape_cast %186 : vector<16x16xi1> to vector<1x16x16xi1>
    %cst_36 = arith.constant 0.000000e+00 : f32
    %188 = vector.shape_cast %187 : vector<1x16x16xi1> to vector<1x16x16xi1>
    %189 = vector.broadcast %188 : vector<1x16x16xi1> to vector<4x16x16xi1>
    %190 = vector.broadcast %cst_36 : f32 to vector<4x16x16xf32>
    %191 = arith.select %189, %146, %190 : vector<4x16x16xi1>, vector<4x16x16xf32>
    %cst_37 = arith.constant dense<0.000000e+00> : vector<4x16xf32>
    %192 = vector.multi_reduction <add>, %191, %cst_37 [2] : vector<4x16x16xf32> to vector<4x16xf32>
    %193 = vector.shape_cast %192 : vector<4x16xf32> to vector<4x16x1xf32>
    %c1_i32_38 = arith.constant 1 : i32
    %194 = vector.broadcast %c1_i32_38 : i32 to vector<16x16xi32>
    %195 = arith.cmpi eq, %28, %194 : vector<16x16xi32>
    %196 = vector.shape_cast %195 : vector<16x16xi1> to vector<1x16x16xi1>
    %cst_39 = arith.constant 0.000000e+00 : f32
    %197 = vector.shape_cast %196 : vector<1x16x16xi1> to vector<1x16x16xi1>
    %198 = vector.broadcast %197 : vector<1x16x16xi1> to vector<4x16x16xi1>
    %199 = vector.broadcast %cst_39 : f32 to vector<4x16x16xf32>
    %200 = arith.select %198, %146, %199 : vector<4x16x16xi1>, vector<4x16x16xf32>
    %cst_40 = arith.constant dense<0.000000e+00> : vector<4x16xf32>
    %201 = vector.multi_reduction <add>, %200, %cst_40 [2] : vector<4x16x16xf32> to vector<4x16xf32>
    %202 = vector.shape_cast %201 : vector<4x16xf32> to vector<4x16x1xf32>
    %c2_i32_41 = arith.constant 2 : i32
    %203 = vector.broadcast %c2_i32_41 : i32 to vector<16x16xi32>
    %204 = arith.cmpi eq, %28, %203 : vector<16x16xi32>
    %205 = vector.shape_cast %204 : vector<16x16xi1> to vector<1x16x16xi1>
    %cst_42 = arith.constant 0.000000e+00 : f32
    %206 = vector.shape_cast %205 : vector<1x16x16xi1> to vector<1x16x16xi1>
    %207 = vector.broadcast %206 : vector<1x16x16xi1> to vector<4x16x16xi1>
    %208 = vector.broadcast %cst_42 : f32 to vector<4x16x16xf32>
    %209 = arith.select %207, %146, %208 : vector<4x16x16xi1>, vector<4x16x16xf32>
    %cst_43 = arith.constant dense<0.000000e+00> : vector<4x16xf32>
    %210 = vector.multi_reduction <add>, %209, %cst_43 [2] : vector<4x16x16xf32> to vector<4x16xf32>
    %211 = vector.shape_cast %210 : vector<4x16xf32> to vector<4x16x1xf32>
    %c3_i32_44 = arith.constant 3 : i32
    %212 = vector.broadcast %c3_i32_44 : i32 to vector<16x16xi32>
    %213 = arith.cmpi eq, %28, %212 : vector<16x16xi32>
    %214 = vector.shape_cast %213 : vector<16x16xi1> to vector<1x16x16xi1>
    %cst_45 = arith.constant 0.000000e+00 : f32
    %215 = vector.shape_cast %214 : vector<1x16x16xi1> to vector<1x16x16xi1>
    %216 = vector.broadcast %215 : vector<1x16x16xi1> to vector<4x16x16xi1>
    %217 = vector.broadcast %cst_45 : f32 to vector<4x16x16xf32>
    %218 = arith.select %216, %146, %217 : vector<4x16x16xi1>, vector<4x16x16xf32>
    %cst_46 = arith.constant dense<0.000000e+00> : vector<4x16xf32>
    %219 = vector.multi_reduction <add>, %218, %cst_46 [2] : vector<4x16x16xf32> to vector<4x16xf32>
    %220 = vector.shape_cast %219 : vector<4x16xf32> to vector<4x16x1xf32>
    %c4_i32_47 = arith.constant 4 : i32
    %221 = vector.broadcast %c4_i32_47 : i32 to vector<16x16xi32>
    %222 = arith.cmpi eq, %28, %221 : vector<16x16xi32>
    %223 = vector.shape_cast %222 : vector<16x16xi1> to vector<1x16x16xi1>
    %cst_48 = arith.constant 0.000000e+00 : f32
    %224 = vector.shape_cast %223 : vector<1x16x16xi1> to vector<1x16x16xi1>
    %225 = vector.broadcast %224 : vector<1x16x16xi1> to vector<4x16x16xi1>
    %226 = vector.broadcast %cst_48 : f32 to vector<4x16x16xf32>
    %227 = arith.select %225, %146, %226 : vector<4x16x16xi1>, vector<4x16x16xf32>
    %cst_49 = arith.constant dense<0.000000e+00> : vector<4x16xf32>
    %228 = vector.multi_reduction <add>, %227, %cst_49 [2] : vector<4x16x16xf32> to vector<4x16xf32>
    %229 = vector.shape_cast %228 : vector<4x16xf32> to vector<4x16x1xf32>
    %230 = tpu.concatenate %157, %166, %175, %184, %193, %202, %211, %220, %229 in 2 : vector<4x16x1xf32>, vector<4x16x1xf32>, vector<4x16x1xf32>, vector<4x16x1xf32>, vector<4x16x1xf32>, vector<4x16x1xf32>, vector<4x16x1xf32>, vector<4x16x1xf32>, vector<4x16x1xf32> -> vector<4x16x9xf32>
    %231 = vector.shape_cast %230 : vector<4x16x9xf32> to vector<64x9xf32>
    %232 = arith.truncf %231 : vector<64x9xf32> to vector<64x9xbf16>
    %c0_50 = arith.constant 0 : index
    %c0_51 = arith.constant 0 : index
    %233 = vector.load %arg6[%c0_50, %c0_51] : memref<9x8xbf16, #tpu.memory_space<vmem>>, vector<9x8xbf16>
    %cst_52 = arith.constant dense<0.000000e+00> : vector<64x8xf32>
    %234 = tpu.matmul %232, %233, %cst_52 {dimension_numbers = #tpu.dot_dimension_numbers<[1], [0], [0], [1], [0, 0, 1, 1], [], []>} : vector<64x9xbf16>, vector<9x8xbf16>, vector<64x8xf32> -> vector<64x8xf32>
    %235 = vector.shape_cast %234 : vector<64x8xf32> to vector<4x16x8xf32>
    %236 = arith.addf %148, %235 : vector<4x16x8xf32>
    %237 = tpu.transpose %236, [1, 0, 2] : vector<4x16x8xf32> -> vector<16x4x8xf32>
    %238 = vector.shape_cast %237 : vector<16x4x8xf32> to vector<16x32xf32>
    %239 = arith.truncf %238 : vector<16x32xf32> to vector<16x32xbf16>
    %c0_53 = arith.constant 0 : index
    %c0_54 = arith.constant 0 : index
    %240 = vector.load %arg7[%c0_53, %c0_54] : memref<32x32xbf16, #tpu.memory_space<vmem>>, vector<32x32xbf16>
    %cst_55 = arith.constant dense<0.000000e+00> : vector<32x16xf32>
    %241 = tpu.matmul %240, %239, %cst_55 {dimension_numbers = #tpu.dot_dimension_numbers<[1], [1], [0], [0], [0, 0, 1, 0], [], []>} : vector<32x32xbf16>, vector<16x32xbf16>, vector<32x16xf32> -> vector<32x16xf32>
    %c0_56 = arith.constant 0 : index
    %c0_57 = arith.constant 0 : index
    %242 = vector.load %arg8[%c0_56, %c0_57] : memref<32x1xf32, #tpu.memory_space<vmem>>, vector<32x1xf32>
    %243 = vector.broadcast %242 : vector<32x1xf32> to vector<32x16xf32>
    %244 = arith.addf %241, %243 : vector<32x16xf32>
    %c0_58 = arith.constant 0 : index
    %c0_59 = arith.constant 0 : index
    %c0_60 = arith.constant 0 : index
    %245 = vector.load %arg9[%c0_58, %c0_59, %c0_60] : memref<1x32x16xf32, #tpu.memory_space<vmem>>, vector<1x32x16xf32>
    %246 = vector.shape_cast %245 : vector<1x32x16xf32> to vector<32x16xf32>
    %247 = vector.shape_cast %244 : vector<32x16xf32> to vector<1x32x16xf32>
    tpu.vector_store %arg9[%c0_58, %c0_59, %c0_60], %247 {strides = array<i32>} : memref<1x32x16xf32, #tpu.memory_space<vmem>>, vector<1x32x16xf32>,
    return
  }
  func.func @transform_0(%arg0: i32, %arg1: memref<2xi32, #tpu.memory_space<smem>>) -> (i32, i32, i32) {
    %c0_i32 = arith.constant 0 : i32
    %c0_i32_0 = arith.constant 0 : i32
    %c0_i32_1 = arith.constant 0 : i32
    return %arg0, %c0_i32, %c0_i32_0 : i32, i32, i32
  }
  func.func @transform_1(%arg0: i32, %arg1: memref<2xi32, #tpu.memory_space<smem>>) -> (i32, i32) {
    %c0_i32 = arith.constant 0 : i32
    %c0_i32_0 = arith.constant 0 : i32
    %c0_i32_1 = arith.constant 0 : i32
    return %c0_i32, %c0_i32_0 : i32, i32
  }
  func.func @transform_2(%arg0: i32, %arg1: memref<2xi32, #tpu.memory_space<smem>>) -> (i32, i32) {
    %c0_i32 = arith.constant 0 : i32
    %c0_i32_0 = arith.constant 0 : i32
    %c0_i32_1 = arith.constant 0 : i32
    return %c0_i32, %c0_i32_0 : i32, i32
  }
  func.func @transform_3(%arg0: i32, %arg1: memref<2xi32, #tpu.memory_space<smem>>) -> (i32, i32) {
    %c0_i32 = arith.constant 0 : i32
    %c0_i32_0 = arith.constant 0 : i32
    %c0_i32_1 = arith.constant 0 : i32
    return %c0_i32, %c0_i32_0 : i32, i32
  }
  func.func @transform_4(%arg0: i32, %arg1: memref<2xi32, #tpu.memory_space<smem>>) -> (i32, i32) {
    %c0_i32 = arith.constant 0 : i32
    %c0_i32_0 = arith.constant 0 : i32
    %c0_i32_1 = arith.constant 0 : i32
    return %c0_i32, %c0_i32_0 : i32, i32
  }
  func.func @transform_5(%arg0: i32, %arg1: memref<2xi32, #tpu.memory_space<smem>>) -> (i32, i32) {
    %c0_i32 = arith.constant 0 : i32
    %c0_i32_0 = arith.constant 0 : i32
    %c0_i32_1 = arith.constant 0 : i32
    return %c0_i32, %c0_i32_0 : i32, i32
  }
  func.func @transform_6(%arg0: i32, %arg1: memref<2xi32, #tpu.memory_space<smem>>) -> (i32, i32) {
    %c0_i32 = arith.constant 0 : i32
    %c0_i32_0 = arith.constant 0 : i32
    %c0_i32_1 = arith.constant 0 : i32
    return %c0_i32, %c0_i32_0 : i32, i32
  }
  func.func @transform_7(%arg0: i32, %arg1: memref<2xi32, #tpu.memory_space<smem>>) -> (i32, i32, i32) {
    %c0_i32 = arith.constant 0 : i32
    %c0_i32_0 = arith.constant 0 : i32
    %c0_i32_1 = arith.constant 0 : i32
    return %arg0, %c0_i32, %c0_i32_0 : i32, i32, i32
  }
}

</mosaic_0001>

<bundles_post_ra>
// kernel: relative_mha_forward.1
= control target key start
LH: loop header
LB: loop body
LE: loop exit
PB: predicated region body
PF: predicated region fallthrough
CT: control target
= control target key end

     0   :  { %s4520_s0 = inlined_call_operand.vmem [shape: s32[2], index: 0, kind: input, shape index: {}]   ;;  %s4521_s1 = inlined_call_operand.vmem [shape: f32[2,32,16], index: 1, kind: input, shape index: {}]   ;;  %s4522_s2 = inlined_call_operand.vmem [shape: bf16[32,96], index: 2, kind: input, shape index: {}]   ;;  %s4523_s3 = inlined_call_operand.vmem [shape: f32[1,96], index: 3, kind: input, shape index: {}]   ;;  %s4524_s4 = inlined_call_operand.vmem [shape: bf16[32,36], index: 4, kind: input, shape index: {}]   ;;  %s4525_s5 = inlined_call_operand.vmem [shape: bf16[9,8], index: 5, kind: input, shape index: {}]   ;;  %s4526_s6 = inlined_call_operand.vmem [shape: bf16[32,32], index: 6, kind: input, shape index: {}]   ;;  %s4527_s7 = inlined_call_operand.vmem [shape: f32[32,1], index: 7, kind: input, shape index: {}]   ;;  %s4528_s8 = inlined_call_operand.vmem [shape: f32[2,32,16], index: 8, kind: output, shape index: {}]  }
   0x1   :  { %s13_s29 = sshll.u32 %s4520_s0, 4  ;;  %s14_s29 = int_to_ptr.vmem [resolvable:$true] %s13_s29 }
   0x2   :  { %s3424_s30 = scalar_lea.vmem %s14_s29, 16  ;;  %p3429_p1 = scmp.lt.s32.totalorder %s14_s29, %s14_s29 }
   0x3   :  { %p3425_p0 = scmp.ne.s32.totalorder %s14_s29, %s3424_s30  ;;  %p3430_p2 = scmp.lt.s32.totalorder %s3424_s30, %s3424_s30 }
   0x5   :  { %p3431_p3 = por %p3430_p2, %p3429_p1 }
   0x7   :  { %p3432_p4 = pnand %p3431_p3, %p3425_p0 }
   0x9   :  { %3435 = shalt.err (!%p3432_p4)  }
   0xa   :  { %s3446_s9 = smov [#allocation3]  }
   0xb   :  { %16 = dma.vmem_to_smem %s14_s29, 16, %s3446_s9, [#allocation2] }
   0xc   :  { %3440 = dma.done.wait [#allocation2], 16 }
   0xd   :  { %3441 = vsyncadd [#allocation2], 4294967280 }
   0xe   :  { %18 = sfence }
   0xf   :  { %s3515_s10 = smov 0  }
  0x10 LB: > { %s3521_s0 = sadd.s32 4294967295, %s3444_s10   ;;  %p3173_p5 = scmp.ge.s32.totalorder %s3444_s10, 1  ;;  %s3444_s10 = sphi %s3515_s10, %s24_s10  }
  0x11   : > { %p244_p6 = scmp.lt.s32.totalorder %s3444_s10, 3 }
  0x13   : > { %p245_p7 = pnand %p3173_p5, %p244_p6 }
  0x14   : > { %p276_p8 = scmp.lt.s32.totalorder (!%p245_p7), %s3521_s0, 1  ;;  %v3447_v0 = vmov (!%p245_p7), 0.0   ;;  %v3385_v1 = vld [vmem:[%s4522_s2] sm:$0xff] (!%p245_p7)   ;;  %v3386_v2 = vld [vmem:[%s4522_s2 + $0x8] sm:$0xff] (!%p245_p7)   ;;  %vm4530_vm0 = vmmov (!%p245_p7), 0   ;;  %vm4529_vm1 = vcmask (!%p245_p7), 261120   ;;  %v463_v32 = vlaneseq (!%p245_p7) }
  0x15   : > { %248 = sbr.rel (%p245_p7) target bundleno = 2147 (0x863), region = 48  ;;  %3258 = vmatprep.subr.bf16.mxu0 (!%p245_p7), %v3447_v0  ;;  %3266 = vmatprep.subr.bf16.mxu1 (!%p245_p7), %v3447_v0  ;;  %v3387_v10 = vld [vmem:[%s4524_s4] sm:$0xff] (!%p245_p7)   ;;  %v3388_v11 = vld [vmem:[%s4524_s4 + $0x8] sm:$0xff] (!%p245_p7)   ;;  %s3449_s26 = smov (!%p245_p7), 112   ;;  %v3454_v30 = vmov (!%p245_p7), 1983009808  }
  0x16   : > { %3262 = vmatprep.mubr.msk.bf16.mxu0 (!%p245_p7), %vm4530_vm0, %v3447_v0  ;;  %3270 = vmatprep.mubr.msk.bf16.mxu1 (!%p245_p7), %vm4530_vm0, %v3447_v0  ;;  %v3178_v12 = vld [vmem:[%s4523_s3] ss:$0 sm:$0xff] (!%p245_p7)  ;;  %s3450_s27 = smov (!%p245_p7), 120   ;;  %s3451_s28 = smov (!%p245_p7), 96   ;;  %v461_v31 = vunpack.c.l.s4 (!%p245_p7), %v3454_v30  ;;  %v3607_v34 = vshrl.u32 (!%p245_p7), %v463_v32, 7  ;;  %vm4531_vm2 = vcmask (!%p245_p7), 64512  }
  0x17   : > { %3259 = vmatpush3.bf16.msra.mxu0 (!%p245_p7), %v3385_v1  ;;  %3267 = vmatpush3.bf16.msra.mxu1 (!%p245_p7), %v3387_v10  ;;  %s3452_s29 = smov (!%p245_p7), 104   ;;  %s3453_s30 = smov (!%p245_p7), 119   ;;  %v3457_v36 = vmov (!%p245_p7), 1934713408   ;;  %vm4532_vm3 = vcmask (!%p245_p7), 39936   ;;  %vm1674_vm4 = vcmask (!%p245_p7), 1014784  }
  0x18   : > { %3260 = vmatprep.subr.bf16.mxu0 (!%p245_p7), %v3447_v0  ;;  %3268 = vmatprep.subr.bf16.mxu1 (!%p245_p7), %v3447_v0  ;;  %s3455_s9 = smov (!%p245_p7), 110   ;;  %v462_v33 = vunpack.c.0.s8 (!%p245_p7), %v461_v31  ;;  %s3456_s11 = smov (!%p245_p7), 101   ;;  %v493_v37 = vunpack.c.l.s4 (!%p245_p7), %v3457_v36  ;;  %vm1933_vm8 = vcmask (!%p245_p7), 130048  }
  0x19   : > { %s3458_s12 = smov (!%p245_p7), 124   ;;  %s3459_s14 = smov (!%p245_p7), 64  }
  0x1a   : > { %v3614_v39 = vsub.s32 (!%p245_p7), %v462_v33, %v3607_v34  ;;  %v494_v44 = vunpack.c.0.s8 (!%p245_p7), %v493_v37  ;;  %s3460_s15 = smov (!%p245_p7), 256   ;;  %s3461_s17 = smov (!%p245_p7), 264  }
  0x1b   : > { %3261 = vmatpush3.bf16.msra.mxu0 (!%p245_p7), %v3386_v2  ;;  %3269 = vmatpush3.bf16.msra.mxu1 (!%p245_p7), %v3388_v11  ;;  %s1920_s18 = sld [smem:[#allocation3 + %s3521_s0]] (!%p245_p7)  ;;  %s3463_s22 = smov (!%p245_p7), 16  }
  0x1c   : > { %s3532_s13 = scalar_select %p276_p8, %s3521_s0, 1  ;;  %3274 = vmatprep.subr.bf16.mxu0 %v3447_v0  ;;  %3280 = vmatprep.subr.bf16.mxu1 %v3447_v0  ;;  %v3627_v50 = vsub.s32 %v494_v44, %v3607_v34 }
  0x1d   : > { %s3464_s23 = smov 8   ;;  %s3465_s24 = smov 24  }
  0x1e   : > { %s3226_s16 = sshll.u32 %s3532_s13, 5 }
  0x1f   : > { %s280_s19 = scalar_lea.vmem %s4521_s1, %s3226_s16 }
  0x20   : > { %v287_v3 = vld [vmem:[%s280_s19] sm:$0xff]  ;;  %v288_v4 = vld [vmem:[%s280_s19 + $0x8] sm:$0xff]  ;;  %v289_v5 = vld [vmem:[%s280_s19 + $0x10] sm:$0xff] }
  0x21   : > { %v291_v6 = vpack.c.bf16 %v288_v4, %v287_v3  ;;  %v290_v7 = vld [vmem:[%s280_s19 + $0x18] sm:$0xff] }
  0x22   : > { %v292_v8 = vpack.c.bf16 %v290_v7, %v289_v5 }
  0x23   : > { %304 = vxpose.xlu0.c.b16.start [1/2] (short) (narrow) %v291_v6, 16 }
  0x27   : > { %305 = vxpose.xlu0.c.b16.end [2/2] (short) (narrow) %v292_v8, 16 }
  0x89   : > { %v312_v9 = vpop.trf.xlu0 }
  0x8a   : > { %3263 = vmatmul.mubr.msk.bf16.vlgmr.msra.gmra.mrb[0].mxu0 %vm4529_vm1, %v312_v9 }
  0x8b   : > { %3276 = vmatprep.mubr.msk.bf16.mxu0 %vm4530_vm0, %v3447_v0 }
 0x15d   : > { %v370_v13 = vpop.f32.mrb[0].mxu0 }
 0x15e   : > { %v3563_v14 = vadd.f32 %v3178_v12, %v370_v13  ;;  %v3264_v15 = vpop.f32.mrb[1].mxu0 }
 0x15f   : > { %v373_v16 = vpop.f32.mrb[2].mxu0 }
 0x160   : > { %v3565_v17 = vadd.f32 %v3178_v12, %v373_v16  ;;  %738 = vrot.lane.b32.xlu0 %v3563_v14, %s3449_s26  ;;  %732 = vrot.lane.b32.xlu1 %v3563_v14, %s3450_s27  ;;  %v3265_v18 = vpop.f32.mrb[3].mxu0 }
 0x162   : > { %v377_v19 = vpack.c.bf16 %v3565_v17, %v3563_v14 }
 0x164   : > { %1026 = vrot.lane.b32.xlu0 %v3563_v14, %s3451_s28  ;;  %744 = vrot.lane.b32.xlu1 %v3563_v14, %s3452_s29 }
 0x165   : > { %3271 = vmatmul.mubr.msk.bf16.vlgmr.msra.gmra.mrb[0].mxu1 %vm4529_vm1, %v377_v19 }
 0x166   : > { %3282 = vmatprep.mubr.msk.bf16.mxu1 %vm4530_vm0, %v3447_v0 }
 0x168   : > { %734 = vrot.lane.b32.xlu1 %v3565_v17, %s3450_s27 }
 0x16c   : > { %740 = vrot.lane.b32.xlu1 %v3565_v17, %s3449_s26 }
 0x170   : > { %746 = vrot.lane.b32.xlu1 %v3565_v17, %s3452_s29 }
 0x174   : > { %1028 = vrot.lane.b32.xlu1 %v3565_v17, %s3451_s28 }
 0x1d2   : > { %v3580_v20 = vpop.permute.xlu1 %732  ;;  %v3583_v21 = vpop.permute.xlu0 %738 }
 0x1d3   : > { %1030 = vrot.lane.b32.xlu0 %v3580_v20, %s3451_s28  ;;  %v750_v40 = vcombine.low %v3563_v14, %v3583_v21  ;;  %v751_v43 = vcombine.high %v3563_v14, %v3583_v21 }
 0x1d5   : > { %v758_v46 = vrot.slane %v750_v40, %v3614_v39  ;;  %v765_v49 = vrot.slane %v751_v43, %v3614_v39 }
 0x1d6   : > { %v3585_v22 = vpop.permute.xlu1 %744  ;;  %v1027_v35 = vpop.permute.xlu0 %1026 }
 0x1d7   : > { %1034 = vrot.lane.b32.xlu0 %v3583_v21, %s3451_s28  ;;  %v766_v38 = vcombine.low %v3580_v20, %v3585_v22  ;;  %v767_v41 = vcombine.high %v3580_v20, %v3585_v22 }
 0x1d9   : > { %v774_v45 = vrot.slane %v766_v38, %v3614_v39  ;;  %v781_v47 = vrot.slane %v767_v41, %v3614_v39 }
 0x1da   : > { %v3588_v23 = vpop.permute.xlu1 %734 }
 0x1db   : > { %1038 = vrot.lane.b32.xlu0 %v3585_v22, %s3451_s28  ;;  %1032 = vrot.lane.b32.xlu1 %v3588_v23, %s3451_s28  ;;  %v782_v52 = vcombine.low %v758_v46, %v774_v45  ;;  %v783_v53 = vcombine.high %v758_v46, %v774_v45  ;;  %v798_v58 = vcombine.low %v765_v49, %v781_v47 }
 0x1dc   : > { %v799_v59 = vcombine.high %v765_v49, %v781_v47 }
 0x1dd   : > { %v3638_v3 = vrot.slane %v782_v52, %v3627_v50  ;;  %v3641_v4 = vrot.slane %v783_v53, %v3627_v50  ;;  %v3650_v11 = vrot.slane %v798_v58, %v3627_v50 }
 0x1de   : > { %v3592_v24 = vpop.permute.xlu1 %740  ;;  %v3653_v12 = vrot.slane %v799_v59, %v3627_v50 }
 0x1df   : > { %1036 = vrot.lane.b32.xlu1 %v3592_v24, %s3451_s28  ;;  %v818_v60 = vcombine.low %v3565_v17, %v3592_v24  ;;  %v819_v61 = vcombine.high %v3565_v17, %v3592_v24  ;;  %v886_v41 = vcombine.low %v3638_v3, %v3641_v4 }
 0x1e0   : > { %v902_v52 = vcombine.low %v3650_v11, %v3653_v12  ;;  %v3190_v53 = vcombine.high %v3650_v11, %v3653_v12 }
 0x1e1   : > { %v826_v13 = vrot.slane %v818_v60, %v3614_v39  ;;  %v833_v15 = vrot.slane %v819_v61, %v3614_v39 }
 0x1e2   : > { %v3595_v25 = vpop.permute.xlu1 %746 }
 0x1e3   : > { %1040 = vrot.lane.b32.xlu1 %v3595_v25, %s3451_s28  ;;  %v834_v54 = vcombine.low %v3588_v23, %v3595_v25  ;;  %v835_v55 = vcombine.high %v3588_v23, %v3595_v25 }
 0x1e5   : > { %v842_v5 = vrot.slane %v834_v54, %v3614_v39  ;;  %v849_v6 = vrot.slane %v835_v55, %v3614_v39 }
 0x1e6   : > { %v1029_v51 = vpop.permute.xlu1 %1028 }
 0x1e7   : > { %v850_v30 = vcombine.low %v826_v13, %v842_v5  ;;  %v851_v31 = vcombine.high %v826_v13, %v842_v5  ;;  %v866_v33 = vcombine.low %v833_v15, %v849_v6 }
 0x1e9   : > { %v874_v58 = vrot.slane %v866_v33, %v3627_v50 }
 0x238   : > { %v3598_v26 = vpop.f32.mrb[0].mxu1 }
 0x239   : > { %440 = vrot.lane.b32.xlu0 %v3598_v26, %s3453_s30  ;;  %v3272_v27 = vpop.f32.mrb[1].mxu1 }
 0x23a   : > { %v3601_v28 = vpop.f32.mrb[2].mxu1 }
 0x23b   : > { %442 = vrot.lane.b32.xlu1 %v3601_v28, %s3453_s30  ;;  %v3273_v29 = vpop.f32.mrb[3].mxu1 }
 0x23d   : > { %446 = vrot.lane.b32.xlu0 %v3598_v26, %s3455_s9 }
 0x23f   : > { %448 = vrot.lane.b32.xlu1 %v3601_v28, %s3455_s9 }
 0x241   : > { %452 = vrot.lane.b32.xlu0 %v3598_v26, %s3456_s11 }
 0x243   : > { %454 = vrot.lane.b32.xlu1 %v3601_v28, %s3456_s11 }
 0x245   : > { %v1031_v42 = vpop.permute.xlu0 %1030 }
 0x249   : > { %v1035_v48 = vpop.permute.xlu0 %1034 }
 0x24a   : > { %v1050_v56 = vcombine.low %v1027_v35, %v1035_v48  ;;  %v1051_v57 = vcombine.high %v1027_v35, %v1035_v48  ;;  %v867_v35 = vcombine.high %v833_v15, %v849_v6 }
 0x24c   : > { %v1058_v7 = vrot.slane %v1050_v56, %v3614_v39  ;;  %v1065_v8 = vrot.slane %v1051_v57, %v3614_v39  ;;  %v858_v56 = vrot.slane %v850_v30, %v3627_v50  ;;  %v865_v57 = vrot.slane %v851_v31, %v3627_v50 }
 0x24d   : > { %v1039_v62 = vpop.permute.xlu0 %1038  ;;  %v1033_v2 = vpop.permute.xlu1 %1032 }
 0x24e   : > { %v1066_v63 = vcombine.low %v1031_v42, %v1039_v62  ;;  %v1067_v1 = vcombine.high %v1031_v42, %v1039_v62  ;;  %v3189_v42 = vcombine.high %v3638_v3, %v3641_v4 }
 0x250   : > { %v1074_v9 = vrot.slane %v1066_v63, %v3614_v39  ;;  %v1081_v10 = vrot.slane %v1067_v1, %v3614_v39 }
 0x251   : > { %v1037_v29 = vpop.permute.xlu1 %1036 }
 0x252   : > { %v1082_v16 = vcombine.low %v1058_v7, %v1074_v9  ;;  %v1083_v18 = vcombine.high %v1058_v7, %v1074_v9  ;;  %v1098_v19 = vcombine.low %v1065_v8, %v1081_v10  ;;  %v1099_v27 = vcombine.high %v1065_v8, %v1081_v10 }
 0x253   : > { %v1118_v43 = vcombine.low %v1029_v51, %v1037_v29  ;;  %v1119_v44 = vcombine.high %v1029_v51, %v1037_v29  ;;  %v881_v51 = vrot.slane %v867_v35, %v3627_v50  ;;  %v954_v8 = vcombine.low %v858_v56, %v865_v57 }
 0x254   : > { %v1090_v36 = vrot.slane %v1082_v16, %v3627_v50  ;;  %v1097_v37 = vrot.slane %v1083_v18, %v3627_v50  ;;  %v1106_v38 = vrot.slane %v1098_v19, %v3627_v50  ;;  %v1113_v40 = vrot.slane %v1099_v27, %v3627_v50 }
 0x255   : > { %v1041_v49 = vpop.permute.xlu1 %1040  ;;  %v1126_v59 = vrot.slane %v1118_v43, %v3614_v39  ;;  %v1133_v60 = vrot.slane %v1119_v44, %v3614_v39  ;;  %v3191_v9 = vcombine.high %v858_v56, %v865_v57  ;;  %v970_v10 = vcombine.low %v874_v58, %v881_v51 }
 0x256   : > { %v1186_v45 = vcombine.low %v1090_v36, %v1097_v37  ;;  %v3193_v46 = vcombine.high %v1090_v36, %v1097_v37  ;;  %v1202_v47 = vcombine.low %v1106_v38, %v1113_v40  ;;  %v3194_v48 = vcombine.high %v1106_v38, %v1113_v40 }
 0x257   : > { %v1134_v54 = vcombine.low %v1033_v2, %v1041_v49  ;;  %v1135_v55 = vcombine.high %v1033_v2, %v1041_v49  ;;  %v3192_v11 = vcombine.high %v874_v58, %v881_v51  ;;  %v3686_v18 = vrot.slane %v886_v41, %v3614_v39 }
 0x258   : > { %v1193_v63 = vrot.slane %v1186_v45, %v3614_v39  ;;  %v1201_v1 = vrot.slane %v3193_v46, %v3614_v39  ;;  %v1209_v2 = vrot.slane %v1202_v47, %v3614_v39  ;;  %v1217_v3 = vrot.slane %v3194_v48, %v3614_v39 }
 0x259   : > { %v1142_v61 = vrot.slane %v1134_v54, %v3614_v39  ;;  %v1149_v62 = vrot.slane %v1135_v55, %v3614_v39  ;;  %v3689_v19 = vrot.slane %v3189_v42, %v3614_v39  ;;  %v961_v36 = vrot.slane %v954_v8, %v3614_v39 }
 0x25a   : > { %v1218_v27 = vcombine.low %v1193_v63, %v1201_v1  ;;  %v1234_v29 = vcombine.low %v1209_v2, %v1217_v3  ;;  %v969_v37 = vrot.slane %v3191_v9, %v3614_v39  ;;  %v977_v38 = vrot.slane %v970_v10, %v3614_v39 }
 0x25b   : > { %v1150_v4 = vcombine.low %v1126_v59, %v1142_v61  ;;  %v1151_v5 = vcombine.high %v1126_v59, %v1142_v61  ;;  %v1166_v6 = vcombine.low %v1133_v60, %v1149_v62  ;;  %v1167_v7 = vcombine.high %v1133_v60, %v1149_v62 }
 0x25c   : > { %v985_v40 = vrot.slane %v3192_v11, %v3614_v39  ;;  %v909_v45 = vrot.slane %v902_v52, %v3614_v39  ;;  %v917_v46 = vrot.slane %v3190_v53, %v3614_v39  ;;  %v1226_v47 = vrot.slane %v1218_v27, %v3627_v50 }
 0x25d   : > { %v1158_v12 = vrot.slane %v1150_v4, %v3627_v50  ;;  %v1165_v13 = vrot.slane %v1151_v5, %v3627_v50  ;;  %v1174_v15 = vrot.slane %v1166_v6, %v3627_v50  ;;  %v1181_v16 = vrot.slane %v1167_v7, %v3627_v50 }
 0x25e   : > { %v1242_v48 = vrot.slane %v1234_v29, %v3627_v50  ;;  %v986_v57 = vcombine.low %v961_v36, %v969_v37  ;;  %v1002_v58 = vcombine.low %v977_v38, %v985_v40  ;;  %v1219_v60 = vcombine.high %v1193_v63, %v1201_v1 }
 0x25f   : > { %v1254_v30 = vcombine.low %v1158_v12, %v1165_v13  ;;  %v3195_v31 = vcombine.high %v1158_v12, %v1165_v13  ;;  %v1270_v33 = vcombine.low %v1174_v15, %v1181_v16  ;;  %v3196_v35 = vcombine.high %v1174_v15, %v1181_v16 }
 0x260   : > { %v1235_v61 = vcombine.high %v1209_v2, %v1217_v3  ;;  %v1250_v62 = vcombine.low %v1226_v47, %v1242_v48  ;;  %v1251_v52 = vcombine.high %v1226_v47, %v1242_v48  ;;  %v918_v53 = vcombine.low %v3686_v18, %v3689_v19 }
 0x261   : > { %v1261_v41 = vrot.slane %v1254_v30, %v3614_v39  ;;  %v1269_v43 = vrot.slane %v3195_v31, %v3614_v39  ;;  %v1277_v42 = vrot.slane %v1270_v33, %v3614_v39  ;;  %v1285_v44 = vrot.slane %v3196_v35, %v3614_v39 }
 0x262   : > { %v934_v4 = vcombine.low %v909_v45, %v917_v46  ;;  %v994_v9 = vrot.slane %v986_v57, %v3627_v50  ;;  %v1010_v10 = vrot.slane %v1002_v58, %v3627_v50  ;;  %v1233_v1 = vrot.slane %v1219_v60, %v3627_v50 }
 0x263   : > { %v1286_v49 = vcombine.low %v1261_v41, %v1269_v43  ;;  %v1302_v54 = vcombine.low %v1277_v42, %v1285_v44  ;;  %v1287_v55 = vcombine.high %v1261_v41, %v1269_v43  ;;  %v1303_v56 = vcombine.high %v1277_v42, %v1285_v44 }
 0x264   : > { %v1249_v2 = vrot.slane %v1235_v61, %v3627_v50  ;;  %v926_v3 = vrot.slane %v918_v53, %v3627_v50  ;;  %v942_v12 = vrot.slane %v934_v4, %v3627_v50  ;;  %v1018_v29 = vcombine.low %v994_v9, %v1010_v10 }
 0x265   : > { %v1294_v51 = vrot.slane %v1286_v49, %v3627_v50  ;;  %v1310_v59 = vrot.slane %v1302_v54, %v3627_v50  ;;  %v1301_v7 = vrot.slane %v1287_v55, %v3627_v50  ;;  %v1317_v8 = vrot.slane %v1303_v56, %v3627_v50 }
 0x266   : > { %v987_v30 = vcombine.high %v961_v36, %v969_v37  ;;  %v1003_v31 = vcombine.high %v977_v38, %v985_v40  ;;  %v1019_v33 = vcombine.high %v994_v9, %v1010_v10  ;;  %v1252_v35 = vcombine.low %v1233_v1, %v1249_v2 }
 0x267   : > { %v1318_v5 = vcombine.low %v1294_v51, %v1310_v59  ;;  %v1319_v6 = vcombine.high %v1294_v51, %v1310_v59  ;;  %v1320_v16 = vcombine.low %v1301_v7, %v1317_v8  ;;  %v1321_v27 = vcombine.high %v1301_v7, %v1317_v8 }
 0x268   : > { %v1253_v41 = vcombine.high %v1233_v1, %v1249_v2  ;;  %v919_v43 = vcombine.high %v3686_v18, %v3689_v19  ;;  %v935_v42 = vcombine.high %v909_v45, %v917_v46  ;;  %v950_v44 = vcombine.low %v926_v3, %v942_v12 }
 0x269   : > { %v1322_v11 = vpack.c.bf16 %v1318_v5, %v1250_v62  ;;  %v1323_v63 = vpack.c.bf16 %v1319_v6, %v1251_v52  ;;  %v951_v47 = vcombine.high %v926_v3, %v942_v12  ;;  %v1324_v48 = vpack.c.bf16 %v1320_v16, %v1252_v35 }
 0x26a   : > { %v1325_v49 = vpack.c.bf16 %v1321_v27, %v1253_v41  ;;  %v1022_v54 = vpack.c.bf16 %v1018_v29, %v950_v44  ;;  %v1001_v36 = vrot.slane %v987_v30, %v3627_v50  ;;  %v1017_v37 = vrot.slane %v1003_v31, %v3627_v50 }
 0x26b   : > { %v1736_v13 = vsel %vm4531_vm2, %v1322_v11, 0  ;;  %v1783_v15 = vsel %vm4531_vm2, %v1323_v63, 0  ;;  %v1023_v55 = vpack.c.bf16 %v1019_v33, %v951_v47  ;;  %v1830_v38 = vsel %vm4531_vm2, %v1324_v48, 0 }
 0x26c   : > { %3275 = vmatpush3.bf16.xpose.msra.mxu0 %v1736_v13  ;;  %3281 = vmatpush3.bf16.xpose.msra.mxu1 %v1783_v15  ;;  %v1877_v40 = vsel %vm4531_vm2, %v1325_v49, 0  ;;  %v933_v18 = vrot.slane %v919_v43, %v3627_v50  ;;  %v949_v19 = vrot.slane %v935_v42, %v3627_v50  ;;  %v1020_v45 = vcombine.low %v1001_v36, %v1017_v37 }
 0x26d   : > { %3286 = vmatprep.subr.bf16.mxu0 %v3447_v0  ;;  %3292 = vmatprep.subr.bf16.mxu1 %v3447_v0  ;;  %v1021_v46 = vcombine.high %v1001_v36, %v1017_v37 }
 0x26e   : > { %v952_v56 = vcombine.low %v933_v18, %v949_v19  ;;  %v953_v57 = vcombine.high %v933_v18, %v949_v19 }
 0x270   : > { %v1024_v58 = vpack.c.bf16 %v1020_v45, %v952_v56  ;;  %v1025_v51 = vpack.c.bf16 %v1021_v46, %v953_v57 }
 0x273   : > { %3277 = vmatmul.mubr.msk.bf16.vlgmr.msra.gmra.mrb[4].mxu0 %vm4531_vm2, %v1022_v54  ;;  %3283 = vmatmul.mubr.msk.bf16.vlgmr.msra.gmra.mrb[4].mxu1 %vm4531_vm2, %v1023_v55 }
 0x274   : > { %3287 = vmatpush3.bf16.xpose.msra.mxu0 %v1830_v38  ;;  %3293 = vmatpush3.bf16.xpose.msra.mxu1 %v1877_v40 }
 0x275   : > { %3288 = vmatprep.mubr.msk.bf16.mxu0 %vm4530_vm0, %v3447_v0  ;;  %3294 = vmatprep.mubr.msk.bf16.mxu1 %vm4530_vm0, %v3447_v0 }
 0x276   : > { %3308 = vmatprep.subr.bf16.mxu1 %v3447_v0 }
 0x27b   : > { %3289 = vmatmul.mubr.msk.bf16.vlgmr.msra.gmra.mrb[8].mxu0 %vm4531_vm2, %v1024_v58  ;;  %3295 = vmatmul.mubr.msk.bf16.vlgmr.msra.gmra.mrb[8].mxu1 %vm4531_vm2, %v1025_v51 }
 0x27c   : > { %3310 = vmatprep.mubr.msk.bf16.mxu1 %vm4530_vm0, %v3447_v0 }
 0x2ab   : > { %v441_v59 = vpop.permute.xlu0 %440 }
 0x2ad   : > { %v443_v60 = vpop.permute.xlu1 %442 }
 0x2af   : > { %v447_v61 = vpop.permute.xlu0 %446 }
 0x2b0   : > { %v458_v62 = vcombine.low %v3598_v26, %v447_v61  ;;  %v459_v52 = vcombine.high %v3598_v26, %v447_v61 }
 0x2b1   : > { %v449_v53 = vpop.permute.xlu1 %448 }
 0x2b2   : > { %v466_v7 = vrot.slane %v458_v62, %v3614_v39  ;;  %v473_v8 = vrot.slane %v459_v52, %v3614_v39  ;;  %v526_v9 = vcombine.low %v3601_v28, %v449_v53  ;;  %v527_v10 = vcombine.high %v3601_v28, %v449_v53 }
 0x2b3   : > { %v453_v4 = vpop.permute.xlu0 %452 }
 0x2b4   : > { %v474_v5 = vcombine.low %v441_v59, %v453_v4  ;;  %v475_v6 = vcombine.high %v441_v59, %v453_v4  ;;  %v534_v16 = vrot.slane %v526_v9, %v3614_v39  ;;  %v541_v27 = vrot.slane %v527_v10, %v3614_v39 }
 0x2b5   : > { %v455_v11 = vpop.permute.xlu1 %454 }
 0x2b6   : > { %v482_v63 = vrot.slane %v474_v5, %v3614_v39  ;;  %v489_v1 = vrot.slane %v475_v6, %v3614_v39  ;;  %v542_v2 = vcombine.low %v443_v60, %v455_v11  ;;  %v543_v3 = vcombine.high %v443_v60, %v455_v11 }
 0x2b8   : > { %v490_v26 = vcombine.low %v466_v7, %v482_v63  ;;  %v491_v12 = vcombine.high %v466_v7, %v482_v63  ;;  %v506_v13 = vcombine.low %v473_v8, %v489_v1  ;;  %v507_v15 = vcombine.high %v473_v8, %v489_v1 }
 0x2b9   : > { %v550_v29 = vrot.slane %v542_v2, %v3614_v39  ;;  %v557_v30 = vrot.slane %v543_v3, %v3614_v39 }
 0x2ba   : > { %v498_v28 = vrot.slane %v490_v26, %v3627_v50  ;;  %v505_v31 = vrot.slane %v491_v12, %v3627_v50  ;;  %v514_v33 = vrot.slane %v506_v13, %v3627_v50  ;;  %v521_v35 = vrot.slane %v507_v15, %v3627_v50 }
 0x2bb   : > { %v558_v41 = vcombine.low %v534_v16, %v550_v29  ;;  %v559_v43 = vcombine.high %v534_v16, %v550_v29  ;;  %v574_v42 = vcombine.low %v541_v27, %v557_v30  ;;  %v575_v44 = vcombine.high %v541_v27, %v557_v30 }
 0x2bc   : > { %v594_v47 = vcombine.low %v498_v28, %v505_v31  ;;  %v3185_v48 = vcombine.high %v498_v28, %v505_v31  ;;  %v610_v49 = vcombine.low %v514_v33, %v521_v35  ;;  %v3186_v54 = vcombine.high %v514_v33, %v521_v35 }
 0x2bd   : > { %v566_v55 = vrot.slane %v558_v41, %v3627_v50  ;;  %v573_v36 = vrot.slane %v559_v43, %v3627_v50  ;;  %v582_v37 = vrot.slane %v574_v42, %v3627_v50  ;;  %v589_v38 = vrot.slane %v575_v44, %v3627_v50 }
 0x2be   : > { %v601_v40 = vrot.slane %v594_v47, %v3614_v39  ;;  %v609_v18 = vrot.slane %v3185_v48, %v3614_v39  ;;  %v617_v19 = vrot.slane %v610_v49, %v3614_v39  ;;  %v625_v45 = vrot.slane %v3186_v54, %v3614_v39 }
 0x2bf   : > { %v662_v46 = vcombine.low %v566_v55, %v573_v36  ;;  %v3187_v56 = vcombine.high %v566_v55, %v573_v36  ;;  %v678_v57 = vcombine.low %v582_v37, %v589_v38  ;;  %v3188_v58 = vcombine.high %v582_v37, %v589_v38 }
 0x2c0   : > { %v626_v51 = vcombine.low %v601_v40, %v609_v18  ;;  %v642_v59 = vcombine.low %v617_v19, %v625_v45  ;;  %v627_v8 = vcombine.high %v601_v40, %v609_v18  ;;  %v643_v9 = vcombine.high %v617_v19, %v625_v45 }
 0x2c1   : > { %v669_v60 = vrot.slane %v662_v46, %v3614_v39  ;;  %v677_v61 = vrot.slane %v3187_v56, %v3614_v39  ;;  %v685_v62 = vrot.slane %v678_v57, %v3614_v39  ;;  %v693_v52 = vrot.slane %v3188_v58, %v3614_v39 }
 0x2c2   : > { %v634_v53 = vrot.slane %v626_v51, %v3627_v50  ;;  %v650_v4 = vrot.slane %v642_v59, %v3627_v50  ;;  %v641_v26 = vrot.slane %v627_v8, %v3627_v50  ;;  %v657_v12 = vrot.slane %v643_v9, %v3627_v50 }
 0x2c3   : > { %v694_v5 = vcombine.low %v669_v60, %v677_v61  ;;  %v710_v6 = vcombine.low %v685_v62, %v693_v52  ;;  %v695_v1 = vcombine.high %v669_v60, %v677_v61  ;;  %v711_v2 = vcombine.high %v685_v62, %v693_v52 }
 0x2c4   : > { %v658_v7 = vcombine.low %v634_v53, %v650_v4  ;;  %v659_v3 = vcombine.high %v634_v53, %v650_v4  ;;  %v660_v27 = vcombine.low %v641_v26, %v657_v12  ;;  %v661_v30 = vcombine.high %v641_v26, %v657_v12 }
 0x2c5   : > { %v702_v10 = vrot.slane %v694_v5, %v3627_v50  ;;  %v718_v11 = vrot.slane %v710_v6, %v3627_v50  ;;  %v709_v15 = vrot.slane %v695_v1, %v3627_v50  ;;  %v725_v16 = vrot.slane %v711_v2, %v3627_v50 }
 0x2c6   : > { %1641 = vrot.lane.b32.xlu0 %v658_v7, %s3458_s12 }
 0x2c7   : > { %v726_v63 = vcombine.low %v702_v10, %v718_v11  ;;  %v727_v13 = vcombine.high %v702_v10, %v718_v11  ;;  %v728_v29 = vcombine.low %v709_v15, %v725_v16  ;;  %v729_v28 = vcombine.high %v709_v15, %v725_v16 }
 0x2c9   : > { %1643 = vrot.lane.b32.xlu1 %v726_v63, %s3458_s12 }
 0x2ca   : > { %1645 = vrot.lane.b32.xlu0 %v659_v3, %s3458_s12 }
 0x2cd   : > { %1647 = vrot.lane.b32.xlu1 %v727_v13, %s3458_s12 }
 0x2ce   : > { %1649 = vrot.lane.b32.xlu0 %v660_v27, %s3458_s12 }
 0x2d1   : > { %1651 = vrot.lane.b32.xlu1 %v728_v29, %s3458_s12 }
 0x2d2   : > { %1653 = vrot.lane.b32.xlu0 %v661_v30, %s3458_s12 }
 0x2d5   : > { %1655 = vrot.lane.b32.xlu1 %v729_v28, %s3458_s12 }
 0x2d6   : > { %1326 = vrot.lane.b32.xlu0 %v3563_v14, %s3459_s14 }
 0x338   : > { %v1642_v31 = vpop.permute.xlu0 %1641 }
 0x339   : > { %v1666_v33 = vsel %vm4532_vm3, %v1642_v31, 0.0 }
 0x33a   : > { %v1675_v35 = vsel %vm1674_vm4, %v1666_v33, %v1642_v31 }
 0x33b   : > { %v1644_v41 = vpop.permute.xlu1 %1643  ;;  %1684 = vrot.lane.b32.xlu0 %v1675_v35, %s3460_s15 }
 0x33c   : > { %v1667_v43 = vsel %vm4532_vm3, %v1644_v41, 0.0  ;;  %v1646_v42 = vpop.permute.xlu0 %1645 }
 0x33d   : > { %v1668_v44 = vsel %vm4532_vm3, %v1646_v42, 0.0  ;;  %v1676_v47 = vsel %vm1674_vm4, %v1667_v43, %v1644_v41 }
 0x33e   : > { %1697 = vrot.lane.b32.xlu1 %v1676_v47, %s3461_s17  ;;  %v1677_v14 = vsel %vm1674_vm4, %v1668_v44, %v1646_v42 }
 0x33f   : > { %v1648_v48 = vpop.permute.xlu1 %1647  ;;  %1687 = vrot.lane.b32.xlu0 %v1677_v14, %s3460_s15 }
 0x340   : > { %v1669_v49 = vsel %vm4532_vm3, %v1648_v48, 0.0  ;;  %v1650_v54 = vpop.permute.xlu0 %1649 }
 0x341   : > { %v1670_v55 = vsel %vm4532_vm3, %v1650_v54, 0.0  ;;  %v1678_v36 = vsel %vm1674_vm4, %v1669_v49, %v1648_v48 }
 0x342   : > { %1701 = vrot.lane.b32.xlu1 %v1678_v36, %s3461_s17  ;;  %v1679_v37 = vsel %vm1674_vm4, %v1670_v55, %v1650_v54 }
 0x343   : > { %v1652_v38 = vpop.permute.xlu1 %1651  ;;  %1690 = vrot.lane.b32.xlu0 %v1679_v37, %s3460_s15 }
 0x344   : > { %v1671_v40 = vsel %vm4532_vm3, %v1652_v38, 0.0  ;;  %v1654_v18 = vpop.permute.xlu0 %1653 }
 0x345   : > { %v1672_v19 = vsel %vm4532_vm3, %v1654_v18, 0.0  ;;  %v1680_v45 = vsel %vm1674_vm4, %v1671_v40, %v1652_v38 }
 0x346   : > { %1705 = vrot.lane.b32.xlu1 %v1680_v45, %s3461_s17  ;;  %v1772_v46 = vpop.f32.mrb[4].mxu0  ;;  %v1819_v56 = vpop.f32.mrb[4].mxu1  ;;  %v1681_v57 = vsel %vm1674_vm4, %v1672_v19, %v1654_v18 }
 0x347   : > { %v1656_v58 = vpop.permute.xlu1 %1655  ;;  %1693 = vrot.lane.b32.xlu0 %v1681_v57, %s3460_s15  ;;  %v3278_v51 = vpop.f32.mrb[5].mxu0 }
 0x348   : > { %v1673_v59 = vsel %vm4532_vm3, %v1656_v58, 0.0  ;;  %v3284_v60 = vpop.f32.mrb[5].mxu1  ;;  %v1775_v61 = vpop.f32.mrb[6].mxu0 }
 0x349   : > { %v3791_v62 = vpop.f32.mrb[6].mxu1  ;;  %v1682_v52 = vsel %vm1674_vm4, %v1673_v59, %v1656_v58  ;;  %v3279_v53 = vpop.f32.mrb[7].mxu0 }
 0x34a   : > { %1709 = vrot.lane.b32.xlu1 %v1682_v52, %s3461_s17  ;;  %v3285_v4 = vpop.f32.mrb[7].mxu1 }
 0x34b   : > { %1334 = vrot.lane.b32.xlu0 %v3583_v21, %s3459_s14  ;;  %v1628_v21 = vadd.s32 8, %v3607_v34 }
 0x34e   : > { %1328 = vrot.lane.b32.xlu1 %v3565_v17, %s3459_s14  ;;  %v1866_v5 = vpop.f32.mrb[8].mxu0  ;;  %v1913_v6 = vpop.f32.mrb[8].mxu1  ;;  %v1630_v17 = vand.u32 127, %v463_v32  ;;  %v1921_v32 = vstv %s1920_s18  ;;  %s285_s18 = scalar_lea.vmem %s4528_s8, %s3226_s16 }
 0x34f   : > { %v3290_v7 = vpop.f32.mrb[9].mxu0  ;;  %v3296_v8 = vpop.f32.mrb[9].mxu1 }
 0x350   : > { %v1869_v9 = vpop.f32.mrb[10].mxu0  ;;  %v1916_v10 = vpop.f32.mrb[10].mxu1  ;;  %v3807_v1 = vsub.s32 %v1630_v17, %v3607_v34  ;;  %v3809_v2 = vsub.s32 %v1630_v17, %v1628_v21  ;;  %vm3819_vm7 = vcmp.lt.s32.totalorder %v1630_v17, %v1921_v32 }
 0x351   : > { %v3291_v11 = vpop.f32.mrb[11].mxu0  ;;  %v3297_v63 = vpop.f32.mrb[11].mxu1 }
 0x352   : > { %1330 = vrot.lane.b32.xlu1 %v3580_v20, %s3459_s14  ;;  %v1712_v3 = vsub.s32 0, %v3807_v1  ;;  %v1715_v20 = vsub.s32 0, %v3809_v2  ;;  %vm2026_vm9 = vcmp.eq.s32.totalorder %v3807_v1, 4294967292  ;;  %vm2064_vm10 = vcmp.eq.s32.totalorder %v3807_v1, 4294967293 }
 0x353   : > { %vm2027_vm11 = vcmp.eq.s32.totalorder %v3809_v2, 4294967292  ;;  %vm2065_vm12 = vcmp.eq.s32.totalorder %v3809_v2, 4294967293  ;;  %vm2102_vm13 = vcmp.eq.s32.totalorder %v3807_v1, 4294967294  ;;  %vm4534_vm14 = vcmp.eq.s32.totalorder %v3809_v2, 4294967295 }
 0x354   : > { %v3201_v26 = vmin.u32 %v1712_v3, %v3807_v1  ;;  %vm4535_vm15 = vcmp.eq.s32.totalorder %v3807_v1, 4294967295  ;;  %vm2103_vm4 = vcmp.eq.s32.totalorder %v3809_v2, 4294967294  ;;  %vm2217_vm1 = vcmp.eq.s32.totalorder %v3809_v2, 1 }
 0x355   : > { %vm2255_vm2 = vcmp.eq.s32.totalorder %v3809_v2, 2  ;;  %vm2292_vm3 = vcmp.eq.s32.totalorder %v3807_v1, 3 }
 0x356   : > { %1332 = vrot.lane.b32.xlu1 %v3588_v23, %s3459_s14  ;;  %v3815_v23 = vpop.permute.xlu0 %1326  ;;  %vm1717_vm5 = vcmp.le.s32.totalorder %v3201_v26, 4 }
 0x35a   : > { %1336 = vrot.lane.b32.xlu1 %v3592_v24, %s3459_s14  ;;  %v3202_v24 = vmin.u32 %v1715_v20, %v3809_v2 }
 0x35c   : > { %vm1718_vm6 = vcmp.le.s32.totalorder %v3202_v24, 4 }
 0x3ad   : > { %v1685_v12 = vpop.permute.xlu0 %1684 }
 0x3ae   : > { %v1723_v13 = vsel %vm1717_vm5, %v1685_v12, 0.0 }
 0x3af   : > { %v1773_v15 = vadd.f32 %v1772_v46, %v1723_v13 }
 0x3b0   : > { %v1698_v16 = vpop.permute.xlu1 %1697 }
 0x3b1   : > { %v1724_v27 = vsel %vm1718_vm6, %v1698_v16, 0.0  ;;  %v1688_v29 = vpop.permute.xlu0 %1687  ;;  %v1925_v30 = vsel %vm3819_vm7, %v1773_v15, -10000.0 }
 0x3b2   : > { %v1776_v28 = vadd.f32 %v1775_v61, %v1724_v27  ;;  %v1725_v31 = vsel %vm1717_vm5, %v1688_v29, 0.0  ;;  %v1934_v33 = vsel %vm1933_vm8, %v1925_v30, -inf }
 0x3b3   : > { %v1820_v35 = vadd.f32 %v1819_v56, %v1725_v31  ;;  %1935 = vmax.xlane.f32.xlu0 %v1934_v33 }
 0x3b4   : > { %v1702_v41 = vpop.permute.xlu1 %1701  ;;  %v1926_v43 = vsel %vm3819_vm7, %v1776_v28, -10000.0 }
 0x3b5   : > { %v1691_v42 = vpop.permute.xlu0 %1690  ;;  %v1937_v44 = vsel %vm1933_vm8, %v1926_v43, -inf  ;;  %v1927_v47 = vsel %vm3819_vm7, %v1820_v35, -10000.0  ;;  %v1726_v54 = vsel %vm1718_vm6, %v1702_v41, 0.0 }
 0x3b6   : > { %v1727_v14 = vsel %vm1717_vm5, %v1691_v42, 0.0  ;;  %1938 = vmax.xlane.f32.xlu1 %v1937_v44  ;;  %v1940_v48 = vsel %vm1933_vm8, %v1927_v47, -inf  ;;  %v1823_v45 = vadd.f32 %v3791_v62, %v1726_v54 }
 0x3b7   : > { %v1867_v49 = vadd.f32 %v1866_v5, %v1727_v14  ;;  %1941 = vmax.xlane.f32.xlu0 %v1940_v48 }
 0x3b8   : > { %v1706_v55 = vpop.permute.xlu1 %1705  ;;  %v1928_v62 = vsel %vm3819_vm7, %v1823_v45, -10000.0 }
 0x3b9   : > { %v1728_v36 = vsel %vm1718_vm6, %v1706_v55, 0.0  ;;  %v1694_v37 = vpop.permute.xlu0 %1693  ;;  %v1929_v38 = vsel %vm3819_vm7, %v1867_v49, -10000.0  ;;  %v1943_v4 = vsel %vm1933_vm8, %v1928_v62, -inf }
 0x3ba   : > { %v1870_v40 = vadd.f32 %v1869_v9, %v1728_v36  ;;  %v1729_v18 = vsel %vm1717_vm5, %v1694_v37, 0.0  ;;  %v1946_v19 = vsel %vm1933_vm8, %v1929_v38, -inf  ;;  %vm4533_vm5 = vcmp.eq.s32.totalorder %v3807_v1, 0 }
 0x3bb   : > { %v1914_v46 = vadd.f32 %v1913_v6, %v1729_v18  ;;  %1947 = vmax.xlane.f32.xlu0 %v1946_v19 }
 0x3bc   : > { %v1710_v56 = vpop.permute.xlu1 %1709  ;;  %v1930_v57 = vsel %vm3819_vm7, %v1870_v40, -10000.0 }
 0x3bd   : > { %v1730_v58 = vsel %vm1718_vm6, %v1710_v56, 0.0  ;;  %v1949_v51 = vsel %vm1933_vm8, %v1930_v57, -inf  ;;  %v1931_v59 = vsel %vm3819_vm7, %v1914_v46, -10000.0  ;;  %v1335_v8 = vpop.permute.xlu0 %1334  ;;  %vm2179_vm6 = vcmp.eq.s32.totalorder %v3809_v2, 0 }
 0x3be   : > { %v1917_v60 = vadd.f32 %v1916_v10, %v1730_v58  ;;  %1950 = vmax.xlane.f32.xlu1 %v1949_v51  ;;  %v1952_v61 = vsel %vm1933_vm8, %v1931_v59, -inf  ;;  %v1350_v35 = vcombine.low %v3815_v23, %v1335_v8  ;;  %v1351_v42 = vcombine.high %v3815_v23, %v1335_v8 }
 0x3bf   : > { %1953 = vmax.xlane.f32.xlu0 %v1952_v61 }
 0x3c0   : > { %v1932_v52 = vsel %vm3819_vm7, %v1917_v60, -10000.0  ;;  %v1329_v5 = vpop.permute.xlu1 %1328  ;;  %v1358_v40 = vrot.slane %v1350_v35, %v3614_v39  ;;  %v1365_v58 = vrot.slane %v1351_v42, %v3614_v39  ;;  %vm2216_vm7 = vcmp.eq.s32.totalorder %v3807_v1, 1 }
 0x3c1   : > { %v1955_v53 = vsel %vm1933_vm8, %v1932_v52, -inf }
 0x3c2   : > { %1956 = vmax.xlane.f32.xlu1 %v1955_v53 }
 0x3c3   : > { %1944 = vmax.xlane.f32.xlu0 %v1943_v4 }
 0x3c4   : > { %v3859_v6 = vpop.permute.xlu1 %1330 }
 0x3c8   : > { %v1333_v7 = vpop.permute.xlu1 %1332 }
 0x3cc   : > { %v1337_v9 = vpop.permute.xlu1 %1336 }
 0x3cd   : > { %v1418_v44 = vcombine.low %v1329_v5, %v1337_v9 }
 0x3cf   : > { %v1426_v45 = vrot.slane %v1418_v44, %v3614_v39 }
 0x3d3   : > { %1340 = vrot.lane.b32.xlu1 %v3595_v25, %s3459_s14 }
 0x3d9   : > { %1338 = vrot.lane.b32.xlu0 %v3585_v22, %s3459_s14 }
 0x440   : > { %v1936_v10 = vpop.xlane.xlu0 %1935 }
 0x441   : > { %v1958_v11 = vsub.f32 %v1925_v30, %v1936_v10 }
 0x443   : > { %v1966_v63 = vmul.f32 1.442695, %v1958_v11  ;;  %v1939_v17 = vpop.xlane.xlu1 %1938 }
 0x444   : > { %v1959_v21 = vsub.f32 %v1926_v43, %v1939_v17  ;;  %v1942_v3 = vpop.xlane.xlu0 %1941 }
 0x445   : > { %3392 = vpow2.f32 %v1966_v63  ;;  %v1960_v20 = vsub.f32 %v1927_v47, %v1942_v3  ;;  %v1419_v47 = vcombine.high %v1329_v5, %v1337_v9 }
 0x446   : > { %v1968_v26 = vmul.f32 1.442695, %v1959_v21 }
 0x447   : > { %v1970_v24 = vmul.f32 1.442695, %v1960_v20  ;;  %v1433_v46 = vrot.slane %v1419_v47, %v3614_v39 }
 0x448   : > { %3394 = vpow2.f32 %v1968_v26  ;;  %v1948_v25 = vpop.xlane.xlu0 %1947 }
 0x449   : > { %3396 = vpow2.f32 %v1970_v24  ;;  %v1962_v22 = vsub.f32 %v1929_v38, %v1948_v25 }
 0x44b   : > { %v1951_v32 = vpop.xlane.xlu1 %1950  ;;  %v1974_v15 = vmul.f32 1.442695, %v1962_v22 }
 0x44c   : > { %v1963_v12 = vsub.f32 %v1930_v57, %v1951_v32  ;;  %v1954_v13 = vpop.xlane.xlu0 %1953 }
 0x44d   : > { %v1964_v34 = vsub.f32 %v1931_v59, %v1954_v13  ;;  %3398 = vpow2.f32 %v1974_v15 }
 0x44e   : > { %v1976_v30 = vmul.f32 1.442695, %v1963_v12 }
 0x44f   : > { %v3861_v16 = vpop.eup %3392  ;;  %v1978_v27 = vmul.f32 1.442695, %v1964_v34  ;;  %v1957_v29 = vpop.xlane.xlu1 %1956 }
 0x450   : > { %v1965_v28 = vsub.f32 %v1932_v52, %v1957_v29  ;;  %v1945_v31 = vpop.xlane.xlu0 %1944  ;;  %v1982_v33 = vsel %vm1933_vm8, %v3861_v16, 0.0 }
 0x451   : > { %v1961_v41 = vsub.f32 %v1928_v62, %v1945_v31  ;;  %1983 = vadd.xlane.f32.xlu0 %v1982_v33  ;;  %3400 = vpow2.f32 %v1978_v27 }
 0x452   : > { %v3866_v43 = vpop.eup %3394  ;;  %v1980_v48 = vmul.f32 1.442695, %v1965_v28  ;;  %3402 = vpow2.f32 %v1976_v30 }
 0x453   : > { %v3869_v14 = vpop.eup %3396  ;;  %v1972_v49 = vmul.f32 1.442695, %v1961_v41  ;;  %v1341_v54 = vpop.permute.xlu1 %1340  ;;  %v1985_v55 = vsel %vm1933_vm8, %v3866_v43, 0.0 }
 0x454   : > { %v1434_v36 = vcombine.low %v1333_v7, %v1341_v54  ;;  %v1435_v37 = vcombine.high %v1333_v7, %v1341_v54  ;;  %1986 = vadd.xlane.f32.xlu1 %v1985_v55  ;;  %v1339_v38 = vpop.permute.xlu0 %1338  ;;  %v1988_v23 = vsel %vm1933_vm8, %v3869_v14, 0.0 }
 0x455   : > { %3404 = vpow2.f32 %v1972_v49  ;;  %v1366_v18 = vcombine.low %v3859_v6, %v1339_v38  ;;  %v1367_v19 = vcombine.high %v3859_v6, %v1339_v38  ;;  %1989 = vadd.xlane.f32.xlu0 %v1988_v23 }
 0x456   : > { %v1442_v56 = vrot.slane %v1434_v36, %v3614_v39  ;;  %v1449_v57 = vrot.slane %v1435_v37, %v3614_v39  ;;  %3406 = vpow2.f32 %v1980_v48 }
 0x457   : > { %v1374_v51 = vrot.slane %v1366_v18, %v3614_v39  ;;  %v1381_v59 = vrot.slane %v1367_v19, %v3614_v39  ;;  %v3893_v3 = vpop.eup %3398 }
 0x458   : > { %v1450_v60 = vcombine.low %v1426_v45, %v1442_v56  ;;  %v1451_v61 = vcombine.high %v1426_v45, %v1442_v56  ;;  %v1466_v62 = vcombine.low %v1433_v46, %v1449_v57  ;;  %v1467_v52 = vcombine.high %v1433_v46, %v1449_v57 }
 0x459   : > { %v1382_v53 = vcombine.low %v1358_v40, %v1374_v51  ;;  %v1383_v4 = vcombine.high %v1358_v40, %v1374_v51  ;;  %v1398_v5 = vcombine.low %v1365_v58, %v1381_v59  ;;  %v1399_v6 = vcombine.high %v1365_v58, %v1381_v59 }
 0x45a   : > { %v1458_v7 = vrot.slane %v1450_v60, %v3627_v50  ;;  %v1465_v8 = vrot.slane %v1451_v61, %v3627_v50  ;;  %v1474_v9 = vrot.slane %v1466_v62, %v3627_v50  ;;  %v1481_v10 = vrot.slane %v1467_v52, %v3627_v50 }
 0x45b   : > { %v1390_v11 = vrot.slane %v1382_v53, %v3627_v50  ;;  %v1397_v63 = vrot.slane %v1383_v4, %v3627_v50  ;;  %v1406_v17 = vrot.slane %v1398_v5, %v3627_v50  ;;  %v1413_v21 = vrot.slane %v1399_v6, %v3627_v50  ;;  %v3895_v22 = vpop.eup %3400 }
 0x45c   : > { %v1554_v20 = vcombine.low %v1458_v7, %v1465_v8  ;;  %v3199_v26 = vcombine.high %v1458_v7, %v1465_v8  ;;  %v1570_v24 = vcombine.low %v1474_v9, %v1481_v10  ;;  %v3200_v25 = vcombine.high %v1474_v9, %v1481_v10  ;;  %v3897_v15 = vpop.eup %3402 }
 0x45d   : > { %v1486_v32 = vcombine.low %v1390_v11, %v1397_v63  ;;  %v3197_v12 = vcombine.high %v1390_v11, %v1397_v63  ;;  %v1502_v13 = vcombine.low %v1406_v17, %v1413_v21  ;;  %v3198_v34 = vcombine.high %v1406_v17, %v1413_v21 }
 0x45e   : > { %v1561_v27 = vrot.slane %v1554_v20, %v3614_v39  ;;  %v1569_v29 = vrot.slane %v3199_v26, %v3614_v39  ;;  %v1577_v30 = vrot.slane %v1570_v24, %v3614_v39  ;;  %v1585_v28 = vrot.slane %v3200_v25, %v3614_v39 }
 0x45f   : > { %v3903_v31 = vpop.eup %3404  ;;  %v1493_v33 = vrot.slane %v1486_v32, %v3614_v39  ;;  %v1501_v35 = vrot.slane %v3197_v12, %v3614_v39  ;;  %v1509_v41 = vrot.slane %v1502_v13, %v3614_v39  ;;  %v1517_v42 = vrot.slane %v3198_v34, %v3614_v39 }
 0x460   : > { %v1994_v44 = vsel %vm1933_vm8, %v3893_v3, 0.0  ;;  %v2000_v47 = vsel %vm1933_vm8, %v3895_v22, 0.0  ;;  %v1991_v48 = vsel %vm1933_vm8, %v3903_v31, 0.0  ;;  %v3915_v49 = vpop.eup %3406  ;;  %v1997_v54 = vsel %vm1933_vm8, %v3897_v15, 0.0 }
 0x461   : > { %1995 = vadd.xlane.f32.xlu0 %v1994_v44  ;;  %1992 = vadd.xlane.f32.xlu1 %v1991_v48  ;;  %v1518_v55 = vcombine.low %v1493_v33, %v1501_v35  ;;  %v1534_v36 = vcombine.low %v1509_v41, %v1517_v42  ;;  %v1586_v37 = vcombine.low %v1561_v27, %v1569_v29  ;;  %v2003_v8 = vsel %vm1933_vm8, %v3915_v49, 0.0 }
 0x462   : > { %v1602_v38 = vcombine.low %v1577_v30, %v1585_v28  ;;  %v1519_v23 = vcombine.high %v1493_v33, %v1501_v35  ;;  %v1535_v40 = vcombine.high %v1509_v41, %v1517_v42  ;;  %v1587_v18 = vcombine.high %v1561_v27, %v1569_v29 }
 0x463   : > { %v1526_v19 = vrot.slane %v1518_v55, %v3627_v50  ;;  %v1542_v45 = vrot.slane %v1534_v36, %v3627_v50  ;;  %v1594_v46 = vrot.slane %v1586_v37, %v3627_v50  ;;  %v1603_v56 = vcombine.high %v1577_v30, %v1585_v28 }
 0x464   : > { %v1610_v57 = vrot.slane %v1602_v38, %v3627_v50  ;;  %v1533_v58 = vrot.slane %v1519_v23, %v3627_v50  ;;  %v1549_v51 = vrot.slane %v1535_v40, %v3627_v50  ;;  %v1601_v59 = vrot.slane %v1587_v18, %v3627_v50 }
 0x465   : > { %2001 = vadd.xlane.f32.xlu0 %v2000_v47  ;;  %1998 = vadd.xlane.f32.xlu1 %v1997_v54  ;;  %v1550_v60 = vcombine.low %v1526_v19, %v1542_v45  ;;  %v1551_v61 = vcombine.high %v1526_v19, %v1542_v45  ;;  %v1617_v62 = vrot.slane %v1603_v56, %v3627_v50 }
 0x466   : > { %v1618_v52 = vcombine.low %v1594_v46, %v1610_v57  ;;  %v1619_v53 = vcombine.high %v1594_v46, %v1610_v57  ;;  %v1553_v4 = vcombine.high %v1533_v58, %v1549_v51  ;;  %v1552_v5 = vcombine.low %v1533_v58, %v1549_v51 }
 0x467   : > { %v1621_v6 = vcombine.high %v1601_v59, %v1617_v62  ;;  %v1620_v7 = vcombine.low %v1601_v59, %v1617_v62 }
 0x468   : > { %v1622_v9 = vpack.c.bf16 %v1618_v52, %v1550_v60  ;;  %v1623_v10 = vpack.c.bf16 %v1619_v53, %v1551_v61 }
 0x469   : > { %2004 = vadd.xlane.f32.xlu1 %v2003_v8  ;;  %v3929_v11 = vpack.c.bf16 %v1621_v6, %v1553_v4  ;;  %v3931_v63 = vpack.c.bf16 %v1620_v7, %v1552_v5 }
 0x46a   : > { %3309 = vmatpush3.bf16.msra.mxu1 %v1622_v9 }
 0x46b   : > { %3314 = vmatprep.subr.bf16.mxu1 %v3447_v0 }
 0x4de   : > { %v1984_v17 = vpop.xlane.xlu0 %1983 }
 0x4df   : > { %3408 = vrcp.f32 %v1984_v17 }
 0x4e1   : > { %v1987_v21 = vpop.xlane.xlu1 %1986 }
 0x4e2   : > { %3410 = vrcp.f32 %v1987_v21  ;;  %v1990_v20 = vpop.xlane.xlu0 %1989 }
 0x4e3   : > { %3412 = vrcp.f32 %v1990_v20 }
 0x4e9   : > { %v3409_v26 = vpop.eup %3408 }
 0x4ea   : > { %v3936_v24 = vmul.f32 %v3409_v26, %v3861_v16 }
 0x4ec   : > { %v3411_v25 = vpop.eup %3410  ;;  %v2032_v32 = vsel %vm2026_vm9, %v3936_v24, 0.0  ;;  %v2070_v30 = vsel %vm2064_vm10, %v3936_v24, 0.0  ;;  %v2108_v38 = vsel %vm2102_vm13, %v3936_v24, 0.0  ;;  %v2146_v62 = vsel %vm4535_vm15, %v3936_v24, 0.0 }
 0x4ed   : > { %v3413_v12 = vpop.eup %3412  ;;  %v3944_v13 = vmul.f32 %v3411_v25, %v3866_v43  ;;  %v2040_v34 = vsel %vm1933_vm8, %v2032_v32, 0.0  ;;  %v2078_v33 = vsel %vm1933_vm8, %v2070_v30, 0.0  ;;  %v2116_v18 = vsel %vm1933_vm8, %v2108_v38, 0.0 }
 0x4ee   : > { %v3948_v27 = vmul.f32 %v3413_v12, %v3869_v14  ;;  %v1996_v16 = vpop.xlane.xlu0 %1995  ;;  %2041 = vadd.xlane.f32.xlu0 %v2040_v34  ;;  %v1993_v29 = vpop.xlane.xlu1 %1992  ;;  %v2184_v20 = vsel %vm4533_vm5, %v3936_v24, 0.0 }
 0x4ef   : > { %v2033_v28 = vsel %vm2027_vm11, %v3944_v13, 0.0  ;;  %v2022_v43 = vpack.c.bf16 %v3944_v13, %v3936_v24  ;;  %3414 = vrcp.f32 %v1993_v29  ;;  %v2071_v35 = vsel %vm2065_vm12, %v3944_v13, 0.0 }
 0x4f0   : > { %v2043_v14 = vsel %vm1933_vm8, %v2033_v28, 0.0  ;;  %v2034_v44 = vsel %vm2026_vm9, %v3948_v27, 0.0  ;;  %v2081_v47 = vsel %vm1933_vm8, %v2071_v35, 0.0  ;;  %v2072_v55 = vsel %vm2064_vm10, %v3948_v27, 0.0 }
 0x4f1   : > { %2044 = vadd.xlane.f32.xlu1 %v2043_v14  ;;  %3311 = vmatmul.mubr.msk.bf16.vlgmr.msra.gmra.mrb[12].mxu1 %vm1933_vm8, %v2022_v43  ;;  %v2046_v48 = vsel %vm1933_vm8, %v2034_v44, 0.0  ;;  %v2084_v36 = vsel %vm1933_vm8, %v2072_v55, 0.0  ;;  %v3988_v40 = vsel %vm4534_vm14, %v3944_v13, 0.0  ;;  %v2109_v52 = vsel %vm2103_vm4, %v3944_v13, 0.0 }
 0x4f2   : > { %v2002_v41 = vpop.xlane.xlu0 %2001  ;;  %3315 = vmatpush3.bf16.msra.mxu1 %v1623_v10  ;;  %2079 = vadd.xlane.f32.xlu0 %v2078_v33  ;;  %v1999_v42 = vpop.xlane.xlu1 %1998  ;;  %v2119_v4 = vsel %vm1933_vm8, %v2109_v52, 0.0  ;;  %v2148_v5 = vsel %vm4535_vm15, %v3948_v27, 0.0  ;;  %v2186_v43 = vsel %vm4533_vm5, %v3948_v27, 0.0  ;;  %v2185_v33 = vsel %vm2179_vm6, %v3944_v13, 0.0 }
 0x4f3   : > { %3316 = vmatprep.mubr.msk.bf16.mxu1 %vm4530_vm0, %v3447_v0  ;;  %3326 = vmatprep.subr.bf16.mxu1 %v3447_v0  ;;  %3416 = vrcp.f32 %v2002_v41 }
 0x4f5   : > { %2082 = vadd.xlane.f32.xlu1 %v2081_v47 }
 0x4f6   : > { %2047 = vadd.xlane.f32.xlu0 %v2046_v48  ;;  %v2005_v54 = vpop.xlane.xlu1 %2004  ;;  %v2195_v48 = vsel %vm1933_vm8, %v2185_v33, 0.0 }
 0x4f7   : > { %3418 = vrcp.f32 %v2005_v54  ;;  %v2222_v54 = vsel %vm2216_vm7, %v3936_v24, 0.0 }
 0x4f8   : > { %3420 = vrcp.f32 %v1996_v16  ;;  %v2192_v16 = vsel %vm1933_vm8, %v2184_v20, 0.0 }
 0x4f9   : > { %v3415_v37 = vpop.eup %3414  ;;  %3422 = vrcp.f32 %v1999_v42  ;;  %v2198_v42 = vsel %vm1933_vm8, %v2186_v43, 0.0 }
 0x4fa   : > { %2085 = vadd.xlane.f32.xlu0 %v2084_v36  ;;  %v3983_v23 = vmul.f32 %v3415_v37, %v3903_v31  ;;  %v2110_v31 = vsel %vm2102_vm13, %v3948_v27, 0.0 }
 0x4fb   : > { %v2122_v51 = vsel %vm1933_vm8, %v2110_v31, 0.0  ;;  %v2223_v31 = vsel %vm2217_vm1, %v3944_v13, 0.0 }
 0x4fc   : > { %v2035_v19 = vsel %vm2027_vm11, %v3983_v23, 0.0  ;;  %v2023_v45 = vpack.c.bf16 %v3983_v23, %v3948_v27  ;;  %v2073_v57 = vsel %vm2065_vm12, %v3983_v23, 0.0  ;;  %v2111_v7 = vsel %vm2103_vm4, %v3983_v23, 0.0 }
 0x4fd   : > { %v2049_v46 = vsel %vm1933_vm8, %v2035_v19, 0.0  ;;  %v3417_v56 = vpop.eup %3416  ;;  %v2087_v61 = vsel %vm1933_vm8, %v2073_v57, 0.0  ;;  %v2125_v21 = vsel %vm1933_vm8, %v2111_v7, 0.0  ;;  %v2149_v12 = vsel %vm4534_vm14, %v3983_v23, 0.0 }
 0x4fe   : > { %2117 = vadd.xlane.f32.xlu0 %v2116_v18  ;;  %2050 = vadd.xlane.f32.xlu1 %v2049_v46  ;;  %v4011_v59 = vmul.f32 %v3417_v56, %v3895_v22  ;;  %v2154_v22 = vsel %vm1933_vm8, %v2146_v62, 0.0  ;;  %v2163_v28 = vsel %vm1933_vm8, %v2149_v12, 0.0  ;;  %v2187_v37 = vsel %vm2179_vm6, %v3983_v23, 0.0 }
 0x4ff   : > { %3317 = vmatmul.mubr.msk.bf16.vlgmr.msra.gmra.mrb[16].mxu1 %vm1933_vm8, %v2023_v45  ;;  %v2230_v19 = vsel %vm1933_vm8, %v2222_v54, 0.0  ;;  %v2201_v45 = vsel %vm1933_vm8, %v2187_v37, 0.0  ;;  %v2224_v46 = vsel %vm2216_vm7, %v3948_v27, 0.0  ;;  %v2233_v57 = vsel %vm1933_vm8, %v2223_v31, 0.0 }
 0x500   : > { %3327 = vmatpush3.bf16.msra.mxu1 %v3929_v11  ;;  %3328 = vmatprep.mubr.msk.bf16.mxu1 %vm4530_vm0, %v3447_v0  ;;  %v4038_v6 = vsel %vm2102_vm13, %v4011_v59, 0.0  ;;  %v4053_v10 = vsel %vm4535_vm15, %v4011_v59, 0.0  ;;  %v2160_v11 = vsel %vm1933_vm8, %v2148_v5, 0.0  ;;  %v4069_v26 = vsel %vm4533_vm5, %v4011_v59, 0.0 }
 0x501   : > { %v3419_v58 = vpop.eup %3418  ;;  %vm2254_vm0 = vcmp.eq.s32.totalorder %v3807_v1, 2  ;;  %vm2293_vm5 = vcmp.eq.s32.totalorder %v3809_v2, 3  ;;  %v4128_v41 = vsel %vm2292_vm3, %v4011_v59, 0.0  ;;  %vm2331_vm15 = vcmp.eq.s32.totalorder %v3809_v2, 4 }
 0x502   : > { %v4014_v60 = vmul.f32 %v3419_v58, %v3915_v49  ;;  %2123 = vadd.xlane.f32.xlu0 %v2122_v51  ;;  %2088 = vadd.xlane.f32.xlu1 %v2087_v61  ;;  %v3421_v9 = vpop.eup %3420  ;;  %v4108_v14 = vsel %vm2254_vm0, %v4011_v59, 0.0  ;;  %v2236_v56 = vsel %vm1933_vm8, %v2224_v46, 0.0  ;;  %v2260_v58 = vsel %vm2254_vm0, %v3936_v24, 0.0 }
 0x503   : > { %v3423_v25 = vpop.eup %3422  ;;  %v4072_v32 = vmul.f32 %v3421_v9, %v3893_v3  ;;  %v4088_v3 = vsel %vm2216_vm7, %v4011_v59, 0.0  ;;  %v2225_v51 = vsel %vm2217_vm1, %v3983_v23, 0.0  ;;  %v2268_v61 = vsel %vm1933_vm8, %v2260_v58, 0.0 }
 0x504   : > { %v2025_v53 = vpack.c.bf16 %v4014_v60, %v4011_v59  ;;  %v4029_v49 = vsel %vm2065_vm12, %v4014_v60, 0.0  ;;  %v4048_v8 = vsel %vm2103_vm4, %v4014_v60, 0.0  ;;  %v4059_v17 = vsel %vm4534_vm14, %v4014_v60, 0.0 }
 0x505   : > { %v4081_v34 = vsel %vm2179_vm6, %v4014_v60, 0.0  ;;  %v4096_v29 = vsel %vm2217_vm1, %v4014_v60, 0.0  ;;  %v4099_v30 = vmul.f32 %v3423_v25, %v3897_v15  ;;  %v4116_v15 = vsel %vm2255_vm2, %v4014_v60, 0.0 }
 0x506   : > { %2155 = vadd.xlane.f32.xlu0 %v2154_v22  ;;  %2120 = vadd.xlane.f32.xlu1 %v2119_v4  ;;  %v4121_v35 = vsel %vm2292_vm3, %v4072_v32, 0.0  ;;  %vm2330_vm14 = vcmp.eq.s32.totalorder %v3807_v1, 4  ;;  %v4135_v44 = vsel %vm2293_vm5, %v4014_v60, 0.0  ;;  %v4162_v38 = vsel %vm2331_vm15, %v4014_v60, 0.0 }
 0x507   : > { %3329 = vmatmul.mubr.msk.bf16.vlgmr.msra.gmra.mrb[20].mxu1 %vm1933_vm8, %v2025_v53  ;;  %v4140_v47 = vsel %vm2330_vm14, %v4072_v32, 0.0  ;;  %v4149_v55 = vsel %vm2331_vm15, %v4099_v30, 0.0  ;;  %v4154_v36 = vsel %vm2330_vm14, %v4011_v59, 0.0  ;;  %v2024_v18 = vpack.c.bf16 %v4099_v30, %v4072_v32 }
 0x508   : > { %v2239_v62 = vsel %vm1933_vm8, %v2225_v51, 0.0  ;;  %v2262_v52 = vsel %vm2254_vm0, %v3948_v27, 0.0  ;;  %v2261_v53 = vsel %vm2255_vm2, %v3944_v13, 0.0  ;;  %v2298_v5 = vsel %vm2292_vm3, %v3936_v24, 0.0 }
 0x509   : > { %v2274_v22 = vsel %vm1933_vm8, %v2262_v52, 0.0  ;;  %v2271_v4 = vsel %vm1933_vm8, %v2261_v53, 0.0  ;;  %v2263_v7 = vsel %vm2255_vm2, %v3983_v23, 0.0  ;;  %v2306_v9 = vsel %vm1933_vm8, %v2298_v5, 0.0 }
 0x50a   : > { %2161 = vadd.xlane.f32.xlu0 %v2160_v11  ;;  %2126 = vadd.xlane.f32.xlu1 %v2125_v21  ;;  %v2277_v11 = vsel %vm1933_vm8, %v2263_v7, 0.0  ;;  %v2300_v21 = vsel %vm2292_vm3, %v3948_v27, 0.0  ;;  %v2299_v20 = vsel %vm2293_vm5, %v3944_v13, 0.0  ;;  %v2074_v37 = vsel %vm2064_vm10, %v4072_v32, 0.0 }
 0x50b   : > { %v2312_v25 = vsel %vm1933_vm8, %v2300_v21, 0.0  ;;  %v2309_v12 = vsel %vm1933_vm8, %v2299_v20, 0.0  ;;  %v2075_v31 = vsel %vm2065_vm12, %v4099_v30, 0.0  ;;  %v2038_v58 = vsel %vm2026_vm9, %v4011_v59, 0.0 }
 0x50c   : > { %v2339_v51 = vsel %vm2331_vm15, %v3983_v23, 0.0  ;;  %v2039_v52 = vsel %vm2027_vm11, %v4014_v60, 0.0  ;;  %v2113_v60 = vsel %vm2103_vm4, %v4099_v30, 0.0  ;;  %v2134_v5 = vsel %vm1933_vm8, %v4038_v6, 0.0 }
 0x50d   : > { %v2131_v7 = vsel %vm1933_vm8, %v2113_v60, 0.0  ;;  %vm4538_vm3 = vcmp.eq.s32.totalorder %v3807_v1, 4294967295  ;;  %v2172_v6 = vsel %vm1933_vm8, %v4053_v10, 0.0  ;;  %v2210_v10 = vsel %vm1933_vm8, %v4069_v26, 0.0 }
 0x50e   : > { %2193 = vadd.xlane.f32.xlu0 %v2192_v16  ;;  %2164 = vadd.xlane.f32.xlu1 %v2163_v28  ;;  %v2336_v16 = vsel %vm2330_vm14, %v3936_v24, 0.0  ;;  %v2301_v28 = vsel %vm2293_vm5, %v3983_v23, 0.0  ;;  %v2112_v23 = vsel %vm2102_vm13, %v4072_v32, 0.0  ;;  %v2248_v26 = vsel %vm1933_vm8, %v4088_v3, 0.0 }
 0x50f   : > { %v2344_v43 = vsel %vm1933_vm8, %v2336_v16, 0.0  ;;  %v2315_v33 = vsel %vm1933_vm8, %v2301_v28, 0.0  ;;  %v2189_v16 = vsel %vm2179_vm6, %v4099_v30, 0.0  ;;  %v2286_v3 = vsel %vm1933_vm8, %v4108_v14, 0.0 }
 0x510   : > { %v2207_v28 = vsel %vm1933_vm8, %v2189_v16, 0.0  ;;  %vm2386_vm12 = vcmask 23552   ;;  %vm2395_vm13 = vcmask 31744   ;;  %vm2412_vm4 = vcmask 48128  }
 0x511   : > { %vm2421_vm6 = vcmask 56320  }
 0x512   : > { %2199 = vadd.xlane.f32.xlu0 %v2198_v42  ;;  %2196 = vadd.xlane.f32.xlu1 %v2195_v48  ;;  %v2036_v42 = vsel %vm2026_vm9, %v4072_v32, 0.0  ;;  %v2337_v48 = vsel %vm2331_vm15, %v3944_v13, 0.0  ;;  %v2338_v13 = vsel %vm2330_vm14, %v3948_v27, 0.0  ;;  %v2058_v27 = vsel %vm1933_vm8, %v2038_v58, 0.0 }
 0x513   : > { %v2052_v24 = vsel %vm1933_vm8, %v2036_v42, 0.0  ;;  %v2347_v54 = vsel %vm1933_vm8, %v2337_v48, 0.0  ;;  %vm4539_vm9 = vcmp.eq.s32.totalorder %v3809_v2, 4294967295  ;;  %v2227_v42 = vsel %vm2217_vm1, %v4099_v30, 0.0 }
 0x514   : > { %v2151_v21 = vsel %vm4539_vm9, %v4099_v30, 0.0  ;;  %v2245_v48 = vsel %vm1933_vm8, %v2227_v42, 0.0  ;;  %v2359_v2 = vsel %vm1933_vm8, %v4149_v55, 0.0  ;;  %vm2462_vm1 = vcmask 1043456  }
 0x515   : > { %v2169_v20 = vsel %vm1933_vm8, %v2151_v21, 0.0  ;;  %vm4541_vm14 = vcmask 39936  }
 0x516   : > { %2231 = vadd.xlane.f32.xlu0 %v2230_v19  ;;  %2202 = vadd.xlane.f32.xlu1 %v2201_v45  ;;  %v2037_v19 = vsel %vm2027_vm11, %v4099_v30, 0.0  ;;  %v2090_v45 = vsel %vm1933_vm8, %v2074_v37, 0.0  ;;  %v2265_v37 = vsel %vm2255_vm2, %v4099_v30, 0.0  ;;  %vm2463_vm2 = vcmask 1044480   ;;  %vm4542_vm15 = vmmov %vm4541_vm14 }
 0x517   : > { %v2055_v46 = vsel %vm1933_vm8, %v2037_v19, 0.0  ;;  %v2283_v19 = vsel %vm1933_vm8, %v2265_v37, 0.0  ;;  %vm2377_vm11 = vcmask 15360  }
 0x51a   : > { %2237 = vadd.xlane.f32.xlu0 %v2236_v56  ;;  %2234 = vadd.xlane.f32.xlu1 %v2233_v57  ;;  %v2350_v56 = vsel %vm1933_vm8, %v2338_v13, 0.0  ;;  %v2093_v57 = vsel %vm1933_vm8, %v2075_v31, 0.0  ;;  %v2324_v13 = vsel %vm1933_vm8, %v4128_v41, 0.0  ;;  %v2362_v31 = vsel %vm1933_vm8, %v4154_v36, 0.0 }
 0x51b   : > { %v2365_v41 = vsel %vm1933_vm8, %v4162_v38, 0.0 }
 0x51e   : > { %2269 = vadd.xlane.f32.xlu0 %v2268_v61  ;;  %2240 = vadd.xlane.f32.xlu1 %v2239_v62  ;;  %v2353_v61 = vsel %vm1933_vm8, %v2339_v51, 0.0  ;;  %v2076_v62 = vsel %vm2064_vm10, %v4011_v59, 0.0  ;;  %v2099_v59 = vsel %vm1933_vm8, %v4029_v49, 0.0  ;;  %v2137_v49 = vsel %vm1933_vm8, %v4048_v8, 0.0 }
 0x51f   : > { %v2096_v53 = vsel %vm1933_vm8, %v2076_v62, 0.0  ;;  %vm4540_vm10 = vcmp.eq.s32.totalorder %v3807_v1, 0  ;;  %v2175_v8 = vsel %vm1933_vm8, %v4059_v17, 0.0  ;;  %v2213_v17 = vsel %vm1933_vm8, %v4081_v34, 0.0 }
 0x520   : > { %v2251_v34 = vsel %vm1933_vm8, %v4096_v29, 0.0  ;;  %v2157_v1 = vsel %vm1933_vm8, %v3988_v40, 0.0  ;;  %v2303_v29 = vsel %vm2293_vm5, %v4099_v30, 0.0  ;;  %v2327_v40 = vsel %vm1933_vm8, %v4135_v44, 0.0  ;;  %vm4543_vm5 = vmmov %vm4541_vm14 }
 0x521   : > { %v2321_v14 = vsel %vm1933_vm8, %v2303_v29, 0.0 }
 0x522   : > { %2275 = vadd.xlane.f32.xlu0 %v2274_v22  ;;  %2272 = vadd.xlane.f32.xlu1 %v2271_v4  ;;  %v2061_v22 = vsel %vm1933_vm8, %v2039_v52, 0.0  ;;  %v2128_v4 = vsel %vm1933_vm8, %v2112_v23, 0.0 }
 0x526   : > { %2307 = vadd.xlane.f32.xlu0 %v2306_v9  ;;  %2278 = vadd.xlane.f32.xlu1 %v2277_v11  ;;  %v2150_v9 = vsel %vm4538_vm3, %v4072_v32, 0.0 }
 0x527   : > { %v2166_v11 = vsel %vm1933_vm8, %v2150_v9, 0.0 }
 0x52a   : > { %2313 = vadd.xlane.f32.xlu0 %v2312_v25  ;;  %2310 = vadd.xlane.f32.xlu1 %v2309_v12  ;;  %v2188_v25 = vsel %vm4540_vm10, %v4072_v32, 0.0  ;;  %vm4547_vm10 = vmmov %vm4543_vm5 }
 0x52b   : > { %v2204_v12 = vsel %vm1933_vm8, %v2188_v25, 0.0 }
 0x52e   : > { %2345 = vadd.xlane.f32.xlu0 %v2344_v43  ;;  %2316 = vadd.xlane.f32.xlu1 %v2315_v33  ;;  %v2226_v43 = vsel %vm2216_vm7, %v4072_v32, 0.0  ;;  %vm4544_vm7 = vcmask 64512  }
 0x52f   : > { %v2242_v33 = vsel %vm1933_vm8, %v2226_v43, 0.0  ;;  %vm4545_vm3 = vmmov %vm4544_vm7 }
 0x530   : > { %vm4546_vm9 = vmmov %vm4545_vm3 }
 0x532   : > { %2053 = vadd.xlane.f32.xlu0 %v2052_v24  ;;  %2348 = vadd.xlane.f32.xlu1 %v2347_v54  ;;  %v2264_v24 = vsel %vm2254_vm0, %v4072_v32, 0.0  ;;  %vm2368_vm0 = vcmask 7168  }
 0x533   : > { %v2280_v54 = vsel %vm1933_vm8, %v2264_v24, 0.0 }
 0x536   : > { %2091 = vadd.xlane.f32.xlu0 %v2090_v45  ;;  %2056 = vadd.xlane.f32.xlu1 %v2055_v46  ;;  %v2289_v45 = vsel %vm1933_vm8, %v4116_v15, 0.0  ;;  %v2318_v46 = vsel %vm1933_vm8, %v4121_v35, 0.0  ;;  %v2356_v15 = vsel %vm1933_vm8, %v4140_v47, 0.0  ;;  %v3389_v47 = vld [vmem:[%s4525_s5] sm:$0x1f]  }
 0x53a   : > { %2351 = vadd.xlane.f32.xlu0 %v2350_v56  ;;  %2094 = vadd.xlane.f32.xlu1 %v2093_v57  ;;  %v3462_v57 = vmov 65535  }
 0x53b   : > { %v2464_v58 = vsel %vm2462_vm1, 4294967295, %v3462_v57  ;;  %vm4548_vm1 = vmmov %vm4545_vm3 }
 0x53c   : > { %v2465_v51 = vsel %vm2463_vm2, %v2464_v58, 0  ;;  %vm2449_vm2 = vcmask 72704  }
 0x53e   : > { %2059 = vadd.xlane.f32.xlu0 %v2058_v27  ;;  %2354 = vadd.xlane.f32.xlu1 %v2353_v61  ;;  %v2467_v27 = vand.u32 %v3389_v47, %v2465_v51 }
 0x540   : > { %3298 = vmatprep.subr.bf16.mxu0 %v2467_v27 }
 0x541   : > { %3299 = vmatpush3.bf16.msra.mxu0 %v2467_v27 }
 0x542   : > { %2097 = vadd.xlane.f32.xlu0 %v2096_v53  ;;  %2062 = vadd.xlane.f32.xlu1 %v2061_v22 }
 0x543   : > { %3320 = vmatprep.subr.bf16.mxu0 %v3447_v0 }
 0x546   : > { %2129 = vadd.xlane.f32.xlu0 %v2128_v4  ;;  %2100 = vadd.xlane.f32.xlu1 %v2099_v59 }
 0x54a   : > { %2135 = vadd.xlane.f32.xlu0 %v2134_v5  ;;  %2132 = vadd.xlane.f32.xlu1 %v2131_v7 }
 0x54e   : > { %2167 = vadd.xlane.f32.xlu0 %v2166_v11  ;;  %2138 = vadd.xlane.f32.xlu1 %v2137_v49 }
 0x552   : > { %2173 = vadd.xlane.f32.xlu0 %v2172_v6  ;;  %2170 = vadd.xlane.f32.xlu1 %v2169_v20 }
 0x556   : > { %2205 = vadd.xlane.f32.xlu0 %v2204_v12  ;;  %2176 = vadd.xlane.f32.xlu1 %v2175_v8 }
 0x55a   : > { %2211 = vadd.xlane.f32.xlu0 %v2210_v10  ;;  %2208 = vadd.xlane.f32.xlu1 %v2207_v28 }
 0x55e   : > { %2243 = vadd.xlane.f32.xlu0 %v2242_v33  ;;  %2214 = vadd.xlane.f32.xlu1 %v2213_v17 }
 0x562   : > { %2249 = vadd.xlane.f32.xlu0 %v2248_v26  ;;  %2246 = vadd.xlane.f32.xlu1 %v2245_v48 }
 0x566   : > { %2281 = vadd.xlane.f32.xlu0 %v2280_v54  ;;  %2252 = vadd.xlane.f32.xlu1 %v2251_v34 }
 0x56a   : > { %2287 = vadd.xlane.f32.xlu0 %v2286_v3  ;;  %2284 = vadd.xlane.f32.xlu1 %v2283_v19 }
 0x56e   : > { %2158 = vadd.xlane.f32.xlu0 %v2157_v1  ;;  %2290 = vadd.xlane.f32.xlu1 %v2289_v45 }
 0x572   : > { %2319 = vadd.xlane.f32.xlu0 %v2318_v46  ;;  %2322 = vadd.xlane.f32.xlu1 %v2321_v14 }
 0x576   : > { %2325 = vadd.xlane.f32.xlu0 %v2324_v13  ;;  %2328 = vadd.xlane.f32.xlu1 %v2327_v40 }
 0x57a   : > { %2357 = vadd.xlane.f32.xlu0 %v2356_v15  ;;  %2360 = vadd.xlane.f32.xlu1 %v2359_v2 }
 0x57b   : > { %v2042_v35 = vpop.xlane.xlu0 %2041 }
 0x57e   : > { %v2045_v56 = vpop.xlane.xlu1 %2044  ;;  %2363 = vadd.xlane.f32.xlu0 %v2362_v31  ;;  %2366 = vadd.xlane.f32.xlu1 %v2365_v41 }
 0x57f   : > { %v2080_v44 = vpop.xlane.xlu0 %2079 }
 0x580   : > { %v2369_v55 = vsel %vm2368_vm0, %v2042_v35, %v2080_v44 }
 0x582   : > { %v2083_v36 = vpop.xlane.xlu1 %2082 }
 0x583   : > { %v2370_v61 = vsel %vm2368_vm0, %v2045_v56, %v2083_v36  ;;  %v2048_v62 = vpop.xlane.xlu0 %2047 }
 0x587   : > { %v2086_v38 = vpop.xlane.xlu0 %2085 }
 0x588   : > { %v2371_v52 = vsel %vm2368_vm0, %v2048_v62, %v2086_v38 }
 0x58b   : > { %v2118_v53 = vpop.xlane.xlu0 %2117  ;;  %v2051_v23 = vpop.xlane.xlu1 %2050 }
 0x58c   : > { %v2378_v22 = vsel %vm2377_vm11, %v2369_v55, %v2118_v53 }
 0x58f   : > { %v2124_v4 = vpop.xlane.xlu0 %2123  ;;  %v2089_v60 = vpop.xlane.xlu1 %2088 }
 0x590   : > { %v2380_v59 = vsel %vm2377_vm11, %v2371_v52, %v2124_v4  ;;  %v2372_v5 = vsel %vm2368_vm0, %v2051_v23, %v2089_v60 }
 0x593   : > { %v2156_v7 = vpop.xlane.xlu0 %2155  ;;  %v2121_v11 = vpop.xlane.xlu1 %2120 }
 0x594   : > { %v2387_v9 = vsel %vm2386_vm12, %v2378_v22, %v2156_v7  ;;  %v4350_v49 = vsel %vm2377_vm11, %v2370_v61, %v2121_v11 }
 0x597   : > { %v2162_v21 = vpop.xlane.xlu0 %2161  ;;  %v2127_v20 = vpop.xlane.xlu1 %2126 }
 0x598   : > { %v2389_v6 = vsel %vm2386_vm12, %v2380_v59, %v2162_v21  ;;  %v2381_v25 = vsel %vm2377_vm11, %v2372_v5, %v2127_v20 }
 0x59b   : > { %v2194_v12 = vpop.xlane.xlu0 %2193  ;;  %v2165_v16 = vpop.xlane.xlu1 %2164 }
 0x59c   : > { %v2396_v8 = vsel %vm2395_vm13, %v2387_v9, %v2194_v12  ;;  %v2390_v10 = vsel %vm2386_vm12, %v2381_v25, %v2165_v16 }
 0x59f   : > { %v2200_v28 = vpop.xlane.xlu0 %2199  ;;  %v4357_v33 = vpop.xlane.xlu1 %2196 }
 0x5a0   : > { %v2398_v43 = vsel %vm2395_vm13, %v2389_v6, %v2200_v28 }
 0x5a3   : > { %v2232_v17 = vpop.xlane.xlu0 %2231  ;;  %v2203_v26 = vpop.xlane.xlu1 %2202 }
 0x5a4   : > { %v2404_v42 = vsel %vm4541_vm14, %v2396_v8, %v2232_v17  ;;  %v2399_v48 = vsel %vm2395_vm13, %v2390_v10, %v2203_v26  ;;  %vm4549_vm14 = vmmov %vm4543_vm5 }
 0x5a7   : > { %v2238_v24 = vpop.xlane.xlu0 %2237  ;;  %v4362_v34 = vpop.xlane.xlu1 %2234 }
 0x5a8   : > { %v2406_v54 = vsel %vm4542_vm15, %v2398_v43, %v2238_v24  ;;  %vm4550_vm15 = vmmov %vm4543_vm5 }
 0x5ab   : > { %v2270_v37 = vpop.xlane.xlu0 %2269  ;;  %v2241_v19 = vpop.xlane.xlu1 %2240 }
 0x5ac   : > { %v2413_v3 = vsel %vm2412_vm4, %v2404_v42, %v2270_v37  ;;  %v2407_v1 = vsel %vm4543_vm5, %v2399_v48, %v2241_v19 }
 0x5af   : > { %v2276_v45 = vpop.xlane.xlu0 %2275  ;;  %v4367_v46 = vpop.xlane.xlu1 %2272 }
 0x5b0   : > { %v2415_v29 = vsel %vm2412_vm4, %v2406_v54, %v2276_v45 }
 0x5b3   : > { %v2308_v14 = vpop.xlane.xlu0 %2307  ;;  %v2279_v40 = vpop.xlane.xlu1 %2278 }
 0x5b4   : > { %v2422_v13 = vsel %vm2421_vm6, %v2413_v3, %v2308_v14  ;;  %v2416_v15 = vsel %vm2412_vm4, %v2407_v1, %v2279_v40 }
 0x5b7   : > { %v2314_v2 = vpop.xlane.xlu0 %2313  ;;  %v2311_v31 = vpop.xlane.xlu1 %2310 }
 0x5b8   : > { %v2424_v35 = vsel %vm2421_vm6, %v2415_v29, %v2314_v2 }
 0x5bb   : > { %v2346_v56 = vpop.xlane.xlu0 %2345  ;;  %v2317_v44 = vpop.xlane.xlu1 %2316 }
 0x5bc   : > { %v4373_v41 = vsel %vm4544_vm7, %v2422_v13, %v2346_v56  ;;  %v2425_v47 = vsel %vm2421_vm6, %v2416_v15, %v2317_v44  ;;  %vm4553_vm7 = vmmov %vm4543_vm5 }
 0x5bf   : > { %v2054_v55 = vpop.xlane.xlu0 %2053  ;;  %v2349_v57 = vpop.xlane.xlu1 %2348 }
 0x5c3   : > { %v2092_v58 = vpop.xlane.xlu0 %2091  ;;  %v2057_v36 = vpop.xlane.xlu1 %2056 }
 0x5c4   : > { %v4376_v51 = vpop.f32.mrb[12].mxu1 }
 0x5c5   : > { %v3312_v27 = vpop.f32.mrb[13].mxu1 }
 0x5c6   : > { %v4378_v61 = vpop.f32.mrb[14].mxu1 }
 0x5c7   : > { %v3313_v62 = vpop.f32.mrb[15].mxu1  ;;  %v2352_v38 = vpop.xlane.xlu0 %2351 }
 0x5c8   : > { %v2095_v52 = vpop.xlane.xlu1 %2094  ;;  %v2432_v23 = vsel %vm4545_vm3, %v2424_v35, %v2352_v38  ;;  %vm4556_vm3 = vmmov 0  }
 0x5cb   : > { %v2060_v53 = vpop.xlane.xlu0 %2059 }
 0x5cc   : > { %v2355_v22 = vpop.xlane.xlu1 %2354 }
 0x5cd   : > { %v2433_v4 = vsel %vm4546_vm9, %v2425_v47, %v2355_v22  ;;  %v2373_v22 = vsel %vm2368_vm0, %v2054_v55, %v2092_v58 }
 0x5ce   : > { %v2439_v59 = vpack.c.bf16 %v2433_v4, %v2432_v23 }
 0x5cf   : > { %v2098_v60 = vpop.xlane.xlu0 %2097 }
 0x5d0   : > { %v2063_v5 = vpop.xlane.xlu1 %2062  ;;  %v2375_v55 = vsel %vm2368_vm0, %v2060_v53, %v2098_v60 }
 0x5d2   : > { %v4382_v7 = vpop.f32.mrb[16].mxu1 }
 0x5d3   : > { %v3318_v9 = vpop.f32.mrb[17].mxu1  ;;  %v2130_v11 = vpop.xlane.xlu0 %2129 }
 0x5d4   : > { %v4384_v21 = vpop.f32.mrb[18].mxu1  ;;  %v2101_v6 = vpop.xlane.xlu1 %2100  ;;  %v2382_v4 = vsel %vm2377_vm11, %v2373_v22, %v2130_v11 }
 0x5d5   : > { %v3319_v20 = vpop.f32.mrb[19].mxu1 }
 0x5d7   : > { %v2136_v25 = vpop.xlane.xlu0 %2135 }
 0x5d8   : > { %v2133_v12 = vpop.xlane.xlu1 %2132 }
 0x5da   : > { %v4386_v8 = vpop.f32.mrb[20].mxu1 }
 0x5db   : > { %v3330_v16 = vpop.f32.mrb[21].mxu1  ;;  %v2168_v10 = vpop.xlane.xlu0 %2167 }
 0x5dc   : > { %v4388_v28 = vpop.f32.mrb[22].mxu1  ;;  %v2139_v43 = vpop.xlane.xlu1 %2138  ;;  %v2391_v9 = vsel %vm2386_vm12, %v2382_v4, %v2168_v10 }
 0x5dd   : > { %v3331_v17 = vpop.f32.mrb[23].mxu1 }
 0x5df   : > { %v2174_v42 = vpop.xlane.xlu0 %2173 }
 0x5e0   : > { %v2171_v26 = vpop.xlane.xlu1 %2170 }
 0x5e3   : > { %v2206_v48 = vpop.xlane.xlu0 %2205 }
 0x5e4   : > { %v2177_v24 = vpop.xlane.xlu1 %2176 }
 0x5e7   : > { %v2212_v54 = vpop.xlane.xlu0 %2211 }
 0x5e8   : > { %v2209_v37 = vpop.xlane.xlu1 %2208 }
 0x5eb   : > { %v2244_v3 = vpop.xlane.xlu0 %2243 }
 0x5ec   : > { %v2215_v19 = vpop.xlane.xlu1 %2214 }
 0x5ef   : > { %v2250_v1 = vpop.xlane.xlu0 %2249 }
 0x5f0   : > { %v2247_v45 = vpop.xlane.xlu1 %2246 }
 0x5f3   : > { %v2282_v29 = vpop.xlane.xlu0 %2281 }
 0x5f4   : > { %v2253_v14 = vpop.xlane.xlu1 %2252 }
 0x5f7   : > { %v2288_v13 = vpop.xlane.xlu0 %2287 }
 0x5f8   : > { %v2285_v40 = vpop.xlane.xlu1 %2284 }
 0x5fb   : > { %v2159_v15 = vpop.xlane.xlu0 %2158 }
 0x5fc   : > { %v2388_v2 = vsel %vm2386_vm12, %v4350_v49, %v2159_v15  ;;  %v2291_v35 = vpop.xlane.xlu1 %2290  ;;  %v2374_v49 = vsel %vm2368_vm0, %v2057_v36, %v2095_v52  ;;  %v2384_v36 = vsel %vm2377_vm11, %v2375_v55, %v2136_v25 }
 0x5fd   : > { %v2397_v56 = vsel %vm2395_vm13, %v2388_v2, %v4357_v33  ;;  %v2393_v53 = vsel %vm2386_vm12, %v2384_v36, %v2174_v42 }
 0x5fe   : > { %v2405_v44 = vsel %vm4547_vm10, %v2397_v56, %v4362_v34  ;;  %v2383_v34 = vsel %vm2377_vm11, %v2374_v49, %v2133_v12  ;;  %vm3010_vm10 = vcmask 195584  }
 0x5ff   : > { %v2414_v47 = vsel %vm2412_vm4, %v2405_v44, %v4367_v46  ;;  %v2320_v27 = vpop.xlane.xlu0 %2319  ;;  %v2392_v20 = vsel %vm2386_vm12, %v2383_v34, %v2171_v26 }
 0x600   : > { %v2323_v62 = vpop.xlane.xlu1 %2322  ;;  %v2423_v38 = vsel %vm2421_vm6, %v2414_v47, %v2311_v31  ;;  %v2400_v31 = vsel %vm2395_vm13, %v2391_v9, %v2206_v48 }
 0x601   : > { %v2431_v23 = vsel %vm4548_vm1, %v2423_v38, %v2349_v57  ;;  %v2401_v57 = vsel %vm2395_vm13, %v2392_v20, %v2209_v37  ;;  %v2408_v58 = vsel %vm4549_vm14, %v2400_v31, %v2244_v3 }
 0x602   : > { %v2438_v33 = vpack.c.bf16 %v2431_v23, %v4373_v41  ;;  %v2376_v41 = vsel %vm2368_vm0, %v2063_v5, %v2101_v6  ;;  %v2409_v52 = vsel %vm4550_vm15, %v2401_v57, %v2247_v45  ;;  %v2417_v11 = vsel %vm2412_vm4, %v2408_v58, %v2282_v29  ;;  %vm4551_vm0 = vmmov %vm4548_vm1 }
 0x603   : > { %v2326_v46 = vpop.xlane.xlu0 %2325  ;;  %v2385_v12 = vsel %vm2377_vm11, %v2376_v41, %v2139_v43  ;;  %v2418_v60 = vsel %vm2412_vm4, %v2409_v52, %v2285_v40  ;;  %v2426_v10 = vsel %vm2421_vm6, %v2417_v11, %v2320_v27  ;;  %v2402_v5 = vsel %vm2395_vm13, %v2393_v53, %v2212_v54  ;;  %vm4552_vm11 = vmmov %vm4551_vm0 }
 0x604   : > { %v2329_v16 = vpop.xlane.xlu1 %2328  ;;  %3300 = vmatprep.mubr.msk.bf16.mxu0 %vm2449_vm2, %v2438_v33  ;;  %v2427_v6 = vsel %vm2421_vm6, %v2418_v60, %v2323_v62  ;;  %v2410_v43 = vsel %vm4543_vm5, %v2402_v5, %v2250_v1  ;;  %vm4559_vm9 = vmmov %vm4551_vm0 }
 0x605   : > { %3301 = vmatmul.mubr.msk.bf16.vlgmr.msra.gmra.mrb[12].mxu0 %vm2449_vm2, %v2439_v59  ;;  %v2394_v59 = vsel %vm2386_vm12, %v2385_v12, %v2177_v24  ;;  %v2419_v37 = vsel %vm2412_vm4, %v2410_v43, %v2288_v13  ;;  %vm4554_vm12 = vmmov %vm4551_vm0 }
 0x606   : > { %3321 = vmatpush3.bf16.msra.mxu0 %v3931_v63  ;;  %v2403_v63 = vsel %vm2395_vm13, %v2394_v59, %v2215_v19  ;;  %v2428_v54 = vsel %vm2421_vm6, %v2419_v37, %v2326_v46  ;;  %vm4555_vm13 = vmmov %vm4551_vm0 }
 0x607   : > { %v2358_v17 = vpop.xlane.xlu0 %2357  ;;  %v2411_v48 = vsel %vm4553_vm7, %v2403_v63, %v2253_v14 }
 0x608   : > { %v2434_v25 = vsel %vm4551_vm0, %v2426_v10, %v2358_v17  ;;  %v2361_v26 = vpop.xlane.xlu1 %2360  ;;  %v2420_v24 = vsel %vm2412_vm4, %v2411_v48, %v2291_v35  ;;  %vm4557_vm4 = vcmask 261120  }
 0x609   : > { %v2435_v42 = vsel %vm4552_vm11, %v2427_v6, %v2361_v26  ;;  %v2429_v29 = vsel %vm2421_vm6, %v2420_v24, %v2329_v16  ;;  %vm4558_vm6 = vmmov %vm4551_vm0 }
 0x60a   : > { %v2440_v3 = vpack.c.bf16 %v2435_v42, %v2434_v25  ;;  %vm4560_vm1 = vmmov %vm4557_vm4 }
 0x60b   : > { %v2364_v45 = vpop.xlane.xlu0 %2363  ;;  %vm4562_vm14 = vmmov %vm4560_vm1 }
 0x60c   : > { %v2436_v40 = vsel %vm4554_vm12, %v2428_v54, %v2364_v45  ;;  %3304 = vmatprep.mubr.msk.bf16.mxu0 %vm2449_vm2, %v2440_v3  ;;  %v2367_v19 = vpop.xlane.xlu1 %2366 }
 0x60d   : > { %v2437_v1 = vsel %vm4555_vm13, %v2429_v29, %v2367_v19 }
 0x60e   : > { %v2441_v15 = vpack.c.bf16 %v2437_v1, %v2436_v40 }
 0x610   : > { %3305 = vmatmul.mubr.msk.bf16.gmra.mrb[16].mxu0 %vm2449_vm2, %v2441_v15  ;;  %vm4561_vm2 = vmmov %vm4560_vm1 }
 0x611   : > { %3322 = vmatprep.mubr.msk.bf16.mxu0 %vm4556_vm3, %v3447_v0 }
 0x618   : > { %3323 = vmatmul.mubr.msk.bf16.vlgmr.msra.gmra.mrb[20].mxu0 %vm1933_vm8, %v2024_v18 }
 0x6d8   : > { %v3302_v14 = vpop.f32.mrb[12].mxu0 }
 0x6d9   : > { %v2616_v13 = vadd.f32 %v3302_v14, %v4382_v7  ;;  %v2503_v2 = vpop.f32.mrb[13].mxu0 }
 0x6da   : > { %v2572_v35 = vadd.f32 %v4376_v51, %v2503_v2  ;;  %v3303_v56 = vpop.f32.mrb[14].mxu0 }
 0x6db   : > { %v2619_v44 = vadd.f32 %v3303_v56, %v4384_v21  ;;  %v2506_v47 = vpop.f32.mrb[15].mxu0 }
 0x6dc   : > { %v2575_v27 = vadd.f32 %v4378_v61, %v2506_v47 }
 0x6e3   : > { %v3306_v62 = vpop.f32.mrb[16].mxu0 }
 0x6e4   : > { %v2704_v0 = vadd.f32 %v3306_v62, %v4386_v8  ;;  %v2519_v38 = vpop.f32.mrb[17].mxu0 }
 0x6e5   : > { %v3307_v22 = vpop.f32.mrb[18].mxu0 }
 0x6e6   : > { %v2726_v32 = vcombine.low %v2616_v13, %v2704_v0  ;;  %v2727_v30 = vcombine.high %v2616_v13, %v2704_v0  ;;  %v2707_v18 = vadd.f32 %v3307_v22, %v4388_v28  ;;  %v2522_v23 = vpop.f32.mrb[19].mxu0 }
 0x6e8   : > { %v2794_v7 = vcombine.low %v2619_v44, %v2707_v18  ;;  %v2795_v49 = vcombine.high %v2619_v44, %v2707_v18  ;;  %v2734_v20 = vrot.slane %v2726_v32, %v3614_v39  ;;  %v2741_v8 = vrot.slane %v2727_v30, %v3614_v39 }
 0x6ea   : > { %v2802_v52 = vrot.slane %v2794_v7, %v3614_v39  ;;  %v2809_v11 = vrot.slane %v2795_v49, %v3614_v39 }
 0x6eb   : > { %v2659_v4 = vpop.f32.mrb[20].mxu0 }
 0x6ec   : > { %v2660_v51 = vadd.f32 %v2659_v4, %v2519_v38  ;;  %v3324_v33 = vpop.f32.mrb[21].mxu0 }
 0x6ed   : > { %v2662_v34 = vpop.f32.mrb[22].mxu0 }
 0x6ee   : > { %v2710_v21 = vcombine.low %v2572_v35, %v2660_v51  ;;  %v2711_v9 = vcombine.high %v2572_v35, %v2660_v51  ;;  %v2663_v46 = vadd.f32 %v2662_v34, %v2522_v23  ;;  %v3325_v61 = vpop.f32.mrb[23].mxu0 }
 0x6f0   : > { %v2718_v31 = vrot.slane %v2710_v21, %v3614_v39  ;;  %v2725_v16 = vrot.slane %v2711_v9, %v3614_v39  ;;  %v2778_v28 = vcombine.low %v2575_v27, %v2663_v46  ;;  %v2779_v55 = vcombine.high %v2575_v27, %v2663_v46 }
 0x6f2   : > { %v2742_v57 = vcombine.low %v2718_v31, %v2734_v20  ;;  %v2743_v58 = vcombine.high %v2718_v31, %v2734_v20  ;;  %v2758_v41 = vcombine.low %v2725_v16, %v2741_v8  ;;  %v2759_v36 = vcombine.high %v2725_v16, %v2741_v8  ;;  %v3390_v16 = vld [vmem:[%s4526_s6] sm:$0xff]  }
 0x6f3   : > { %v2786_v12 = vrot.slane %v2778_v28, %v3614_v39  ;;  %v2793_v53 = vrot.slane %v2779_v55, %v3614_v39  ;;  %3334 = vmatprep.mubr.msk.bf16.mxu0 %vm4557_vm4, %v3390_v16 }
 0x6f4   : > { %v2750_v60 = vrot.slane %v2742_v57, %v3627_v50  ;;  %v2757_v10 = vrot.slane %v2743_v58, %v3627_v50  ;;  %v2766_v17 = vrot.slane %v2758_v41, %v3627_v50  ;;  %v2773_v59 = vrot.slane %v2759_v36, %v3627_v50  ;;  %v3018_v58 = vld [vmem:[%s4527_s7] sm:$0xff]  ;;  %v3019_v41 = vld [vmem:[%s4527_s7 + $0x8] sm:$0xff]  ;;  %v3020_v36 = vld [vmem:[%s4527_s7 + $0x10] sm:$0xff] }
 0x6f5   : > { %v2810_v5 = vcombine.low %v2786_v12, %v2802_v52  ;;  %v2811_v6 = vcombine.high %v2786_v12, %v2802_v52  ;;  %v2826_v25 = vcombine.low %v2793_v53, %v2809_v11  ;;  %v2827_v26 = vcombine.high %v2793_v53, %v2809_v11  ;;  %v3021_v52 = vld [vmem:[%s4527_s7 + $0x18] sm:$0xff] }
 0x6f6   : > { %v2846_v63 = vcombine.low %v2750_v60, %v2757_v10  ;;  %v3216_v43 = vcombine.high %v2750_v60, %v2757_v10  ;;  %v2862_v42 = vcombine.low %v2766_v17, %v2773_v59  ;;  %v3217_v48 = vcombine.high %v2766_v17, %v2773_v59 }
 0x6f7   : > { %v2818_v37 = vrot.slane %v2810_v5, %v3627_v50  ;;  %v2825_v3 = vrot.slane %v2811_v6, %v3627_v50  ;;  %v2834_v24 = vrot.slane %v2826_v25, %v3627_v50  ;;  %v2841_v54 = vrot.slane %v2827_v26, %v3627_v50 }
 0x6f8   : > { %v2853_v45 = vrot.slane %v2846_v63, %v3614_v39  ;;  %v2861_v29 = vrot.slane %v3216_v43, %v3614_v39  ;;  %v2869_v40 = vrot.slane %v2862_v42, %v3614_v39  ;;  %v2877_v19 = vrot.slane %v3217_v48, %v3614_v39 }
 0x6f9   : > { %v2914_v1 = vcombine.low %v2818_v37, %v2825_v3  ;;  %v3218_v15 = vcombine.high %v2818_v37, %v2825_v3  ;;  %v2930_v14 = vcombine.low %v2834_v24, %v2841_v54  ;;  %v3219_v13 = vcombine.high %v2834_v24, %v2841_v54  ;;  %v3391_v24 = vld [vmem:[%s4526_s6 + $0x8] sm:$0xff]  }
 0x6fa   : > { %v2879_v2 = vcombine.high %v2853_v45, %v2861_v29  ;;  %v2895_v35 = vcombine.high %v2869_v40, %v2877_v19  ;;  %v2878_v56 = vcombine.low %v2853_v45, %v2861_v29  ;;  %v2894_v44 = vcombine.low %v2869_v40, %v2877_v19 }
 0x6fb   : > { %v2921_v47 = vrot.slane %v2914_v1, %v3614_v39  ;;  %v2929_v27 = vrot.slane %v3218_v15, %v3614_v39  ;;  %v2937_v62 = vrot.slane %v2930_v14, %v3614_v39  ;;  %v2945_v0 = vrot.slane %v3219_v13, %v3614_v39 }
 0x6fc   : > { %v2893_v38 = vrot.slane %v2879_v2, %v3627_v50  ;;  %v2909_v22 = vrot.slane %v2895_v35, %v3627_v50  ;;  %v2886_v32 = vrot.slane %v2878_v56, %v3627_v50  ;;  %v2902_v30 = vrot.slane %v2894_v44, %v3627_v50 }
 0x6fd   : > { %v2947_v18 = vcombine.high %v2921_v47, %v2929_v27  ;;  %v2963_v23 = vcombine.high %v2937_v62, %v2945_v0  ;;  %v2946_v7 = vcombine.low %v2921_v47, %v2929_v27  ;;  %v2962_v49 = vcombine.low %v2937_v62, %v2945_v0 }
 0x6fe   : > { %v2912_v4 = vcombine.low %v2893_v38, %v2909_v22  ;;  %v2911_v51 = vcombine.high %v2886_v32, %v2902_v30  ;;  %v2913_v33 = vcombine.high %v2893_v38, %v2909_v22  ;;  %v2910_v34 = vcombine.low %v2886_v32, %v2902_v30 }
 0x6ff   : > { %v2961_v21 = vrot.slane %v2947_v18, %v3627_v50  ;;  %v2977_v39 = vrot.slane %v2963_v23, %v3627_v50  ;;  %v2954_v9 = vrot.slane %v2946_v7, %v3627_v50  ;;  %v2970_v46 = vrot.slane %v2962_v49, %v3627_v50 }
 0x700   : > { %v3466_v50 = vmov 0  }
 0x701   : > { %v2980_v61 = vcombine.low %v2961_v21, %v2977_v39  ;;  %v2979_v20 = vcombine.high %v2954_v9, %v2970_v46  ;;  %v2981_v8 = vcombine.high %v2961_v21, %v2977_v39  ;;  %v2978_v31 = vcombine.low %v2954_v9, %v2970_v46  ;;  %3383 = vset.pattern.permute.xlu1 %v3466_v50 }
 0x702   : > { %3384 = vset.pattern.permute.xlu0 %v3466_v50 }
 0x703   : > { %v3373_v28 = vpack.i.bf16 %v2980_v61, %v2912_v4  ;;  %v3368_v55 = vpack.i.bf16 %v2979_v20, %v2911_v51  ;;  %v3378_v57 = vpack.i.bf16 %v2981_v8, %v2913_v33 }
 0x705   : > { %3374 = vrot.lane.b32.xlu1 %v3373_v28, %s3463_s22  ;;  %3369 = vrot.lane.b32.xlu0 %v3368_v55, %s3464_s23 }
 0x709   : > { %3379 = vrot.lane.b32.xlu1 %v3378_v57, %s3465_s24  ;;  %3029 = vperm.xlu0 %3384, %v3019_v41  }
 0x70d   : > { %3024 = vperm.xlu1 %3383, %v3018_v58  }
 0x711   : > { %3034 = vperm.xlu1 %3383, %v3020_v36  }
 0x715   : > { %3039 = vperm.xlu1 %3383, %v3021_v52  }
 0x777   : > { %v3375_v11 = vpop.permute.xlu1 %3374  ;;  %v3370_v12 = vpop.permute.xlu0 %3369 }
 0x778   : > { %v3372_v53 = vunpack.i.h.bf16 %v3370_v12  ;;  %v3371_v60 = vunpack.i.l.bf16 %v3370_v12  ;;  %v3377_v10 = vunpack.i.h.bf16 %v3375_v11  ;;  %v3376_v17 = vunpack.i.l.bf16 %v3375_v11 }
 0x77a   : > { %v3006_v59 = vsel %vm4558_vm6, %v2910_v34, %v3371_v60  ;;  %v3007_v5 = vsel %vm4559_vm9, %v2978_v31, %v3372_v53 }
 0x77b   : > { %v3380_v6 = vpop.permute.xlu1 %3379  ;;  %v3008_v63 = vsel %vm1933_vm8, %v3006_v59, %v3376_v17  ;;  %v3009_v43 = vsel %vm1933_vm8, %v3007_v5, %v3377_v10 }
 0x77c   : > { %v3382_v25 = vunpack.i.h.bf16 %v3380_v6  ;;  %v3381_v26 = vunpack.i.l.bf16 %v3380_v6 }
 0x77e   : > { %v3011_v42 = vsel %vm3010_vm10, %v3008_v63, %v3381_v26  ;;  %v3012_v48 = vsel %vm3010_vm10, %v3009_v43, %v3382_v25 }
 0x77f   : > { %v3013_v37 = vpack.c.bf16 %v3012_v48, %v3011_v42 }
 0x781   : > { %3338 = vmatprep.subr.msk.bf16.mxu0 %vm4560_vm1, %v3013_v37  ;;  %v3059_v3 = vsel %vm4561_vm2, %v3013_v37, 0 }
 0x782   : > { %3333 = vmatpush3.bf16.xpose.msra.mxu0 %v3059_v3 }
 0x788   : > { %v3030_v1 = vpop.permute.xlu0 %3029 }
 0x789   : > { %3335 = vmatmul.mubr.msk.bf16.vlgmr.msra.gmra.mrb[24].mxu0 %vm4562_vm14, %v3391_v24 }
 0x78c   : > { %v3025_v54 = vpop.permute.xlu1 %3024 }
 0x790   : > { %v3035_v45 = vpop.permute.xlu1 %3034 }
 0x794   : > { %v3040_v15 = vpop.permute.xlu1 %3039 }
 0x85c   : > { %v3336_v29 = vpop.f32.mrb[24].mxu0 }
 0x85d   : > { %v3104_v40 = vadd.f32 %v3336_v29, %v3035_v45  ;;  %v3095_v19 = vpop.f32.mrb[25].mxu0 }
 0x85e   : > { %v3096_v14 = vadd.f32 %v3095_v19, %v3025_v54  ;;  %v3337_v13 = vpop.f32.mrb[26].mxu0 }
 0x85f   : > { %3112 = vst.msk [vmem:[%s285_s18 + $0x10] sm:$0xff] %vm1933_vm8, %v3104_v40  ;;  %v3107_v2 = vadd.f32 %v3337_v13, %v3040_v15  ;;  %v3098_v35 = vpop.f32.mrb[27].mxu0 }
 0x860   : > { %3110 = vst.msk [vmem:[%s285_s18] sm:$0xff] %vm1933_vm8, %v3096_v14  ;;  %v3099_v56 = vadd.f32 %v3098_v35, %v3030_v1 }
 0x861   : > { %3113 = vst.msk [vmem:[%s285_s18 + $0x18] sm:$0xff] %vm1933_vm8, %v3107_v2 }
 0x862   : > { %3111 = vst.msk [vmem:[%s285_s18 + $0x8] sm:$0xff] %vm1933_vm8, %v3099_v56 }
 0x863 PF: > { %s24_s10 = sadd.s32 1, %s3444_s10  }
 0x864   : > { %p21_p9 = scmp.ge.s32.totalorder %s24_s10, 4  }
 0x866   :  { %23 = sbr.rel (!%p21_p9) target bundleno = 16 (0x10), region = 78 }

// kernel: relative_mha_forward.1
= control target key start
LH: loop header
LB: loop body
LE: loop exit
PB: predicated region body
PF: predicated region fallthrough
CT: control target
= control target key end

     0   :  { %s5315_s0 = inlined_call_operand.vmem [shape: s32[2], index: 0, kind: input, shape index: {}]   ;;  %s5316_s1 = inlined_call_operand.vmem [shape: f32[2,32,16], index: 1, kind: input, shape index: {}]   ;;  %s5317_s2 = inlined_call_operand.vmem [shape: bf16[32,96], index: 2, kind: input, shape index: {}]   ;;  %s5318_s3 = inlined_call_operand.vmem [shape: f32[1,96], index: 3, kind: input, shape index: {}]   ;;  %s5319_s4 = inlined_call_operand.vmem [shape: bf16[32,36], index: 4, kind: input, shape index: {}]   ;;  %s5320_s5 = inlined_call_operand.vmem [shape: bf16[9,8], index: 5, kind: input, shape index: {}]   ;;  %s5321_s6 = inlined_call_operand.vmem [shape: bf16[32,32], index: 6, kind: input, shape index: {}]   ;;  %s5322_s7 = inlined_call_operand.vmem [shape: f32[32,1], index: 7, kind: input, shape index: {}]   ;;  %s5323_s8 = inlined_call_operand.vmem [shape: f32[2,32,16], index: 8, kind: output, shape index: {}]  }
   0x1   :  { %s13_s29 = sshll.u32 %s5315_s0, 4  ;;  %s14_s29 = int_to_ptr.vmem [resolvable:$true] %s13_s29 }
   0x2   :  { %s3825_s30 = scalar_lea.vmem %s14_s29, 16  ;;  %p3830_p1 = scmp.lt.s32.totalorder %s14_s29, %s14_s29 }
   0x3   :  { %p3826_p0 = scmp.ne.s32.totalorder %s14_s29, %s3825_s30  ;;  %p3831_p2 = scmp.lt.s32.totalorder %s3825_s30, %s3825_s30 }
   0x5   :  { %p3832_p3 = por %p3831_p2, %p3830_p1 }
   0x7   :  { %p3833_p4 = pnand %p3832_p3, %p3826_p0 }
   0x9   :  { %3836 = shalt.err (!%p3833_p4)  }
   0xa   :  { %s3847_s9 = smov [#allocation3]  }
   0xb   :  { %16 = dma.vmem_to_smem %s14_s29, 16, %s3847_s9, [#allocation2] }
   0xc   :  { %3841 = dma.done.wait [#allocation2], 16 }
   0xd   :  { %3842 = vsyncadd [#allocation2], 4294967280 }
   0xe   :  { %18 = sfence }
   0xf   :  { %s3921_s10 = smov 0  }
  0x10 LB: > { %s3927_s0 = sadd.s32 4294967295, %s3845_s10   ;;  %p3508_p5 = scmp.ge.s32.totalorder %s3845_s10, 1  ;;  %s3845_s10 = sphi %s3921_s10, %s24_s10  }
  0x11   : > { %p244_p6 = scmp.lt.s32.totalorder %s3845_s10, 3 }
  0x13   : > { %p245_p7 = pnand %p3508_p5, %p244_p6 }
  0x14   : > { %p276_p8 = scmp.lt.s32.totalorder (!%p245_p7), %s3927_s0, 1  ;;  %v3848_v0 = vmov (!%p245_p7), 0.0   ;;  %v3786_v1 = vld [vmem:[%s5317_s2] sm:$0xff] (!%p245_p7)   ;;  %v3787_v2 = vld [vmem:[%s5317_s2 + $0x8] sm:$0xff] (!%p245_p7)   ;;  %vm5326_vm0 = vmmov (!%p245_p7), 0   ;;  %vm5324_vm1 = vcmask (!%p245_p7), 261120   ;;  %v463_v32 = vlaneseq (!%p245_p7) }
  0x15   : > { %248 = sbr.rel (%p245_p7) target bundleno = 2217 (0x8a9), region = 48  ;;  %3591 = vmatprep.subr.bf16.mxu0 (!%p245_p7), %v3848_v0  ;;  %3599 = vmatprep.subr.bf16.mxu1 (!%p245_p7), %v3848_v0  ;;  %v3788_v10 = vld [vmem:[%s5319_s4] sm:$0xff] (!%p245_p7)   ;;  %v3789_v11 = vld [vmem:[%s5319_s4 + $0x8] sm:$0xff] (!%p245_p7)   ;;  %s3850_s26 = smov (!%p245_p7), 112   ;;  %v3855_v30 = vmov (!%p245_p7), 1983009808  }
  0x16   : > { %3595 = vmatprep.mubr.msk.bf16.mxu0 (!%p245_p7), %vm5326_vm0, %v3848_v0  ;;  %3603 = vmatprep.mubr.msk.bf16.mxu1 (!%p245_p7), %vm5326_vm0, %v3848_v0  ;;  %v3513_v12 = vld [vmem:[%s5318_s3] ss:$0 sm:$0xff] (!%p245_p7)  ;;  %s3851_s27 = smov (!%p245_p7), 120   ;;  %s3852_s28 = smov (!%p245_p7), 96   ;;  %v461_v31 = vunpack.c.l.s4 (!%p245_p7), %v3855_v30  ;;  %v4013_v34 = vshrl.u32 (!%p245_p7), %v463_v32, 7  ;;  %v3859_v45 = vmov (!%p245_p7), 0  }
  0x17   : > { %3592 = vmatpush3.bf16.msra.mxu0 (!%p245_p7), %v3786_v1  ;;  %3600 = vmatpush3.bf16.msra.mxu1 (!%p245_p7), %v3788_v10  ;;  %s3853_s29 = smov (!%p245_p7), 104   ;;  %s3854_s30 = smov (!%p245_p7), 119   ;;  %v3858_v36 = vmov (!%p245_p7), 1934713408   ;;  %vm5325_vm2 = vcmask (!%p245_p7), 64512   ;;  %vm2321_vm13 = vcmask (!%p245_p7), 130048  }
  0x18   : > { %3593 = vmatprep.subr.bf16.mxu0 (!%p245_p7), %v3848_v0  ;;  %3601 = vmatprep.subr.bf16.mxu1 (!%p245_p7), %v3848_v0  ;;  %s3856_s9 = smov (!%p245_p7), 110   ;;  %v462_v33 = vunpack.c.0.s8 (!%p245_p7), %v461_v31  ;;  %s3857_s11 = smov (!%p245_p7), 101   ;;  %v493_v37 = vunpack.c.l.s4 (!%p245_p7), %v3858_v36 }
  0x19   : > { %3707 = vset.pattern.permute.xlu1 (!%p245_p7), %v3859_v45  ;;  %s3868_s12 = smov (!%p245_p7), 64   ;;  %s2308_s14 = sld [smem:[#allocation3 + %s3927_s0]] (!%p245_p7) }
  0x1a   : > { %v4020_v39 = vsub.s32 (!%p245_p7), %v462_v33, %v4013_v34  ;;  %v494_v44 = vunpack.c.0.s8 (!%p245_p7), %v493_v37  ;;  %s3871_s20 = smov (!%p245_p7), 8   ;;  %s3872_s21 = smov (!%p245_p7), 24  }
  0x1b   : > { %3594 = vmatpush3.bf16.msra.mxu0 (!%p245_p7), %v3787_v2  ;;  %3602 = vmatpush3.bf16.msra.mxu1 (!%p245_p7), %v3789_v11 }
  0x1c   : > { %s3938_s13 = scalar_select %p276_p8, %s3927_s0, 1  ;;  %3607 = vmatprep.subr.bf16.mxu0 %v3848_v0  ;;  %3613 = vmatprep.subr.bf16.mxu1 %v3848_v0  ;;  %v4035_v51 = vsub.s32 %v494_v44, %v4013_v34 }
  0x1e   : > { %s3559_s16 = sshll.u32 %s3938_s13, 5 }
  0x1f   : > { %s280_s19 = scalar_lea.vmem %s5316_s1, %s3559_s16 }
  0x20   : > { %v287_v3 = vld [vmem:[%s280_s19] sm:$0xff]  ;;  %v288_v4 = vld [vmem:[%s280_s19 + $0x8] sm:$0xff]  ;;  %v289_v5 = vld [vmem:[%s280_s19 + $0x10] sm:$0xff] }
  0x21   : > { %v291_v6 = vpack.c.bf16 %v288_v4, %v287_v3  ;;  %v290_v7 = vld [vmem:[%s280_s19 + $0x18] sm:$0xff]  ;;  %s3870_s19 = smov 16  }
  0x22   : > { %v292_v8 = vpack.c.bf16 %v290_v7, %v289_v5 }
  0x23   : > { %304 = vxpose.xlu0.c.b16.start [1/2] (short) (narrow) %v291_v6, 16 }
  0x27   : > { %305 = vxpose.xlu0.c.b16.end [2/2] (short) (narrow) %v292_v8, 16 }
  0x30   : > { %3706 = vset.pattern.permute.xlu0 %v3859_v45 }
  0x89   : > { %v312_v9 = vpop.trf.xlu0 }
  0x8a   : > { %3596 = vmatmul.mubr.msk.bf16.vlgmr.msra.gmra.mrb[0].mxu0 %vm5324_vm1, %v312_v9 }
  0x8b   : > { %3609 = vmatprep.mubr.msk.bf16.mxu0 %vm5326_vm0, %v3848_v0 }
 0x15d   : > { %v370_v13 = vpop.f32.mrb[0].mxu0 }
 0x15e   : > { %v3969_v14 = vadd.f32 %v3513_v12, %v370_v13  ;;  %v3597_v15 = vpop.f32.mrb[1].mxu0 }
 0x15f   : > { %v373_v16 = vpop.f32.mrb[2].mxu0 }
 0x160   : > { %v3971_v17 = vadd.f32 %v3513_v12, %v373_v16  ;;  %738 = vrot.lane.b32.xlu0 %v3969_v14, %s3850_s26  ;;  %732 = vrot.lane.b32.xlu1 %v3969_v14, %s3851_s27  ;;  %v3598_v18 = vpop.f32.mrb[3].mxu0 }
 0x162   : > { %v377_v19 = vpack.c.bf16 %v3971_v17, %v3969_v14 }
 0x164   : > { %1026 = vrot.lane.b32.xlu0 %v3969_v14, %s3852_s28  ;;  %744 = vrot.lane.b32.xlu1 %v3969_v14, %s3853_s29 }
 0x165   : > { %3604 = vmatmul.mubr.msk.bf16.vlgmr.msra.gmra.mrb[0].mxu1 %vm5324_vm1, %v377_v19 }
 0x166   : > { %3615 = vmatprep.mubr.msk.bf16.mxu1 %vm5326_vm0, %v3848_v0 }
 0x168   : > { %734 = vrot.lane.b32.xlu1 %v3971_v17, %s3851_s27 }
 0x16c   : > { %740 = vrot.lane.b32.xlu1 %v3971_v17, %s3850_s26 }
 0x170   : > { %746 = vrot.lane.b32.xlu1 %v3971_v17, %s3853_s29 }
 0x174   : > { %1028 = vrot.lane.b32.xlu1 %v3971_v17, %s3852_s28 }
 0x1d2   : > { %v3986_v20 = vpop.permute.xlu1 %732  ;;  %v3989_v21 = vpop.permute.xlu0 %738 }
 0x1d3   : > { %1030 = vrot.lane.b32.xlu0 %v3986_v20, %s3852_s28  ;;  %v750_v40 = vcombine.low %v3969_v14, %v3989_v21  ;;  %v751_v43 = vcombine.high %v3969_v14, %v3989_v21 }
 0x1d5   : > { %v758_v47 = vrot.slane %v750_v40, %v4020_v39  ;;  %v765_v50 = vrot.slane %v751_v43, %v4020_v39 }
 0x1d6   : > { %v3991_v22 = vpop.permute.xlu1 %744  ;;  %v1027_v35 = vpop.permute.xlu0 %1026 }
 0x1d7   : > { %1034 = vrot.lane.b32.xlu0 %v3989_v21, %s3852_s28  ;;  %v766_v38 = vcombine.low %v3986_v20, %v3991_v22  ;;  %v767_v41 = vcombine.high %v3986_v20, %v3991_v22 }
 0x1d9   : > { %v774_v46 = vrot.slane %v766_v38, %v4020_v39  ;;  %v781_v48 = vrot.slane %v767_v41, %v4020_v39 }
 0x1da   : > { %v3994_v23 = vpop.permute.xlu1 %734 }
 0x1db   : > { %1038 = vrot.lane.b32.xlu0 %v3991_v22, %s3852_s28  ;;  %1032 = vrot.lane.b32.xlu1 %v3994_v23, %s3852_s28  ;;  %v782_v53 = vcombine.low %v758_v47, %v774_v46  ;;  %v783_v54 = vcombine.high %v758_v47, %v774_v46  ;;  %v798_v59 = vcombine.low %v765_v50, %v781_v48 }
 0x1dc   : > { %v799_v60 = vcombine.high %v765_v50, %v781_v48 }
 0x1dd   : > { %v4046_v4 = vrot.slane %v782_v53, %v4035_v51  ;;  %v4049_v5 = vrot.slane %v783_v54, %v4035_v51  ;;  %v4058_v12 = vrot.slane %v798_v59, %v4035_v51 }
 0x1de   : > { %v3998_v24 = vpop.permute.xlu1 %740  ;;  %v4061_v13 = vrot.slane %v799_v60, %v4035_v51 }
 0x1df   : > { %1036 = vrot.lane.b32.xlu1 %v3998_v24, %s3852_s28  ;;  %v818_v61 = vcombine.low %v3971_v17, %v3998_v24  ;;  %v819_v62 = vcombine.high %v3971_v17, %v3998_v24  ;;  %v3524_v43 = vcombine.high %v4046_v4, %v4049_v5 }
 0x1e0   : > { %v902_v54 = vcombine.low %v4058_v12, %v4061_v13 }
 0x1e1   : > { %v826_v15 = vrot.slane %v818_v61, %v4020_v39  ;;  %v833_v16 = vrot.slane %v819_v62, %v4020_v39 }
 0x1e2   : > { %v4001_v25 = vpop.permute.xlu1 %746 }
 0x1e3   : > { %1040 = vrot.lane.b32.xlu1 %v4001_v25, %s3852_s28  ;;  %v834_v55 = vcombine.low %v3994_v23, %v4001_v25  ;;  %v835_v56 = vcombine.high %v3994_v23, %v4001_v25 }
 0x1e5   : > { %v842_v6 = vrot.slane %v834_v55, %v4020_v39  ;;  %v849_v7 = vrot.slane %v835_v56, %v4020_v39  ;;  %v3525_v55 = vcombine.high %v4058_v12, %v4061_v13 }
 0x1e6   : > { %v1029_v52 = vpop.permute.xlu1 %1028 }
 0x1e7   : > { %v850_v31 = vcombine.low %v826_v15, %v842_v6  ;;  %v851_v33 = vcombine.high %v826_v15, %v842_v6  ;;  %v867_v36 = vcombine.high %v833_v16, %v849_v7 }
 0x1e9   : > { %v865_v59 = vrot.slane %v851_v33, %v4035_v51 }
 0x238   : > { %v4004_v26 = vpop.f32.mrb[0].mxu1 }
 0x239   : > { %440 = vrot.lane.b32.xlu0 %v4004_v26, %s3854_s30  ;;  %v3605_v27 = vpop.f32.mrb[1].mxu1 }
 0x23a   : > { %v4007_v28 = vpop.f32.mrb[2].mxu1 }
 0x23b   : > { %442 = vrot.lane.b32.xlu1 %v4007_v28, %s3854_s30  ;;  %v3606_v29 = vpop.f32.mrb[3].mxu1 }
 0x23d   : > { %446 = vrot.lane.b32.xlu0 %v4004_v26, %s3856_s9 }
 0x23f   : > { %448 = vrot.lane.b32.xlu1 %v4007_v28, %s3856_s9 }
 0x241   : > { %452 = vrot.lane.b32.xlu0 %v4004_v26, %s3857_s11 }
 0x243   : > { %454 = vrot.lane.b32.xlu1 %v4007_v28, %s3857_s11 }
 0x245   : > { %v1031_v42 = vpop.permute.xlu0 %1030 }
 0x249   : > { %v1035_v49 = vpop.permute.xlu0 %1034 }
 0x24a   : > { %v1050_v57 = vcombine.low %v1027_v35, %v1035_v49  ;;  %v1051_v58 = vcombine.high %v1027_v35, %v1035_v49  ;;  %v866_v35 = vcombine.low %v833_v16, %v849_v7 }
 0x24c   : > { %v1058_v8 = vrot.slane %v1050_v57, %v4020_v39  ;;  %v1065_v9 = vrot.slane %v1051_v58, %v4020_v39  ;;  %v858_v58 = vrot.slane %v850_v31, %v4035_v51  ;;  %v874_v60 = vrot.slane %v866_v35, %v4035_v51 }
 0x24d   : > { %v1039_v63 = vpop.permute.xlu0 %1038  ;;  %v1033_v3 = vpop.permute.xlu1 %1032 }
 0x24e   : > { %v1066_v1 = vcombine.low %v1031_v42, %v1039_v63  ;;  %v1067_v2 = vcombine.high %v1031_v42, %v1039_v63  ;;  %v886_v42 = vcombine.low %v4046_v4, %v4049_v5 }
 0x250   : > { %v1074_v10 = vrot.slane %v1066_v1, %v4020_v39  ;;  %v1081_v11 = vrot.slane %v1067_v2, %v4020_v39 }
 0x251   : > { %v1037_v30 = vpop.permute.xlu1 %1036 }
 0x252   : > { %v1082_v18 = vcombine.low %v1058_v8, %v1074_v10  ;;  %v1083_v19 = vcombine.high %v1058_v8, %v1074_v10  ;;  %v1098_v27 = vcombine.low %v1065_v9, %v1081_v11  ;;  %v1099_v29 = vcombine.high %v1065_v9, %v1081_v11 }
 0x253   : > { %v1118_v44 = vcombine.low %v1029_v52, %v1037_v30  ;;  %v1119_v46 = vcombine.high %v1029_v52, %v1037_v30  ;;  %v881_v52 = vrot.slane %v867_v36, %v4035_v51  ;;  %v954_v10 = vcombine.low %v858_v58, %v865_v59 }
 0x254   : > { %v1090_v37 = vrot.slane %v1082_v18, %v4035_v51  ;;  %v1097_v38 = vrot.slane %v1083_v19, %v4035_v51  ;;  %v1106_v40 = vrot.slane %v1098_v27, %v4035_v51  ;;  %v1113_v41 = vrot.slane %v1099_v29, %v4035_v51 }
 0x255   : > { %v1041_v53 = vpop.permute.xlu1 %1040  ;;  %v1126_v61 = vrot.slane %v1118_v44, %v4020_v39  ;;  %v1133_v62 = vrot.slane %v1119_v46, %v4020_v39  ;;  %v3526_v11 = vcombine.high %v858_v58, %v865_v59  ;;  %v970_v12 = vcombine.low %v874_v60, %v881_v52 }
 0x256   : > { %v1186_v47 = vcombine.low %v1090_v37, %v1097_v38  ;;  %v3528_v48 = vcombine.high %v1090_v37, %v1097_v38  ;;  %v1202_v49 = vcombine.low %v1106_v40, %v1113_v41  ;;  %v3529_v50 = vcombine.high %v1106_v40, %v1113_v41 }
 0x257   : > { %v1134_v56 = vcombine.low %v1033_v3, %v1041_v53  ;;  %v1135_v57 = vcombine.high %v1033_v3, %v1041_v53  ;;  %v3527_v13 = vcombine.high %v874_v60, %v881_v52  ;;  %v4094_v27 = vrot.slane %v886_v42, %v4020_v39 }
 0x258   : > { %v1193_v2 = vrot.slane %v1186_v47, %v4020_v39  ;;  %v1201_v3 = vrot.slane %v3528_v48, %v4020_v39  ;;  %v1209_v4 = vrot.slane %v1202_v49, %v4020_v39  ;;  %v1217_v5 = vrot.slane %v3529_v50, %v4020_v39 }
 0x259   : > { %v1142_v63 = vrot.slane %v1134_v56, %v4020_v39  ;;  %v1149_v1 = vrot.slane %v1135_v57, %v4020_v39  ;;  %v4097_v29 = vrot.slane %v3524_v43, %v4020_v39  ;;  %v961_v38 = vrot.slane %v954_v10, %v4020_v39 }
 0x25a   : > { %v1218_v30 = vcombine.low %v1193_v2, %v1201_v3  ;;  %v1234_v31 = vcombine.low %v1209_v4, %v1217_v5  ;;  %v969_v40 = vrot.slane %v3526_v11, %v4020_v39  ;;  %v977_v41 = vrot.slane %v970_v12, %v4020_v39 }
 0x25b   : > { %v1150_v6 = vcombine.low %v1126_v61, %v1142_v63  ;;  %v1151_v7 = vcombine.high %v1126_v61, %v1142_v63  ;;  %v1166_v8 = vcombine.low %v1133_v62, %v1149_v1  ;;  %v1167_v9 = vcombine.high %v1133_v62, %v1149_v1 }
 0x25c   : > { %v985_v44 = vrot.slane %v3527_v13, %v4020_v39  ;;  %v909_v48 = vrot.slane %v902_v54, %v4020_v39  ;;  %v917_v49 = vrot.slane %v3525_v55, %v4020_v39  ;;  %v1226_v50 = vrot.slane %v1218_v30, %v4035_v51 }
 0x25d   : > { %v1158_v15 = vrot.slane %v1150_v6, %v4035_v51  ;;  %v1165_v16 = vrot.slane %v1151_v7, %v4035_v51  ;;  %v1174_v18 = vrot.slane %v1166_v8, %v4035_v51  ;;  %v1181_v19 = vrot.slane %v1167_v9, %v4035_v51 }
 0x25e   : > { %v1242_v53 = vrot.slane %v1234_v31, %v4035_v51  ;;  %v986_v60 = vcombine.low %v961_v38, %v969_v40  ;;  %v1002_v52 = vcombine.low %v977_v41, %v985_v44  ;;  %v1219_v63 = vcombine.high %v1193_v2, %v1201_v3 }
 0x25f   : > { %v1254_v33 = vcombine.low %v1158_v15, %v1165_v16  ;;  %v3530_v35 = vcombine.high %v1158_v15, %v1165_v16  ;;  %v1270_v36 = vcombine.low %v1174_v18, %v1181_v19  ;;  %v3531_v37 = vcombine.high %v1174_v18, %v1181_v19 }
 0x260   : > { %v1235_v1 = vcombine.high %v1209_v4, %v1217_v5  ;;  %v1250_v6 = vcombine.low %v1226_v50, %v1242_v53  ;;  %v1251_v54 = vcombine.high %v1226_v50, %v1242_v53  ;;  %v918_v55 = vcombine.low %v4094_v27, %v4097_v29 }
 0x261   : > { %v1261_v42 = vrot.slane %v1254_v33, %v4020_v39  ;;  %v1269_v46 = vrot.slane %v3530_v35, %v4020_v39  ;;  %v1277_v43 = vrot.slane %v1270_v36, %v4020_v39  ;;  %v1285_v47 = vrot.slane %v3531_v37, %v4020_v39 }
 0x262   : > { %v934_v7 = vcombine.low %v909_v48, %v917_v49  ;;  %v994_v12 = vrot.slane %v986_v60, %v4035_v51  ;;  %v1010_v13 = vrot.slane %v1002_v52, %v4035_v51  ;;  %v1233_v3 = vrot.slane %v1219_v63, %v4035_v51 }
 0x263   : > { %v1286_v56 = vcombine.low %v1261_v42, %v1269_v46  ;;  %v1302_v57 = vcombine.low %v1277_v43, %v1285_v47  ;;  %v1287_v58 = vcombine.high %v1261_v42, %v1269_v46  ;;  %v1303_v59 = vcombine.high %v1277_v43, %v1285_v47 }
 0x264   : > { %v1249_v4 = vrot.slane %v1235_v1, %v4035_v51  ;;  %v926_v5 = vrot.slane %v918_v55, %v4035_v51  ;;  %v942_v16 = vrot.slane %v934_v7, %v4035_v51  ;;  %v1018_v33 = vcombine.low %v994_v12, %v1010_v13 }
 0x265   : > { %v1294_v61 = vrot.slane %v1286_v56, %v4035_v51  ;;  %v1310_v62 = vrot.slane %v1302_v57, %v4035_v51  ;;  %v1301_v10 = vrot.slane %v1287_v58, %v4035_v51  ;;  %v1317_v11 = vrot.slane %v1303_v59, %v4035_v51 }
 0x266   : > { %v987_v35 = vcombine.high %v961_v38, %v969_v40  ;;  %v1003_v36 = vcombine.high %v977_v41, %v985_v44  ;;  %v1019_v37 = vcombine.high %v994_v12, %v1010_v13  ;;  %v1252_v42 = vcombine.low %v1233_v3, %v1249_v4 }
 0x267   : > { %v1318_v8 = vcombine.low %v1294_v61, %v1310_v62  ;;  %v1319_v9 = vcombine.high %v1294_v61, %v1310_v62  ;;  %v1320_v30 = vcombine.low %v1301_v10, %v1317_v11  ;;  %v1321_v31 = vcombine.high %v1301_v10, %v1317_v11 }
 0x268   : > { %v1253_v46 = vcombine.high %v1233_v3, %v1249_v4  ;;  %v919_v43 = vcombine.high %v4094_v27, %v4097_v29  ;;  %v935_v47 = vcombine.high %v909_v48, %v917_v49  ;;  %v950_v50 = vcombine.low %v926_v5, %v942_v16 }
 0x269   : > { %v1322_v15 = vpack.c.bf16 %v1318_v8, %v1250_v6  ;;  %v1323_v2 = vpack.c.bf16 %v1319_v9, %v1251_v54  ;;  %v951_v53 = vcombine.high %v926_v5, %v942_v16  ;;  %v1324_v56 = vpack.c.bf16 %v1320_v30, %v1252_v42 }
 0x26a   : > { %v1325_v57 = vpack.c.bf16 %v1321_v31, %v1253_v46  ;;  %v1022_v58 = vpack.c.bf16 %v1018_v33, %v950_v50  ;;  %v1001_v38 = vrot.slane %v987_v35, %v4035_v51  ;;  %v1017_v40 = vrot.slane %v1003_v36, %v4035_v51 }
 0x26b   : > { %v1692_v18 = vsel %vm5325_vm2, %v1322_v15, 0  ;;  %v1739_v19 = vsel %vm5325_vm2, %v1323_v2, 0  ;;  %v1023_v59 = vpack.c.bf16 %v1019_v37, %v951_v53  ;;  %v1786_v41 = vsel %vm5325_vm2, %v1324_v56, 0 }
 0x26c   : > { %3608 = vmatpush3.bf16.xpose.msra.mxu0 %v1692_v18  ;;  %3614 = vmatpush3.bf16.xpose.msra.mxu1 %v1739_v19  ;;  %v1833_v44 = vsel %vm5325_vm2, %v1325_v57, 0  ;;  %v933_v27 = vrot.slane %v919_v43, %v4035_v51  ;;  %v949_v29 = vrot.slane %v935_v47, %v4035_v51  ;;  %v1020_v48 = vcombine.low %v1001_v38, %v1017_v40 }
 0x26d   : > { %3619 = vmatprep.subr.bf16.mxu0 %v3848_v0  ;;  %3625 = vmatprep.subr.bf16.mxu1 %v3848_v0  ;;  %v1021_v49 = vcombine.high %v1001_v38, %v1017_v40  ;;  %v3860_v38 = vmov 2   ;;  %v3861_v40 = vmov 1  }
 0x26e   : > { %v952_v60 = vcombine.low %v933_v27, %v949_v29  ;;  %v953_v52 = vcombine.high %v933_v27, %v949_v29  ;;  %v3863_v27 = vmov 3  }
 0x270   : > { %v1024_v61 = vpack.c.bf16 %v1020_v48, %v952_v60  ;;  %v1025_v62 = vpack.c.bf16 %v1021_v49, %v953_v52  ;;  %v3864_v48 = vmov 5  }
 0x273   : > { %3610 = vmatmul.mubr.msk.bf16.vlgmr.msra.gmra.mrb[4].mxu0 %vm5325_vm2, %v1022_v58  ;;  %3616 = vmatmul.mubr.msk.bf16.vlgmr.msra.gmra.mrb[4].mxu1 %vm5325_vm2, %v1023_v59 }
 0x274   : > { %3620 = vmatpush3.bf16.xpose.msra.mxu0 %v1786_v41  ;;  %3626 = vmatpush3.bf16.xpose.msra.mxu1 %v1833_v44  ;;  %v3862_v44 = vmov 4  }
 0x275   : > { %3621 = vmatprep.mubr.msk.bf16.mxu0 %vm5326_vm0, %v3848_v0  ;;  %3627 = vmatprep.mubr.msk.bf16.mxu1 %vm5326_vm0, %v3848_v0 }
 0x276   : > { %3641 = vmatprep.subr.bf16.mxu1 %v3848_v0 }
 0x27b   : > { %3622 = vmatmul.mubr.msk.bf16.vlgmr.msra.gmra.mrb[8].mxu0 %vm5325_vm2, %v1024_v61  ;;  %3628 = vmatmul.mubr.msk.bf16.vlgmr.msra.gmra.mrb[8].mxu1 %vm5325_vm2, %v1025_v62  ;;  %v3865_v61 = vmov 6  }
 0x27c   : > { %3643 = vmatprep.mubr.msk.bf16.mxu1 %vm5326_vm0, %v3848_v0 }
 0x2ab   : > { %v441_v63 = vpop.permute.xlu0 %440 }
 0x2ad   : > { %v443_v29 = vpop.permute.xlu1 %442 }
 0x2af   : > { %v447_v1 = vpop.permute.xlu0 %446 }
 0x2b0   : > { %v458_v6 = vcombine.low %v4004_v26, %v447_v1  ;;  %v459_v54 = vcombine.high %v4004_v26, %v447_v1 }
 0x2b1   : > { %v449_v49 = vpop.permute.xlu1 %448 }
 0x2b2   : > { %v466_v9 = vrot.slane %v458_v6, %v4020_v39  ;;  %v473_v10 = vrot.slane %v459_v54, %v4020_v39  ;;  %v526_v1 = vcombine.low %v4007_v28, %v449_v49  ;;  %v527_v6 = vcombine.high %v4007_v28, %v449_v49 }
 0x2b3   : > { %v453_v55 = vpop.permute.xlu0 %452 }
 0x2b4   : > { %v474_v7 = vcombine.low %v441_v63, %v453_v55  ;;  %v475_v8 = vcombine.high %v441_v63, %v453_v55 }
 0x2b5   : > { %v455_v52 = vpop.permute.xlu1 %454 }
 0x2b6   : > { %v482_v11 = vrot.slane %v474_v7, %v4020_v39  ;;  %v489_v12 = vrot.slane %v475_v8, %v4020_v39  ;;  %v542_v62 = vcombine.low %v443_v29, %v455_v52  ;;  %v543_v63 = vcombine.high %v443_v29, %v455_v52 }
 0x2b7   : > { %v534_v7 = vrot.slane %v526_v1, %v4020_v39  ;;  %v541_v8 = vrot.slane %v527_v6, %v4020_v39 }
 0x2b8   : > { %v490_v13 = vcombine.low %v466_v9, %v482_v11  ;;  %v491_v15 = vcombine.high %v466_v9, %v482_v11  ;;  %v506_v2 = vcombine.low %v473_v10, %v489_v12  ;;  %v507_v3 = vcombine.high %v473_v10, %v489_v12 }
 0x2b9   : > { %v550_v54 = vrot.slane %v542_v62, %v4020_v39  ;;  %v557_v55 = vrot.slane %v543_v63, %v4020_v39  ;;  %v3866_v12 = vmov 7  }
 0x2ba   : > { %v498_v4 = vrot.slane %v490_v13, %v4035_v51  ;;  %v505_v5 = vrot.slane %v491_v15, %v4035_v51  ;;  %v514_v26 = vrot.slane %v506_v2, %v4035_v51  ;;  %v521_v16 = vrot.slane %v507_v3, %v4035_v51 }
 0x2bb   : > { %v558_v9 = vcombine.low %v534_v7, %v550_v54  ;;  %v559_v28 = vcombine.high %v534_v7, %v550_v54  ;;  %v574_v10 = vcombine.low %v541_v8, %v557_v55  ;;  %v575_v11 = vcombine.high %v541_v8, %v557_v55 }
 0x2bc   : > { %v594_v18 = vcombine.low %v498_v4, %v505_v5  ;;  %v3520_v19 = vcombine.high %v498_v4, %v505_v5  ;;  %v610_v30 = vcombine.low %v514_v26, %v521_v16  ;;  %v3521_v31 = vcombine.high %v514_v26, %v521_v16 }
 0x2bd   : > { %v566_v13 = vrot.slane %v558_v9, %v4035_v51  ;;  %v573_v15 = vrot.slane %v559_v28, %v4035_v51  ;;  %v582_v2 = vrot.slane %v574_v10, %v4035_v51  ;;  %v589_v3 = vrot.slane %v575_v11, %v4035_v51 }
 0x2be   : > { %v601_v33 = vrot.slane %v594_v18, %v4020_v39  ;;  %v609_v35 = vrot.slane %v3520_v19, %v4020_v39  ;;  %v617_v36 = vrot.slane %v610_v30, %v4020_v39  ;;  %v625_v37 = vrot.slane %v3521_v31, %v4020_v39 }
 0x2bf   : > { %v662_v4 = vcombine.low %v566_v13, %v573_v15  ;;  %v3522_v5 = vcombine.high %v566_v13, %v573_v15  ;;  %v678_v26 = vcombine.low %v582_v2, %v589_v3  ;;  %v3523_v16 = vcombine.high %v582_v2, %v589_v3 }
 0x2c0   : > { %v626_v42 = vcombine.low %v601_v33, %v609_v35  ;;  %v642_v46 = vcombine.low %v617_v36, %v625_v37  ;;  %v627_v56 = vcombine.high %v601_v33, %v609_v35  ;;  %v643_v57 = vcombine.high %v617_v36, %v625_v37 }
 0x2c1   : > { %v3867_v18 = vmov 8   ;;  %v669_v19 = vrot.slane %v662_v4, %v4020_v39  ;;  %v677_v30 = vrot.slane %v3522_v5, %v4020_v39  ;;  %v685_v31 = vrot.slane %v678_v26, %v4020_v39 }
 0x2c2   : > { %v634_v43 = vrot.slane %v626_v42, %v4035_v51  ;;  %v650_v47 = vrot.slane %v642_v46, %v4035_v51  ;;  %v641_v58 = vrot.slane %v627_v56, %v4035_v51  ;;  %v657_v59 = vrot.slane %v643_v57, %v4035_v51 }
 0x2c3   : > { %v693_v33 = vrot.slane %v3523_v16, %v4020_v39  ;;  %v694_v35 = vcombine.low %v669_v19, %v677_v30 }
 0x2c4   : > { %v4162_v50 = vcombine.low %v634_v43, %v650_v47  ;;  %v4164_v53 = vcombine.high %v634_v43, %v650_v47  ;;  %v4174_v41 = vcombine.low %v641_v58, %v657_v59  ;;  %v4194_v60 = vcombine.high %v641_v58, %v657_v59 }
 0x2c5   : > { %v710_v36 = vcombine.low %v685_v31, %v693_v33  ;;  %v702_v37 = vrot.slane %v694_v35, %v4035_v51  ;;  %v695_v47 = vcombine.high %v669_v19, %v677_v30 }
 0x2c6   : > { %1641 = vperm.xlu0 %3706, %v4162_v50   ;;  %1651 = vperm.xlu1 %3707, %v4164_v53  }
 0x2c7   : > { %v718_v42 = vrot.slane %v710_v36, %v4035_v51 }
 0x2c9   : > { %v4241_v46 = vcombine.high %v702_v37, %v718_v42  ;;  %v726_v43 = vcombine.low %v702_v37, %v718_v42 }
 0x2ca   : > { %3709 = vset.pattern.permute.xlu0 %v3860_v38  ;;  %3708 = vset.pattern.permute.xlu1 %v3861_v40 }
 0x2cb   : > { %1937 = vperm.xlu0 %3709, %v4162_v50   ;;  %1883 = vperm.xlu1 %3708, %v4162_v50  }
 0x2cf   : > { %3712 = vset.pattern.permute.xlu0 %v3859_v45  ;;  %1891 = vperm.xlu1 %3708, %v4164_v53  }
 0x2d0   : > { %1661 = vperm.xlu0 %3712, %v4174_v41  }
 0x2d3   : > { %3710 = vset.pattern.permute.xlu1 %v3860_v38 }
 0x2d4   : > { %3715 = vset.pattern.permute.xlu0 %v3862_v44  ;;  %1945 = vperm.xlu1 %3710, %v4164_v53  }
 0x2d5   : > { %2053 = vperm.xlu0 %3715, %v4164_v53  }
 0x2d8   : > { %3711 = vset.pattern.permute.xlu1 %v3863_v27 }
 0x2d9   : > { %3716 = vset.pattern.permute.xlu0 %v3861_v40  ;;  %1991 = vperm.xlu1 %3711, %v4162_v50  }
 0x2da   : > { %1899 = vperm.xlu0 %3716, %v4174_v41  }
 0x2dd   : > { %1999 = vperm.xlu1 %3711, %v4164_v53  }
 0x2de   : > { %3719 = vset.pattern.permute.xlu0 %v3864_v48 }
 0x2df   : > { %2107 = vperm.xlu0 %3719, %v4164_v53  }
 0x2e1   : > { %3713 = vset.pattern.permute.xlu1 %v3862_v44 }
 0x2e2   : > { %2045 = vperm.xlu1 %3713, %v4162_v50  }
 0x2e3   : > { %3720 = vset.pattern.permute.xlu0 %v3860_v38 }
 0x2e4   : > { %1953 = vperm.xlu0 %3720, %v4174_v41  }
 0x2e6   : > { %3714 = vset.pattern.permute.xlu1 %v3859_v45 }
 0x2e7   : > { %1671 = vperm.xlu1 %3714, %v4194_v60  }
 0x2e8   : > { %3723 = vset.pattern.permute.xlu0 %v3865_v61 }
 0x2e9   : > { %2161 = vperm.xlu0 %3723, %v4164_v53  }
 0x2eb   : > { %3717 = vset.pattern.permute.xlu1 %v3864_v48 }
 0x2ec   : > { %2099 = vperm.xlu1 %3717, %v4162_v50  }
 0x2ed   : > { %3724 = vset.pattern.permute.xlu0 %v3863_v27 }
 0x2ee   : > { %2007 = vperm.xlu0 %3724, %v4174_v41  }
 0x2f0   : > { %3718 = vset.pattern.permute.xlu1 %v3861_v40 }
 0x2f1   : > { %1907 = vperm.xlu1 %3718, %v4194_v60  }
 0x2f2   : > { %3727 = vset.pattern.permute.xlu0 %v3866_v12 }
 0x2f3   : > { %2215 = vperm.xlu0 %3727, %v4164_v53  }
 0x2f5   : > { %3721 = vset.pattern.permute.xlu1 %v3865_v61 }
 0x2f6   : > { %2153 = vperm.xlu1 %3721, %v4162_v50  }
 0x2f7   : > { %3728 = vset.pattern.permute.xlu0 %v3862_v44 }
 0x2f8   : > { %2061 = vperm.xlu0 %3728, %v4174_v41  }
 0x2fa   : > { %3722 = vset.pattern.permute.xlu1 %v3860_v38 }
 0x2fb   : > { %1961 = vperm.xlu1 %3722, %v4194_v60  }
 0x2fc   : > { %3731 = vset.pattern.permute.xlu0 %v3867_v18 }
 0x2fd   : > { %2269 = vperm.xlu0 %3731, %v4164_v53   ;;  %v709_v53 = vrot.slane %v695_v47, %v4035_v51 }
 0x2ff   : > { %3725 = vset.pattern.permute.xlu1 %v3866_v12 }
 0x300   : > { %2207 = vperm.xlu1 %3725, %v4162_v50  }
 0x301   : > { %3732 = vset.pattern.permute.xlu0 %v3864_v48 }
 0x302   : > { %2115 = vperm.xlu0 %3732, %v4174_v41  }
 0x304   : > { %3726 = vset.pattern.permute.xlu1 %v3863_v27 }
 0x305   : > { %2015 = vperm.xlu1 %3726, %v4194_v60  }
 0x306   : > { %3735 = vset.pattern.permute.xlu0 %v3866_v12 }
 0x307   : > { %2223 = vperm.xlu0 %3735, %v4174_v41  }
 0x309   : > { %3729 = vset.pattern.permute.xlu1 %v3867_v18 }
 0x30a   : > { %2261 = vperm.xlu1 %3729, %v4162_v50   ;;  %v711_v50 = vcombine.high %v685_v31, %v693_v33  ;;  %v4335_v31 = vand.u32 127, %v463_v32 }
 0x30b   : > { %3739 = vset.pattern.permute.xlu0 %v3859_v45 }
 0x30c   : > { %1656 = vperm.xlu0 %3739, %v4241_v46   ;;  %v725_v56 = vrot.slane %v711_v50, %v4035_v51 }
 0x30e   : > { %3730 = vset.pattern.permute.xlu1 %v3862_v44  ;;  %v4272_v57 = vcombine.high %v709_v53, %v725_v56  ;;  %v4277_v58 = vcombine.low %v709_v53, %v725_v56 }
 0x30f   : > { %2069 = vperm.xlu1 %3730, %v4194_v60  }
 0x310   : > { %3740 = vset.pattern.permute.xlu0 %v3861_v40 }
 0x311   : > { %1887 = vperm.xlu0 %3740, %v726_v43  }
 0x313   : > { %3733 = vset.pattern.permute.xlu1 %v3864_v48 }
 0x314   : > { %2123 = vperm.xlu1 %3733, %v4194_v60  }
 0x315   : > { %3743 = vset.pattern.permute.xlu0 %v3860_v38 }
 0x316   : > { %1949 = vperm.xlu0 %3743, %v4241_v46  }
 0x318   : > { %3734 = vset.pattern.permute.xlu1 %v3865_v61 }
 0x319   : > { %2169 = vperm.xlu1 %3734, %v4174_v41  }
 0x31a   : > { %3744 = vset.pattern.permute.xlu0 %v3863_v27 }
 0x31b   : > { %1995 = vperm.xlu0 %3744, %v726_v43  }
 0x31d   : > { %2177 = vperm.xlu1 %3734, %v4194_v60  }
 0x31f   : > { %3747 = vset.pattern.permute.xlu0 %v3862_v44 }
 0x320   : > { %2049 = vperm.xlu0 %3747, %v726_v43  }
 0x321   : > { %3736 = vset.pattern.permute.xlu1 %v3866_v12 }
 0x322   : > { %2231 = vperm.xlu1 %3736, %v4194_v60  }
 0x324   : > { %3750 = vset.pattern.permute.xlu0 %v3864_v48 }
 0x325   : > { %2103 = vperm.xlu0 %3750, %v726_v43  }
 0x326   : > { %3737 = vset.pattern.permute.xlu1 %v3867_v18 }
 0x327   : > { %2277 = vperm.xlu1 %3737, %v4174_v41  }
 0x329   : > { %3753 = vset.pattern.permute.xlu0 %v3865_v61 }
 0x32a   : > { %2157 = vperm.xlu0 %3753, %v726_v43  }
 0x32b   : > { %2285 = vperm.xlu1 %3737, %v4194_v60  }
 0x32e   : > { %3756 = vset.pattern.permute.xlu0 %v3866_v12 }
 0x32f   : > { %3738 = vset.pattern.permute.xlu1 %v3859_v45  ;;  %2211 = vperm.xlu0 %3756, %v726_v43  }
 0x330   : > { %1646 = vperm.xlu1 %3738, %v726_v43  }
 0x333   : > { %3759 = vset.pattern.permute.xlu0 %v3867_v18 }
 0x334   : > { %2265 = vperm.xlu0 %3759, %v726_v43   ;;  %3741 = vset.pattern.permute.xlu1 %v3861_v40 }
 0x335   : > { %1895 = vperm.xlu1 %3741, %v4241_v46  }
 0x338   : > { %3762 = vset.pattern.permute.xlu0 %v3864_v48 }
 0x339   : > { %2127 = vperm.xlu0 %3762, %v4272_v57   ;;  %3742 = vset.pattern.permute.xlu1 %v3860_v38 }
 0x33a   : > { %1941 = vperm.xlu1 %3742, %v726_v43  }
 0x33d   : > { %3763 = vset.pattern.permute.xlu0 %v3865_v61 }
 0x33e   : > { %2173 = vperm.xlu0 %3763, %v4277_v58   ;;  %3745 = vset.pattern.permute.xlu1 %v3863_v27 }
 0x33f   : > { %2003 = vperm.xlu1 %3745, %v4241_v46  }
 0x342   : > { %3766 = vset.pattern.permute.xlu0 %v3866_v12 }
 0x343   : > { %2235 = vperm.xlu0 %3766, %v4272_v57   ;;  %3746 = vset.pattern.permute.xlu1 %v3859_v45 }
 0x344   : > { %1666 = vperm.xlu1 %3746, %v4277_v58  }
 0x345   : > { %v4287_v59 = vpop.permute.xlu0 %1641  ;;  %v1652_v41 = vpop.permute.xlu1 %1651 }
 0x346   : > { %v4289_v29 = vpop.f32.mrb[4].mxu0  ;;  %v4291_v49 = vpop.f32.mrb[4].mxu1 }
 0x347   : > { %3767 = vset.pattern.permute.xlu0 %v3867_v18  ;;  %v3611_v60 = vpop.f32.mrb[5].mxu0  ;;  %v3617_v52 = vpop.f32.mrb[5].mxu1 }
 0x348   : > { %2281 = vperm.xlu0 %3767, %v4277_v58   ;;  %1676 = vperm.xlu1 %3746, %v4272_v57   ;;  %v4296_v62 = vpop.f32.mrb[6].mxu0  ;;  %v4298_v63 = vpop.f32.mrb[6].mxu1 }
 0x349   : > { %v3612_v1 = vpop.f32.mrb[7].mxu0  ;;  %v3618_v6 = vpop.f32.mrb[7].mxu1 }
 0x34a   : > { %v4300_v54 = vpop.permute.xlu0 %1937  ;;  %v1884_v55 = vpop.permute.xlu1 %1883 }
 0x34c   : > { %1326 = vrot.lane.b32.xlu0 %v3969_v14, %s3868_s12  ;;  %3748 = vset.pattern.permute.xlu1 %v3862_v44 }
 0x34d   : > { %2057 = vperm.xlu1 %3748, %v4241_v46   ;;  %3785 = vset.pattern.permute.xlu0 %v3859_v45 }
 0x34e   : > { %v1892_v7 = vpop.permute.xlu1 %1891  ;;  %v4307_v8 = vpop.f32.mrb[8].mxu0 }
 0x34f   : > { %v4309_v9 = vpop.f32.mrb[8].mxu1  ;;  %v4311_v28 = vpop.permute.xlu0 %1661 }
 0x350   : > { %v3623_v10 = vpop.f32.mrb[9].mxu0  ;;  %v3629_v11 = vpop.f32.mrb[9].mxu1  ;;  %1334 = vrot.lane.b32.xlu0 %v3989_v21, %s3868_s12 }
 0x351   : > { %v4315_v13 = vpop.f32.mrb[10].mxu0  ;;  %v4317_v14 = vpop.f32.mrb[10].mxu1  ;;  %3749 = vset.pattern.permute.xlu1 %v3861_v40 }
 0x352   : > { %v3624_v15 = vpop.f32.mrb[11].mxu0  ;;  %v3630_v2 = vpop.f32.mrb[11].mxu1  ;;  %1903 = vperm.xlu1 %3749, %v4277_v58  }
 0x353   : > { %v1946_v3 = vpop.permute.xlu1 %1945 }
 0x354   : > { %v2054_v4 = vpop.permute.xlu0 %2053 }
 0x356   : > { %1911 = vperm.xlu1 %3749, %v4272_v57  }
 0x358   : > { %v1992_v5 = vpop.permute.xlu1 %1991 }
 0x359   : > { %v4322_v26 = vpop.permute.xlu0 %1899 }
 0x35a   : > { %3751 = vset.pattern.permute.xlu1 %v3864_v48 }
 0x35b   : > { %2111 = vperm.xlu1 %3751, %v4241_v46  }
 0x35c   : > { %v2000_v21 = vpop.permute.xlu1 %1999 }
 0x35e   : > { %v2108_v16 = vpop.permute.xlu0 %2107 }
 0x35f   : > { %3752 = vset.pattern.permute.xlu1 %v3860_v38  ;;  %v4340_v38 = vsub.s32 %v4335_v31, %v4013_v34 }
 0x360   : > { %1957 = vperm.xlu1 %3752, %v4277_v58  }
 0x361   : > { %v2046_v40 = vpop.permute.xlu1 %2045  ;;  %vm1633_vm3 = vcmp.eq.s32.totalorder %v4340_v38, 4294967292  ;;  %vm5332_vm4 = vcmp.eq.s32.totalorder %v4340_v38, 4294967293  ;;  %vm5333_vm5 = vcmp.eq.s32.totalorder %v4340_v38, 4294967294  ;;  %vm1984_vm6 = vcmp.eq.s32.totalorder %v4340_v38, 4294967295 }
 0x362   : > { %v1681_v32 = vsel %vm1633_vm3, %v1652_v41, 0.0  ;;  %v1916_v47 = vsel %vm5332_vm4, %v1892_v7, 0.0  ;;  %v1914_v53 = vsel %vm5332_vm4, %v1884_v55, 0.0  ;;  %v1970_v56 = vsel %vm5333_vm5, %v1946_v3, 0.0 }
 0x363   : > { %v4328_v19 = vpop.permute.xlu0 %1953  ;;  %v1776_v50 = vadd.f32 %v4291_v49, %v1681_v32  ;;  %v2024_v60 = vsel %vm1984_vm6, %v2000_v21, 0.0  ;;  %vm5334_vm7 = vcmp.eq.s32.totalorder %v4340_v38, 0  ;;  %v1968_v55 = vsel %vm5333_vm5, %v4300_v54, 0.0 }
 0x364   : > { %1965 = vperm.xlu1 %3752, %v4272_v57   ;;  %v2022_v7 = vsel %vm1984_vm6, %v1992_v5, 0.0  ;;  %v2078_v15 = vsel %vm5334_vm7, %v2054_v4, 0.0  ;;  %vm5331_vm8 = vcmp.eq.s32.totalorder %v4340_v38, 1  ;;  %vm5330_vm9 = vcmp.eq.s32.totalorder %v4340_v38, 2 }
 0x365   : > { %vm5329_vm10 = vcmp.eq.s32.totalorder %v4340_v38, 3  ;;  %v2132_v4 = vsel %vm5331_vm8, %v2108_v16, 0.0  ;;  %vm5328_vm11 = vcmp.eq.s32.totalorder %v4340_v38, 4 }
 0x366   : > { %v4331_v30 = vpop.permute.xlu1 %1671 }
 0x368   : > { %3754 = vset.pattern.permute.xlu1 %v3865_v61  ;;  %v2162_v33 = vpop.permute.xlu0 %2161 }
 0x369   : > { %2165 = vperm.xlu1 %3754, %v4241_v46  }
 0x36b   : > { %v2100_v35 = vpop.permute.xlu1 %2099 }
 0x36c   : > { %v2130_v5 = vsel %vm5331_vm8, %v2100_v35, 0.0 }
 0x36d   : > { %3755 = vset.pattern.permute.xlu1 %v3863_v27  ;;  %v4344_v36 = vpop.permute.xlu0 %2007  ;;  %v1679_v27 = vsel %vm1633_vm3, %v4287_v59, 0.0  ;;  %v1924_v59 = vadd.f32 %v1916_v47, %v1776_v50 }
 0x36e   : > { %2011 = vperm.xlu1 %3755, %v4277_v58   ;;  %v1729_v41 = vadd.f32 %v4289_v29, %v1679_v27 }
 0x36f   : > { %v1978_v1 = vadd.f32 %v1970_v56, %v1924_v59 }
 0x370   : > { %v4346_v37 = vpop.permute.xlu1 %1907  ;;  %v1922_v49 = vadd.f32 %v1914_v53, %v1729_v41 }
 0x371   : > { %v2032_v29 = vadd.f32 %v2024_v60, %v1978_v1 }
 0x372   : > { %2019 = vperm.xlu1 %3755, %v4272_v57   ;;  %v2216_v42 = vpop.permute.xlu0 %2215  ;;  %v1976_v10 = vadd.f32 %v1968_v55, %v1922_v49  ;;  %v2309_v49 = vstv %s2308_s14  ;;  %s285_s14 = scalar_lea.vmem %s5323_s8, %s3559_s16 }
 0x373   : > { %v2086_v3 = vadd.f32 %v2078_v15, %v2032_v29  ;;  %v2240_v35 = vsel %vm5329_vm10, %v2216_v42, 0.0  ;;  %vm4417_vm12 = vcmp.lt.s32.totalorder %v4335_v31, %v2309_v49 }
 0x374   : > { %v2030_v2 = vadd.f32 %v2022_v7, %v1976_v10 }
 0x375   : > { %v2154_v43 = vpop.permute.xlu1 %2153  ;;  %v2140_v47 = vadd.f32 %v2132_v4, %v2086_v3 }
 0x376   : > { %3757 = vset.pattern.permute.xlu1 %v3866_v12  ;;  %v2184_v32 = vsel %vm5330_vm9, %v2154_v43, 0.0 }
 0x377   : > { %2219 = vperm.xlu1 %3757, %v4241_v46   ;;  %v4372_v6 = vpop.permute.xlu0 %2061 }
 0x37a   : > { %v4370_v52 = vpop.permute.xlu1 %1961 }
 0x37b   : > { %3758 = vset.pattern.permute.xlu1 %v3862_v44  ;;  %v2076_v44 = vsel %vm5334_vm7, %v2046_v40, 0.0  ;;  %v2186_v40 = vsel %vm5330_vm9, %v2162_v33, 0.0 }
 0x37c   : > { %2065 = vperm.xlu1 %3758, %v4277_v58   ;;  %v2270_v54 = vpop.permute.xlu0 %2269  ;;  %v2084_v21 = vadd.f32 %v2076_v44, %v2030_v2  ;;  %v2194_v33 = vadd.f32 %v2186_v40, %v2140_v47 }
 0x37d   : > { %v2294_v43 = vsel %vm5328_vm11, %v2270_v54, 0.0 }
 0x37e   : > { %v2138_v50 = vadd.f32 %v2130_v5, %v2084_v21  ;;  %v2248_v41 = vadd.f32 %v2240_v35, %v2194_v33 }
 0x37f   : > { %v2208_v11 = vpop.permute.xlu1 %2207 }
 0x380   : > { %2073 = vperm.xlu1 %3758, %v4272_v57   ;;  %v2238_v16 = vsel %vm5329_vm10, %v2208_v11, 0.0  ;;  %v2192_v53 = vadd.f32 %v2184_v32, %v2138_v50  ;;  %v2302_v42 = vadd.f32 %v2294_v43, %v2248_v41 }
 0x381   : > { %v4408_v56 = vpop.permute.xlu0 %2115 }
 0x382   : > { %v2246_v59 = vadd.f32 %v2238_v16, %v2192_v53  ;;  %v4435_v11 = vsel %vm4417_vm12, %v2302_v42, -10000.0 }
 0x383   : > { %v2328_v15 = vsel %vm2321_vm13, %v4435_v11, -inf }
 0x384   : > { %3760 = vset.pattern.permute.xlu1 %v3867_v18  ;;  %v4400_v27 = vpop.permute.xlu1 %2015 }
 0x385   : > { %2273 = vperm.xlu1 %3760, %v4241_v46  }
 0x386   : > { %v4421_v55 = vpop.permute.xlu0 %2223 }
 0x389   : > { %3761 = vset.pattern.permute.xlu1 %v3864_v48  ;;  %v2262_v60 = vpop.permute.xlu1 %2261 }
 0x38a   : > { %v2292_v46 = vsel %vm5328_vm11, %v2262_v60, 0.0  ;;  %2119 = vperm.xlu1 %3761, %v4277_v58  }
 0x38b   : > { %v2300_v1 = vadd.f32 %v2292_v46, %v2246_v59  ;;  %v4439_v44 = vpop.permute.xlu0 %1656 }
 0x38d   : > { %v4425_v7 = vsel %vm4417_vm12, %v2300_v1, -10000.0 }
 0x38e   : > { %3764 = vset.pattern.permute.xlu1 %v3865_v61  ;;  %v4428_v48 = vpop.permute.xlu1 %2069  ;;  %v2322_v10 = vsel %vm2321_vm13, %v4425_v7, -inf }
 0x38f   : > { %2181 = vperm.xlu1 %3764, %v4272_v57   ;;  %2323 = vmax.xlane.f32.xlu0 %v2322_v10 }
 0x390   : > { %v1888_v3 = vpop.permute.xlu0 %1887 }
 0x393   : > { %3765 = vset.pattern.permute.xlu1 %v3866_v12  ;;  %v4442_v61 = vpop.permute.xlu1 %2123  ;;  %2329 = vmax.xlane.f32.xlu0 %v2328_v15 }
 0x394   : > { %2227 = vperm.xlu1 %3765, %v4277_v58  }
 0x395   : > { %v4454_v12 = vpop.permute.xlu0 %1949 }
 0x398   : > { %3768 = vset.pattern.permute.xlu1 %v3867_v18  ;;  %v4446_v2 = vpop.permute.xlu1 %2169 }
 0x399   : > { %2289 = vperm.xlu1 %3768, %v4272_v57   ;;  %v1628_v57 = vadd.s32 8, %v4013_v34 }
 0x39a   : > { %v1996_v18 = vpop.permute.xlu0 %1995 }
 0x39b   : > { %v4470_v21 = vsub.s32 %v4335_v31, %v1628_v57 }
 0x39c   : > { %v4449_v54 = vpop.permute.xlu1 %2177 }
 0x39d   : > { %1328 = vrot.lane.b32.xlu1 %v3971_v17, %s3868_s12  ;;  %vm1634_vm14 = vcmp.eq.s32.totalorder %v4470_v21, 4294967292  ;;  %vm1877_vm15 = vcmp.eq.s32.totalorder %v4470_v21, 4294967293  ;;  %vm1931_vm1 = vcmp.eq.s32.totalorder %v4470_v21, 4294967294  ;;  %vm1985_vm2 = vcmp.eq.s32.totalorder %v4470_v21, 4294967295 }
 0x39e   : > { %3784 = vset.pattern.permute.xlu1 %v3859_v45  ;;  %vm2039_vm0 = vcmp.eq.s32.totalorder %v4470_v21, 0  ;;  %v2023_v16 = vsel %vm1985_vm2, %v1996_v18, 0.0  ;;  %vm2093_vm11 = vcmp.eq.s32.totalorder %v4470_v21, 1  ;;  %vm2147_vm10 = vcmp.eq.s32.totalorder %v4470_v21, 2 }
 0x39f   : > { %v2050_v45 = vpop.permute.xlu0 %2049  ;;  %vm2201_vm9 = vcmp.eq.s32.totalorder %v4470_v21, 3  ;;  %vm2255_vm8 = vcmp.eq.s32.totalorder %v4470_v21, 4 }
 0x3a0   : > { %v2077_v53 = vsel %vm2039_vm0, %v2050_v45, 0.0 }
 0x3a1   : > { %1330 = vrot.lane.b32.xlu1 %v3986_v20, %s3868_s12  ;;  %v4458_v58 = vpop.permute.xlu1 %2231 }
 0x3a4   : > { %v2104_v4 = vpop.permute.xlu0 %2103 }
 0x3a5   : > { %1332 = vrot.lane.b32.xlu1 %v3994_v23, %s3868_s12  ;;  %v2131_v59 = vsel %vm2093_vm11, %v2104_v4, 0.0 }
 0x3a6   : > { %v4462_v5 = vpop.permute.xlu1 %2277 }
 0x3a9   : > { %1336 = vrot.lane.b32.xlu1 %v3998_v24, %s3868_s12  ;;  %v2158_v32 = vpop.permute.xlu0 %2157  ;;  %v1915_v24 = vsel %vm1877_vm15, %v1888_v3, 0.0 }
 0x3aa   : > { %v4467_v17 = vpop.permute.xlu1 %2285  ;;  %v2185_v49 = vsel %vm2147_vm10, %v2158_v32, 0.0 }
 0x3af   : > { %v1647_v20 = vpop.permute.xlu1 %1646 }
 0x3b0   : > { %v1680_v23 = vsel %vm1634_vm14, %v1647_v20, 0.0 }
 0x3b1   : > { %v1732_v34 = vadd.f32 %v4296_v62, %v1680_v23  ;;  %v2212_v62 = vpop.permute.xlu0 %2211 }
 0x3b2   : > { %v2239_v10 = vsel %vm2201_vm9, %v2212_v62, 0.0 }
 0x3b3   : > { %v1923_v47 = vadd.f32 %v1915_v24, %v1732_v34 }
 0x3b4   : > { %v1896_v40 = vpop.permute.xlu1 %1895 }
 0x3b5   : > { %v2266_v46 = vpop.permute.xlu0 %2265 }
 0x3b6   : > { %v2293_v3 = vsel %vm2255_vm8, %v2266_v46, 0.0 }
 0x3b9   : > { %v1942_v31 = vpop.permute.xlu1 %1941 }
 0x3ba   : > { %v1969_v50 = vsel %vm1931_vm1, %v1942_v31, 0.0 }
 0x3bb   : > { %v1977_v35 = vadd.f32 %v1969_v50, %v1923_v47 }
 0x3bd   : > { %v2031_v33 = vadd.f32 %v2023_v16, %v1977_v35  ;;  %v1683_v35 = vsel %vm1633_vm3, %v4311_v28, 0.0  ;;  %v1682_v16 = vsel %vm1634_vm14, %v4439_v44, 0.0  ;;  %v1972_v28 = vsel %vm5333_vm5, %v4328_v19, 0.0 }
 0x3be   : > { %v2004_v43 = vpop.permute.xlu1 %2003  ;;  %v1685_v44 = vsel %vm1633_vm3, %v4331_v30, 0.0  ;;  %v2080_v19 = vsel %vm5334_vm7, %v4372_v6, 0.0  ;;  %v1974_v30 = vsel %vm5333_vm5, %v4370_v52, 0.0  ;;  %v2028_v6 = vsel %vm1984_vm6, %v4400_v27, 0.0 }
 0x3bf   : > { %v2085_v41 = vadd.f32 %v2077_v53, %v2031_v33  ;;  %v1918_v33 = vsel %vm5332_vm4, %v4322_v26, 0.0  ;;  %v1917_v53 = vsel %vm1877_vm15, %v1896_v40, 0.0  ;;  %v2026_v26 = vsel %vm1984_vm6, %v4344_v36, 0.0 }
 0x3c0   : > { %v1870_v40 = vadd.f32 %v4309_v9, %v1685_v44  ;;  %v2025_v36 = vsel %vm1985_vm2, %v2004_v43, 0.0  ;;  %v2082_v43 = vsel %vm5334_vm7, %v4428_v48, 0.0  ;;  %vm5338_vm5 = vcmp.eq.s32.totalorder %v4340_v38, 2  ;;  %v2128_v44 = vpop.permute.xlu0 %2127 }
 0x3c1   : > { %v2139_v60 = vadd.f32 %v2131_v59, %v2085_v41  ;;  %v1823_v41 = vadd.f32 %v4307_v8, %v1683_v35  ;;  %v1779_v59 = vadd.f32 %v4298_v63, %v1682_v16  ;;  %v1920_v8 = vsel %vm5332_vm4, %v4346_v37, 0.0 }
 0x3c2   : > { %v1928_v37 = vadd.f32 %v1920_v8, %v1870_v40  ;;  %vm5337_vm4 = vcmp.eq.s32.totalorder %v4340_v38, 1  ;;  %v2188_v35 = vsel %vm5338_vm5, %v4446_v2, 0.0  ;;  %v2190_v2 = vsel %vm5338_vm5, %v4449_v54, 0.0 }
 0x3c3   : > { %v4496_v42 = vpop.permute.xlu1 %1666  ;;  %v2193_v1 = vadd.f32 %v2185_v49, %v2139_v60  ;;  %v1926_v60 = vadd.f32 %v1918_v33, %v1823_v41  ;;  %v1925_v49 = vadd.f32 %v1917_v53, %v1779_v59  ;;  %v2134_v9 = vsel %vm5337_vm4, %v4408_v56, 0.0 }
 0x3c4   : > { %vm5340_vm7 = vcmp.eq.s32.totalorder %v4340_v38, 4 }
 0x3c5   : > { %v2247_v15 = vadd.f32 %v2239_v10, %v2193_v1  ;;  %v1980_v63 = vadd.f32 %v1972_v28, %v1926_v60  ;;  %v1971_v1 = vsel %vm1931_vm1, %v4454_v12, 0.0  ;;  %v1982_v12 = vadd.f32 %v1974_v30, %v1928_v37 }
 0x3c7   : > { %v4502_v18 = vpop.permute.xlu1 %1676  ;;  %v2301_v57 = vadd.f32 %v2293_v3, %v2247_v15  ;;  %v2034_v10 = vadd.f32 %v2026_v26, %v1980_v63  ;;  %v1979_v15 = vadd.f32 %v1971_v1, %v1925_v49  ;;  %v2036_v27 = vadd.f32 %v2028_v6, %v1982_v12 }
 0x3c8   : > { %v2296_v26 = vsel %vm5340_vm7, %v4462_v5, 0.0  ;;  %v1686_v54 = vsel %vm1634_vm14, %v4502_v18, 0.0 }
 0x3c9   : > { %v4506_v45 = vsel %vm4417_vm12, %v2301_v57, -10000.0  ;;  %v2088_v57 = vadd.f32 %v2080_v19, %v2034_v10  ;;  %v2090_v59 = vadd.f32 %v2082_v43, %v2036_v27  ;;  %v1873_v1 = vadd.f32 %v4317_v14, %v1686_v54 }
 0x3ca   : > { %v2325_v4 = vsel %vm2321_vm13, %v4506_v45, -inf }
 0x3cb   : > { %v2142_v16 = vadd.f32 %v2134_v9, %v2088_v57 }
 0x3cc   : > { %v2058_v20 = vpop.permute.xlu1 %2057 }
 0x3cd   : > { %2326 = vmax.xlane.f32.xlu1 %v2325_v4  ;;  %v2079_v52 = vsel %vm2039_vm0, %v2058_v20, 0.0  ;;  %v2033_v4 = vadd.f32 %v2025_v36, %v1979_v15  ;;  %v2136_v20 = vsel %vm5337_vm4, %v4442_v61, 0.0  ;;  %v2196_v48 = vadd.f32 %v2188_v35, %v2142_v16 }
 0x3ce   : > { %v2144_v60 = vadd.f32 %v2136_v20, %v2090_v59  ;;  %v1684_v61 = vsel %vm1634_vm14, %v4496_v42, 0.0  ;;  %vm5339_vm4 = vcmp.eq.s32.totalorder %v4340_v38, 3 }
 0x3cf   : > { %v2087_v33 = vadd.f32 %v2079_v52, %v2033_v4  ;;  %vm5341_vm5 = vmmov %vm5339_vm4 }
 0x3d0   : > { %v2198_v8 = vadd.f32 %v2190_v2, %v2144_v60  ;;  %v2244_v19 = vsel %vm5341_vm5, %v4458_v58, 0.0  ;;  %v2298_v58 = vsel %vm5340_vm7, %v4467_v17, 0.0  ;;  %vm5344_vm5 = vcmp.eq.s32.totalorder %v4340_v38, 4294967294 }
 0x3d1   : > { %v1904_v23 = vpop.permute.xlu1 %1903  ;;  %vm5345_vm7 = vmmov %vm5344_vm5 }
 0x3d2   : > { %v1919_v63 = vsel %vm1877_vm15, %v1904_v23, 0.0  ;;  %v2252_v37 = vadd.f32 %v2244_v19, %v2198_v8 }
 0x3d5   : > { %v4510_v34 = vpop.permute.xlu1 %1911 }
 0x3d6   : > { %v1921_v5 = vsel %vm1877_vm15, %v4510_v34, 0.0 }
 0x3d7   : > { %v1929_v15 = vadd.f32 %v1921_v5, %v1873_v1 }
 0x3da   : > { %v2112_v32 = vpop.permute.xlu1 %2111 }
 0x3db   : > { %v2133_v56 = vsel %vm2093_vm11, %v2112_v32, 0.0 }
 0x3dc   : > { %v2141_v28 = vadd.f32 %v2133_v56, %v2087_v33 }
 0x3df   : > { %v4512_v24 = vpop.permute.xlu1 %1957 }
 0x3e0   : > { %v1973_v23 = vsel %vm1931_vm1, %v4512_v24, 0.0 }
 0x3e3   : > { %v4514_v31 = vpop.permute.xlu1 %1965 }
 0x3e4   : > { %v1975_v34 = vsel %vm1931_vm1, %v4514_v31, 0.0  ;;  %v2306_v31 = vadd.f32 %v2298_v58, %v2252_v37 }
 0x3e5   : > { %v1983_v57 = vadd.f32 %v1975_v34, %v1929_v15 }
 0x3e6   : > { %v4642_v20 = vsel %vm4417_vm12, %v2306_v31, -10000.0 }
 0x3e8   : > { %v2166_v47 = vpop.permute.xlu1 %2165 }
 0x3e9   : > { %v2187_v53 = vsel %vm2147_vm10, %v2166_v47, 0.0  ;;  %v2242_v47 = vsel %vm5339_vm4, %v4421_v55, 0.0  ;;  %v1826_v55 = vadd.f32 %v4315_v13, %v1684_v61  ;;  %v2174_v13 = vpop.permute.xlu0 %2173 }
 0x3ea   : > { %v2195_v49 = vadd.f32 %v2187_v53, %v2141_v28  ;;  %v2189_v28 = vsel %vm2147_vm10, %v2174_v13, 0.0 }
 0x3eb   : > { %v1927_v10 = vadd.f32 %v1919_v63, %v1826_v55 }
 0x3ed   : > { %v4516_v50 = vpop.permute.xlu1 %2011  ;;  %v1981_v9 = vadd.f32 %v1973_v23, %v1927_v10  ;;  %v2236_v56 = vpop.permute.xlu0 %2235 }
 0x3ee   : > { %v2027_v14 = vsel %vm1985_vm2, %v4516_v50, 0.0  ;;  %v2245_v54 = vsel %vm2201_vm9, %v2236_v56, 0.0 }
 0x3ef   : > { %v2035_v4 = vadd.f32 %v2027_v14, %v1981_v9 }
 0x3f1   : > { %v4524_v62 = vpop.permute.xlu1 %2019 }
 0x3f2   : > { %v2029_v17 = vsel %vm1985_vm2, %v4524_v62, 0.0 }
 0x3f3   : > { %v2037_v35 = vadd.f32 %v2029_v17, %v1983_v57 }
 0x3f6   : > { %v2220_v46 = vpop.permute.xlu1 %2219 }
 0x3f7   : > { %v2241_v32 = vsel %vm2201_vm9, %v2220_v46, 0.0  ;;  %v2250_v46 = vadd.f32 %v2242_v47, %v2196_v48  ;;  %v2340_v48 = vsel %vm2321_vm13, %v4642_v20, -inf }
 0x3f8   : > { %v2249_v40 = vadd.f32 %v2241_v32, %v2195_v49  ;;  %v2282_v32 = vpop.permute.xlu0 %2281 }
 0x3f9   : > { %v2304_v30 = vadd.f32 %v2296_v26, %v2250_v46 }
 0x3fb   : > { %v2066_v3 = vpop.permute.xlu1 %2065  ;;  %v4632_v50 = vsel %vm4417_vm12, %v2304_v30, -10000.0 }
 0x3fc   : > { %v2081_v12 = vsel %vm2039_vm0, %v2066_v3, 0.0  ;;  %v2334_v27 = vsel %vm2321_vm13, %v4632_v50, -inf  ;;  %v1327_v30 = vpop.permute.xlu0 %1326 }
 0x3fd   : > { %v2089_v16 = vadd.f32 %v2081_v12, %v2035_v4 }
 0x3ff   : > { %v2074_v41 = vpop.permute.xlu1 %2073 }
 0x400   : > { %v2083_v43 = vsel %vm2039_vm0, %v2074_v41, 0.0  ;;  %v2137_v41 = vsel %vm2093_vm11, %v2128_v44, 0.0  ;;  %v2297_v44 = vsel %vm2255_vm8, %v2282_v32, 0.0  ;;  %v1335_v1 = vpop.permute.xlu0 %1334 }
 0x401   : > { %v2091_v33 = vadd.f32 %v2083_v43, %v2037_v35 }
 0x403   : > { %v2145_v2 = vadd.f32 %v2137_v41, %v2091_v33 }
 0x404   : > { %v2274_v42 = vpop.permute.xlu1 %2273 }
 0x405   : > { %v2295_v18 = vsel %vm2255_vm8, %v2274_v42, 0.0 }
 0x406   : > { %v2303_v36 = vadd.f32 %v2295_v18, %v2249_v40 }
 0x408   : > { %v4621_v24 = vsel %vm4417_vm12, %v2303_v36, -10000.0 }
 0x409   : > { %v2120_v6 = vpop.permute.xlu1 %2119  ;;  %v2331_v52 = vsel %vm2321_vm13, %v4621_v24, -inf }
 0x40a   : > { %2332 = vmax.xlane.f32.xlu0 %v2331_v52  ;;  %v2135_v62 = vsel %vm2093_vm11, %v2120_v6, 0.0 }
 0x40b   : > { %v2143_v53 = vadd.f32 %v2135_v62, %v2089_v16  ;;  %v1350_v16 = vcombine.low %v1327_v30, %v1335_v1 }
 0x40d   : > { %v2197_v61 = vadd.f32 %v2189_v28, %v2143_v53 }
 0x40e   : > { %v2182_v3 = vpop.permute.xlu1 %2181  ;;  %2335 = vmax.xlane.f32.xlu0 %v2334_v27  ;;  %v1351_v27 = vcombine.high %v1327_v30, %v1335_v1 }
 0x40f   : > { %v2191_v59 = vsel %vm2147_vm10, %v2182_v3, 0.0 }
 0x410   : > { %v2199_v49 = vadd.f32 %v2191_v59, %v2145_v2 }
 0x412   : > { %2341 = vmax.xlane.f32.xlu0 %v2340_v48  ;;  %v2253_v63 = vadd.f32 %v2245_v54, %v2199_v49  ;;  %v1365_v48 = vrot.slane %v1351_v27, %v4020_v39 }
 0x413   : > { %v2228_v60 = vpop.permute.xlu1 %2227 }
 0x414   : > { %v2243_v47 = vsel %vm2201_vm9, %v2228_v60, 0.0 }
 0x415   : > { %v2251_v26 = vadd.f32 %v2243_v47, %v2197_v61 }
 0x417   : > { %v2305_v8 = vadd.f32 %v2297_v44, %v2251_v26 }
 0x418   : > { %v2290_v46 = vpop.permute.xlu1 %2289 }
 0x419   : > { %v2299_v40 = vsel %vm2255_vm8, %v2290_v46, 0.0  ;;  %v4662_v42 = vsel %vm4417_vm12, %v2305_v8, -10000.0 }
 0x41a   : > { %v2307_v19 = vadd.f32 %v2299_v40, %v2253_v63  ;;  %v2337_v55 = vsel %vm2321_vm13, %v4662_v42, -inf }
 0x41b   : > { %2338 = vmax.xlane.f32.xlu1 %v2337_v55 }
 0x41c   : > { %v4668_v5 = vsel %vm4417_vm12, %v2307_v19, -10000.0  ;;  %v2324_v23 = vpop.xlane.xlu0 %2323  ;;  %v4680_v37 = vpop.permute.xlu1 %1328  ;;  %vm5342_vm12 = vcmp.eq.s32.totalorder %v4340_v38, 4294967293 }
 0x41d   : > { %v2343_v18 = vsel %vm2321_vm13, %v4668_v5, -inf  ;;  %v2346_v36 = vsub.f32 %v4425_v7, %v2324_v23  ;;  %vm5343_vm4 = vmmov %vm5342_vm12 }
 0x41f   : > { %2344 = vmax.xlane.f32.xlu1 %v2343_v18  ;;  %v2354_v13 = vmul.f32 1.442695, %v2346_v36 }
 0x420   : > { %v2330_v58 = vpop.xlane.xlu0 %2329 }
 0x421   : > { %v2348_v29 = vsub.f32 %v4435_v11, %v2330_v58  ;;  %3793 = vpow2.f32 %v2354_v13 }
 0x423   : > { %v2358_v10 = vmul.f32 1.442695, %v2348_v29 }
 0x425   : > { %3795 = vpow2.f32 %v2358_v10 }
 0x428   : > { %1338 = vrot.lane.b32.xlu0 %v3991_v22, %s3868_s12 }
 0x42b   : > { %v4678_v34 = vpop.eup %3793 }
 0x42c   : > { %v2370_v22 = vsel %vm2321_vm13, %v4678_v34, 0.0 }
 0x42f   : > { %v4684_v15 = vpop.eup %3795 }
 0x430   : > { %1340 = vrot.lane.b32.xlu1 %v4001_v25, %s3868_s12  ;;  %v1331_v25 = vpop.permute.xlu1 %1330  ;;  %v2376_v7 = vsel %vm2321_vm13, %v4684_v15, 0.0 }
 0x434   : > { %v4688_v14 = vpop.permute.xlu1 %1332 }
 0x438   : > { %v4690_v11 = vpop.permute.xlu1 %1336 }
 0x439   : > { %v1418_v10 = vcombine.low %v4680_v37, %v4690_v11 }
 0x447   : > { %2371 = vadd.xlane.f32.xlu0 %v2370_v22  ;;  %v1419_v22 = vcombine.high %v4680_v37, %v4690_v11 }
 0x44b   : > { %2377 = vadd.xlane.f32.xlu0 %v2376_v7 }
 0x45a   : > { %v2327_v9 = vpop.xlane.xlu1 %2326 }
 0x45b   : > { %v2347_v17 = vsub.f32 %v4506_v45, %v2327_v9 }
 0x45d   : > { %v2356_v6 = vmul.f32 1.442695, %v2347_v17 }
 0x45f   : > { %3797 = vpow2.f32 %v2356_v6 }
 0x469   : > { %v4693_v52 = vpop.eup %3797 }
 0x46a   : > { %v2373_v31 = vsel %vm2321_vm13, %v4693_v52, 0.0 }
 0x46b   : > { %2374 = vadd.xlane.f32.xlu1 %v2373_v31 }
 0x497   : > { %v2333_v57 = vpop.xlane.xlu0 %2332 }
 0x498   : > { %v2349_v12 = vsub.f32 %v4621_v24, %v2333_v57  ;;  %v1358_v24 = vrot.slane %v1350_v16, %v4020_v39 }
 0x49a   : > { %v2360_v4 = vmul.f32 1.442695, %v2349_v12 }
 0x49b   : > { %v2336_v43 = vpop.xlane.xlu0 %2335 }
 0x49c   : > { %3799 = vpow2.f32 %v2360_v4  ;;  %v2350_v35 = vsub.f32 %v4632_v50, %v2336_v43 }
 0x49e   : > { %v2362_v62 = vmul.f32 1.442695, %v2350_v35  ;;  %v1426_v35 = vrot.slane %v1418_v10, %v4020_v39 }
 0x49f   : > { %v2342_v56 = vpop.xlane.xlu0 %2341 }
 0x4a0   : > { %3801 = vpow2.f32 %v2362_v62  ;;  %v2352_v45 = vsub.f32 %v4642_v20, %v2342_v56  ;;  %v1433_v62 = vrot.slane %v1419_v22, %v4020_v39 }
 0x4a2   : > { %v2366_v33 = vmul.f32 1.442695, %v2352_v45 }
 0x4a3   : > { %v1339_v3 = vpop.permute.xlu0 %1338 }
 0x4a4   : > { %3803 = vpow2.f32 %v2366_v33  ;;  %v1366_v53 = vcombine.low %v1331_v25, %v1339_v3  ;;  %v1367_v41 = vcombine.high %v1331_v25, %v1339_v3 }
 0x4a6   : > { %v4700_v59 = vpop.eup %3799  ;;  %v1374_v50 = vrot.slane %v1366_v53, %v4020_v39  ;;  %v1381_v28 = vrot.slane %v1367_v41, %v4020_v39 }
 0x4a7   : > { %v2379_v20 = vsel %vm2321_vm13, %v4700_v59, 0.0 }
 0x4a8   : > { %v1382_v2 = vcombine.low %v1358_v24, %v1374_v50  ;;  %v1383_v32 = vcombine.high %v1358_v24, %v1374_v50  ;;  %v1398_v60 = vcombine.low %v1365_v48, %v1381_v28  ;;  %v1399_v61 = vcombine.high %v1365_v48, %v1381_v28  ;;  %2380 = vadd.xlane.f32.xlu1 %v2379_v20  ;;  %v2339_v49 = vpop.xlane.xlu1 %2338 }
 0x4a9   : > { %v2351_v47 = vsub.f32 %v4662_v42, %v2339_v49 }
 0x4aa   : > { %v4709_v26 = vpop.eup %3801  ;;  %v1390_v44 = vrot.slane %v1382_v2, %v4035_v51  ;;  %v1397_v54 = vrot.slane %v1383_v32, %v4035_v51  ;;  %v1406_v8 = vrot.slane %v1398_v60, %v4035_v51  ;;  %v1413_v46 = vrot.slane %v1399_v61, %v4035_v51 }
 0x4ab   : > { %v2364_v63 = vmul.f32 1.442695, %v2351_v47  ;;  %v2382_v40 = vsel %vm2321_vm13, %v4709_v26, 0.0 }
 0x4ac   : > { %v1486_v19 = vcombine.low %v1390_v44, %v1397_v54  ;;  %v3532_v55 = vcombine.high %v1390_v44, %v1397_v54  ;;  %v1502_v18 = vcombine.low %v1406_v8, %v1413_v46  ;;  %v3533_v30 = vcombine.high %v1406_v8, %v1413_v46  ;;  %2383 = vadd.xlane.f32.xlu0 %v2382_v40  ;;  %v2345_v42 = vpop.xlane.xlu1 %2344 }
 0x4ad   : > { %3805 = vpow2.f32 %v2364_v63  ;;  %v2353_v1 = vsub.f32 %v4668_v5, %v2345_v42 }
 0x4ae   : > { %v4718_v23 = vpop.eup %3803  ;;  %v1493_v36 = vrot.slane %v1486_v19, %v4020_v39  ;;  %v1501_v58 = vrot.slane %v3532_v55, %v4020_v39  ;;  %v1509_v13 = vrot.slane %v1502_v18, %v4020_v39  ;;  %v1517_v29 = vrot.slane %v3533_v30, %v4020_v39 }
 0x4af   : > { %v2368_v25 = vmul.f32 1.442695, %v2353_v1  ;;  %v2388_v5 = vsel %vm2321_vm13, %v4718_v23, 0.0 }
 0x4b0   : > { %2389 = vadd.xlane.f32.xlu0 %v2388_v5  ;;  %v1341_v7 = vpop.permute.xlu1 %1340  ;;  %v1518_v9 = vcombine.low %v1493_v36, %v1501_v58  ;;  %v1534_v17 = vcombine.low %v1509_v13, %v1517_v29  ;;  %v1519_v6 = vcombine.high %v1493_v36, %v1501_v58  ;;  %v1535_v31 = vcombine.high %v1509_v13, %v1517_v29 }
 0x4b1   : > { %3807 = vpow2.f32 %v2368_v25  ;;  %v1434_v57 = vcombine.low %v4688_v14, %v1341_v7  ;;  %v1435_v12 = vcombine.high %v4688_v14, %v1341_v7 }
 0x4b2   : > { %v1526_v4 = vrot.slane %v1518_v9, %v4035_v51  ;;  %v1542_v43 = vrot.slane %v1534_v17, %v4035_v51  ;;  %v1533_v37 = vrot.slane %v1519_v6, %v4035_v51  ;;  %v1549_v11 = vrot.slane %v1535_v31, %v4035_v51 }
 0x4b3   : > { %v1442_v56 = vrot.slane %v1434_v57, %v4020_v39  ;;  %v1449_v45 = vrot.slane %v1435_v12, %v4020_v39 }
 0x4b4   : > { %v1551_v16 = vcombine.high %v1526_v4, %v1542_v43  ;;  %v1553_v27 = vcombine.high %v1533_v37, %v1549_v11  ;;  %v1552_v33 = vcombine.low %v1533_v37, %v1549_v11  ;;  %v1550_v58 = vcombine.low %v1526_v4, %v1542_v43 }
 0x4b5   : > { %v1450_v14 = vcombine.low %v1426_v35, %v1442_v56  ;;  %v1451_v3 = vcombine.high %v1426_v35, %v1442_v56  ;;  %v1466_v53 = vcombine.low %v1433_v62, %v1449_v45  ;;  %v1467_v41 = vcombine.high %v1433_v62, %v1449_v45 }
 0x4b7   : > { %v4740_v24 = vpop.eup %3805  ;;  %v1458_v48 = vrot.slane %v1450_v14, %v4035_v51  ;;  %v1465_v50 = vrot.slane %v1451_v3, %v4035_v51  ;;  %v1474_v28 = vrot.slane %v1466_v53, %v4035_v51  ;;  %v1481_v20 = vrot.slane %v1467_v41, %v4035_v51 }
 0x4b8   : > { %v2385_v2 = vsel %vm2321_vm13, %v4740_v24, 0.0 }
 0x4b9   : > { %v1554_v32 = vcombine.low %v1458_v48, %v1465_v50  ;;  %v3534_v60 = vcombine.high %v1458_v48, %v1465_v50  ;;  %v1570_v61 = vcombine.low %v1474_v28, %v1481_v20  ;;  %v3535_v49 = vcombine.high %v1474_v28, %v1481_v20  ;;  %2386 = vadd.xlane.f32.xlu1 %v2385_v2 }
 0x4bb   : > { %v4748_v47 = vpop.eup %3807  ;;  %v1561_v44 = vrot.slane %v1554_v32, %v4020_v39  ;;  %v1569_v54 = vrot.slane %v3534_v60, %v4020_v39  ;;  %v1577_v8 = vrot.slane %v1570_v61, %v4020_v39  ;;  %v1585_v46 = vrot.slane %v3535_v49, %v4020_v39 }
 0x4bc   : > { %v2391_v63 = vsel %vm2321_vm13, %v4748_v47, 0.0 }
 0x4bd   : > { %2392 = vadd.xlane.f32.xlu1 %v2391_v63  ;;  %v1586_v40 = vcombine.low %v1561_v44, %v1569_v54  ;;  %v1602_v19 = vcombine.low %v1577_v8, %v1585_v46  ;;  %v1587_v55 = vcombine.high %v1561_v44, %v1569_v54  ;;  %v1603_v18 = vcombine.high %v1577_v8, %v1585_v46 }
 0x4bf   : > { %v1594_v30 = vrot.slane %v1586_v40, %v4035_v51  ;;  %v1610_v42 = vrot.slane %v1602_v19, %v4035_v51  ;;  %v1601_v1 = vrot.slane %v1587_v55, %v4035_v51  ;;  %v1617_v36 = vrot.slane %v1603_v18, %v4035_v51 }
 0x4c1   : > { %v1618_v13 = vcombine.low %v1594_v30, %v1610_v42  ;;  %v1619_v29 = vcombine.high %v1594_v30, %v1610_v42  ;;  %v1621_v10 = vcombine.high %v1601_v1, %v1617_v36  ;;  %v1620_v22 = vcombine.low %v1601_v1, %v1617_v36 }
 0x4c3   : > { %v1622_v25 = vpack.c.bf16 %v1618_v13, %v1550_v58  ;;  %v1623_v5 = vpack.c.bf16 %v1619_v29, %v1551_v16  ;;  %v4760_v7 = vpack.c.bf16 %v1621_v10, %v1553_v27  ;;  %v4762_v9 = vpack.c.bf16 %v1620_v22, %v1552_v33 }
 0x4c5   : > { %3642 = vmatpush3.bf16.msra.mxu1 %v1622_v25 }
 0x4c6   : > { %3647 = vmatprep.subr.bf16.mxu1 %v3848_v0 }
 0x4d4   : > { %v2372_v17 = vpop.xlane.xlu0 %2371 }
 0x4d5   : > { %3809 = vrcp.f32 %v2372_v17 }
 0x4d8   : > { %v2378_v6 = vpop.xlane.xlu0 %2377 }
 0x4d9   : > { %3811 = vrcp.f32 %v2378_v6 }
 0x4df   : > { %v3810_v31 = vpop.eup %3809 }
 0x4e0   : > { %v4766_v57 = vmul.f32 %v3810_v31, %v4678_v34 }
 0x4e2   : > { %v2414_v12 = vsel %vm1633_vm3, %v4766_v57, 0.0  ;;  %v2446_v11 = vsel %vm5342_vm12, %v4766_v57, 0.0  ;;  %v2478_v45 = vsel %vm5344_vm5, %v4766_v57, 0.0  ;;  %v2510_v3 = vsel %vm1984_vm6, %v4766_v57, 0.0 }
 0x4e3   : > { %v3812_v4 = vpop.eup %3811  ;;  %v2422_v43 = vsel %vm2321_vm13, %v2414_v12, 0.0  ;;  %v2454_v35 = vsel %vm2321_vm13, %v2446_v11, 0.0  ;;  %v2486_v16 = vsel %vm2321_vm13, %v2478_v45, 0.0  ;;  %v2518_v53 = vsel %vm2321_vm13, %v2510_v3, 0.0 }
 0x4e4   : > { %v4773_v37 = vmul.f32 %v3812_v4, %v4684_v15  ;;  %2423 = vadd.xlane.f32.xlu0 %v2422_v43  ;;  %vm5346_vm12 = vcmp.eq.s32.totalorder %v4340_v38, 0  ;;  %vm5348_vm5 = vcmp.eq.s32.totalorder %v4340_v38, 1 }
 0x4e5   : > { %v2542_v50 = vsel %vm5346_vm12, %v4766_v57, 0.0 }
 0x4e6   : > { %v2416_v34 = vsel %vm1633_vm3, %v4773_v37, 0.0  ;;  %v2448_v15 = vsel %vm5343_vm4, %v4773_v37, 0.0  ;;  %v2480_v27 = vsel %vm5345_vm7, %v4773_v37, 0.0  ;;  %v2512_v41 = vsel %vm1984_vm6, %v4773_v37, 0.0  ;;  %vm5347_vm4 = vmmov %vm5346_vm12 }
 0x4e7   : > { %v2428_v62 = vsel %vm2321_vm13, %v2416_v34, 0.0  ;;  %v2460_v56 = vsel %vm2321_vm13, %v2448_v15, 0.0  ;;  %v2492_v33 = vsel %vm2321_vm13, %v2480_v27, 0.0  ;;  %v2524_v48 = vsel %vm2321_vm13, %v2512_v41, 0.0  ;;  %vm5350_vm12 = vmmov %vm5348_vm5 }
 0x4e8   : > { %2455 = vadd.xlane.f32.xlu0 %v2454_v35  ;;  %v2550_v20 = vsel %vm2321_vm13, %v2542_v50, 0.0  ;;  %v2544_v32 = vsel %vm5347_vm4, %v4773_v37, 0.0  ;;  %vm5349_vm7 = vmmov 0   ;;  %v2576_v63 = vsel %vm5350_vm12, %v4773_v37, 0.0 }
 0x4e9   : > { %v2556_v49 = vsel %vm2321_vm13, %v2544_v32, 0.0  ;;  %v2588_v40 = vsel %vm2321_vm13, %v2576_v63, 0.0  ;;  %vm5351_vm4 = vcmp.eq.s32.totalorder %v4340_v38, 2  ;;  %vm5353_vm12 = vcmp.eq.s32.totalorder %v4340_v38, 3 }
 0x4ea   : > { %v2606_v19 = vsel %vm5351_vm4, %v4766_v57, 0.0  ;;  %v2638_v42 = vsel %vm5353_vm12, %v4766_v57, 0.0 }
 0x4eb   : > { %v2614_v55 = vsel %vm2321_vm13, %v2606_v19, 0.0  ;;  %v2646_v1 = vsel %vm2321_vm13, %v2638_v42, 0.0 }
 0x4ec   : > { %2429 = vadd.xlane.f32.xlu0 %v2428_v62 }
 0x4f0   : > { %2461 = vadd.xlane.f32.xlu0 %v2460_v56 }
 0x4f4   : > { %2487 = vadd.xlane.f32.xlu0 %v2486_v16 }
 0x4f8   : > { %2493 = vadd.xlane.f32.xlu0 %v2492_v33  ;;  %v2375_v14 = vpop.xlane.xlu1 %2374 }
 0x4f9   : > { %3813 = vrcp.f32 %v2375_v14 }
 0x4fc   : > { %2519 = vadd.xlane.f32.xlu0 %v2518_v53 }
 0x500   : > { %2525 = vadd.xlane.f32.xlu0 %v2524_v48 }
 0x503   : > { %v3814_v28 = vpop.eup %3813 }
 0x504   : > { %v4808_v2 = vmul.f32 %v3814_v28, %v4693_v52  ;;  %2551 = vadd.xlane.f32.xlu0 %v2550_v20  ;;  %v2574_v52 = vsel %vm5348_vm5, %v4766_v57, 0.0  ;;  %vm5352_vm5 = vmmov %vm5351_vm4 }
 0x505   : > { %v2582_v8 = vsel %vm2321_vm13, %v2574_v52, 0.0  ;;  %v2608_v18 = vsel %vm5352_vm5, %v4773_v37, 0.0  ;;  %vm5354_vm4 = vmmov %vm5353_vm12  ;;  %vm5355_vm5 = vcmp.eq.s32.totalorder %v4340_v38, 4 }
 0x506   : > { %v2415_v60 = vsel %vm1634_vm14, %v4808_v2, 0.0  ;;  %v2410_v61 = vpack.c.bf16 %v4808_v2, %v4766_v57  ;;  %v2447_v54 = vsel %vm1877_vm15, %v4808_v2, 0.0  ;;  %v2620_v30 = vsel %vm2321_vm13, %v2608_v18, 0.0  ;;  %vm5356_vm12 = vmmov %vm5355_vm5 }
 0x507   : > { %v2425_v44 = vsel %vm2321_vm13, %v2415_v60, 0.0  ;;  %v2457_v46 = vsel %vm2321_vm13, %v2447_v54, 0.0  ;;  %v2640_v36 = vsel %vm5354_vm4, %v4773_v37, 0.0  ;;  %v2670_v13 = vsel %vm5355_vm5, %v4766_v57, 0.0 }
 0x508   : > { %2557 = vadd.xlane.f32.xlu0 %v2556_v49  ;;  %2426 = vadd.xlane.f32.xlu1 %v2425_v44  ;;  %v2652_v58 = vsel %vm2321_vm13, %v2640_v36, 0.0  ;;  %v2678_v29 = vsel %vm2321_vm13, %v2670_v13, 0.0  ;;  %v2672_v10 = vsel %vm5356_vm12, %v4773_v37, 0.0  ;;  %v2511_v25 = vsel %vm1985_vm2, %v4808_v2, 0.0 }
 0x509   : > { %3644 = vmatmul.mubr.msk.bf16.vlgmr.msra.gmra.mrb[12].mxu1 %vm2321_vm13, %v2410_v61  ;;  %v2684_v22 = vsel %vm2321_vm13, %v2672_v10, 0.0  ;;  %vm5357_vm4 = vcmp.eq.s32.totalorder %v4340_v38, 4294967293  ;;  %v2479_v16 = vsel %vm1931_vm1, %v4808_v2, 0.0  ;;  %v2543_v49 = vsel %vm2039_vm0, %v4808_v2, 0.0 }
 0x50a   : > { %3648 = vmatpush3.bf16.msra.mxu1 %v1623_v5  ;;  %3649 = vmatprep.mubr.msk.bf16.mxu1 %vm5349_vm7, %v3848_v0  ;;  %v2521_v5 = vsel %vm2321_vm13, %v2511_v25, 0.0  ;;  %v2489_v14 = vsel %vm2321_vm13, %v2479_v16, 0.0  ;;  %vm5358_vm5 = vmmov %vm5357_vm4  ;;  %v2575_v18 = vsel %vm2093_vm11, %v4808_v2, 0.0  ;;  %v2607_v10 = vsel %vm2147_vm10, %v4808_v2, 0.0 }
 0x50b   : > { %3659 = vmatprep.subr.bf16.mxu1 %v3848_v0  ;;  %v2585_v42 = vsel %vm2321_vm13, %v2575_v18, 0.0  ;;  %v2617_v25 = vsel %vm2321_vm13, %v2607_v10, 0.0 }
 0x50c   : > { %2583 = vadd.xlane.f32.xlu0 %v2582_v8  ;;  %2458 = vadd.xlane.f32.xlu1 %v2457_v46  ;;  %v2553_v8 = vsel %vm2321_vm13, %v2543_v49, 0.0 }
 0x510   : > { %2589 = vadd.xlane.f32.xlu0 %v2588_v40 }
 0x514   : > { %2615 = vadd.xlane.f32.xlu0 %v2614_v55 }
 0x518   : > { %2621 = vadd.xlane.f32.xlu0 %v2620_v30 }
 0x51c   : > { %2647 = vadd.xlane.f32.xlu0 %v2646_v1 }
 0x520   : > { %2653 = vadd.xlane.f32.xlu0 %v2652_v58 }
 0x524   : > { %2679 = vadd.xlane.f32.xlu0 %v2678_v29 }
 0x528   : > { %2685 = vadd.xlane.f32.xlu0 %v2684_v22 }
 0x52c   : > { %2522 = vadd.xlane.f32.xlu0 %v2521_v5 }
 0x535   : > { %v2381_v17 = vpop.xlane.xlu1 %2380 }
 0x536   : > { %3815 = vrcp.f32 %v2381_v17 }
 0x539   : > { %v2384_v6 = vpop.xlane.xlu0 %2383 }
 0x53a   : > { %3817 = vrcp.f32 %v2384_v6 }
 0x53d   : > { %v2390_v31 = vpop.xlane.xlu0 %2389 }
 0x53e   : > { %3819 = vrcp.f32 %v2390_v31 }
 0x540   : > { %v3816_v57 = vpop.eup %3815 }
 0x541   : > { %v4865_v12 = vmul.f32 %v3816_v57, %v4700_v59 }
 0x543   : > { %v2417_v4 = vsel %vm1634_vm14, %v4865_v12, 0.0  ;;  %v2411_v43 = vpack.c.bf16 %v4865_v12, %v4773_v37  ;;  %v2449_v59 = vsel %vm1877_vm15, %v4865_v12, 0.0  ;;  %v2481_v3 = vsel %vm1931_vm1, %v4865_v12, 0.0 }
 0x544   : > { %v3818_v11 = vpop.eup %3817  ;;  %v2431_v35 = vsel %vm2321_vm13, %v2417_v4, 0.0  ;;  %v2463_v56 = vsel %vm2321_vm13, %v2449_v59, 0.0  ;;  %v2495_v41 = vsel %vm2321_vm13, %v2481_v3, 0.0  ;;  %v2513_v50 = vsel %vm1985_vm2, %v4865_v12, 0.0 }
 0x545   : > { %v4874_v34 = vmul.f32 %v3818_v11, %v4709_v26  ;;  %2432 = vadd.xlane.f32.xlu1 %v2431_v35  ;;  %3650 = vmatmul.mubr.msk.bf16.vlgmr.msra.gmra.mrb[16].mxu1 %vm2321_vm13, %v2411_v43  ;;  %v2527_v32 = vsel %vm2321_vm13, %v2513_v50, 0.0  ;;  %v2577_v36 = vsel %vm2093_vm11, %v4865_v12, 0.0  ;;  %v2609_v17 = vsel %vm2147_vm10, %v4865_v12, 0.0 }
 0x546   : > { %3660 = vmatpush3.bf16.msra.mxu1 %v4760_v7  ;;  %v2387_v62 = vpop.xlane.xlu1 %2386  ;;  %3661 = vmatprep.mubr.msk.bf16.mxu1 %vm5349_vm7, %v3848_v0  ;;  %v2591_v13 = vsel %vm2321_vm13, %v2577_v36, 0.0  ;;  %v2623_v31 = vsel %vm2321_vm13, %v2609_v17, 0.0  ;;  %v2639_v4 = vsel %vm2201_vm9, %v4808_v2, 0.0 }
 0x547   : > { %v2418_v37 = vsel %vm1633_vm3, %v4874_v34, 0.0  ;;  %v2450_v7 = vsel %vm5357_vm4, %v4874_v34, 0.0  ;;  %3821 = vrcp.f32 %v2387_v62  ;;  %v2514_v55 = vsel %vm1984_vm6, %v4874_v34, 0.0 }
 0x548   : > { %v3820_v15 = vpop.eup %3819  ;;  %v2434_v26 = vsel %vm2321_vm13, %v2418_v37, 0.0  ;;  %v2466_v33 = vsel %vm2321_vm13, %v2450_v7, 0.0  ;;  %v2530_v30 = vsel %vm2321_vm13, %v2514_v55, 0.0  ;;  %vm5361_vm4 = vcmp.eq.s32.totalorder %v4340_v38, 0 }
 0x549   : > { %v4889_v45 = vmul.f32 %v3820_v15, %v4718_v23  ;;  %2435 = vadd.xlane.f32.xlu0 %v2434_v26  ;;  %2464 = vadd.xlane.f32.xlu1 %v2463_v56  ;;  %v2546_v29 = vsel %vm5361_vm4, %v4874_v34, 0.0  ;;  %v2649_v11 = vsel %vm2321_vm13, %v2639_v4, 0.0  ;;  %v2641_v62 = vsel %vm2201_vm9, %v4865_v12, 0.0 }
 0x54a   : > { %v2393_v27 = vpop.xlane.xlu1 %2392  ;;  %v2562_v22 = vsel %vm2321_vm13, %v2546_v29, 0.0  ;;  %v2655_v15 = vsel %vm2321_vm13, %v2641_v62, 0.0  ;;  %v2671_v7 = vsel %vm2255_vm8, %v4808_v2, 0.0 }
 0x54b   : > { %3823 = vrcp.f32 %v2393_v27  ;;  %v2420_v23 = vsel %vm1633_vm3, %v4889_v45, 0.0  ;;  %v2452_v48 = vsel %vm5358_vm5, %v4889_v45, 0.0  ;;  %vm5359_vm3 = vcmp.eq.s32.totalorder %v4340_v38, 4294967294 }
 0x54c   : > { %v2440_v53 = vsel %vm2321_vm13, %v2420_v23, 0.0  ;;  %v2472_v20 = vsel %vm2321_vm13, %v2452_v48, 0.0  ;;  %v2482_v61 = vsel %vm5359_vm3, %v4874_v34, 0.0  ;;  %vm5360_vm12 = vmmov %vm5359_vm3  ;;  %v2516_v1 = vsel %vm1984_vm6, %v4889_v45, 0.0 }
 0x54d   : > { %2467 = vadd.xlane.f32.xlu0 %v2466_v33  ;;  %2490 = vadd.xlane.f32.xlu1 %v2489_v14  ;;  %v2498_v54 = vsel %vm2321_vm13, %v2482_v61, 0.0  ;;  %v2484_v63 = vsel %vm5360_vm12, %v4889_v45, 0.0  ;;  %v2536_v58 = vsel %vm2321_vm13, %v2516_v1, 0.0  ;;  %vm5362_vm6 = vmmov %vm5361_vm4  ;;  %vm5363_vm5 = vcmp.eq.s32.totalorder %v4340_v38, 1 }
 0x54e   : > { %v2548_v5 = vsel %vm5362_vm6, %v4889_v45, 0.0  ;;  %v2578_v57 = vsel %vm5363_vm5, %v4874_v34, 0.0  ;;  %vm5364_vm3 = vmmov %vm5363_vm5  ;;  %vm2702_vm12 = vcmask 7168   ;;  %vm5365_vm4 = vcmp.eq.s32.totalorder %v4340_v38, 2 }
 0x54f   : > { %v2568_v6 = vsel %vm2321_vm13, %v2548_v5, 0.0  ;;  %v2594_v43 = vsel %vm2321_vm13, %v2578_v57, 0.0  ;;  %v2580_v59 = vsel %vm5364_vm3, %v4889_v45, 0.0  ;;  %v2610_v56 = vsel %vm5365_vm4, %v4874_v34, 0.0  ;;  %vm5366_vm6 = vmmov %vm5365_vm4 }
 0x550   : > { %v2600_v37 = vsel %vm2321_vm13, %v2580_v59, 0.0  ;;  %v2626_v27 = vsel %vm2321_vm13, %v2610_v56, 0.0  ;;  %v2681_v33 = vsel %vm2321_vm13, %v2671_v7, 0.0  ;;  %v2612_v14 = vsel %vm5366_vm6, %v4889_v45, 0.0 }
 0x551   : > { %2441 = vadd.xlane.f32.xlu0 %v2440_v53  ;;  %2496 = vadd.xlane.f32.xlu1 %v2495_v41  ;;  %v3822_v28 = vpop.eup %3821  ;;  %v2673_v23 = vsel %vm2255_vm8, %v4865_v12, 0.0  ;;  %v2632_v3 = vsel %vm2321_vm13, %v2612_v14, 0.0  ;;  %vm5367_vm5 = vcmp.eq.s32.totalorder %v4340_v38, 3  ;;  %vm5369_vm4 = vcmp.eq.s32.totalorder %v4340_v38, 4 }
 0x552   : > { %v4925_v52 = vmul.f32 %v3822_v28, %v4740_v24  ;;  %v2504_v24 = vsel %vm2321_vm13, %v2484_v63, 0.0  ;;  %v2687_v2 = vsel %vm2321_vm13, %v2673_v23, 0.0  ;;  %v2642_v53 = vsel %vm5367_vm5, %v4874_v34, 0.0  ;;  %vm5368_vm3 = vmmov %vm5367_vm5 }
 0x553   : > { %v2658_v48 = vsel %vm2321_vm13, %v2642_v53, 0.0  ;;  %vm5370_vm6 = vmmov %vm5369_vm4  ;;  %vm2798_vm5 = vcmask 1044480  }
 0x554   : > { %v2412_v19 = vpack.c.bf16 %v4925_v52, %v4874_v34  ;;  %v2419_v41 = vsel %vm1634_vm14, %v4925_v52, 0.0  ;;  %v2451_v28 = vsel %vm1877_vm15, %v4925_v52, 0.0  ;;  %v2515_v29 = vsel %vm1985_vm2, %v4925_v52, 0.0 }
 0x555   : > { %v3824_v60 = vpop.eup %3823  ;;  %2473 = vadd.xlane.f32.xlu0 %v2472_v20  ;;  %2528 = vadd.xlane.f32.xlu1 %v2527_v32  ;;  %v2437_v50 = vsel %vm2321_vm13, %v2419_v41, 0.0  ;;  %v2469_v32 = vsel %vm2321_vm13, %v2451_v28, 0.0  ;;  %v2547_v17 = vsel %vm2039_vm0, %v4925_v52, 0.0  ;;  %v2675_v41 = vsel %vm2255_vm8, %v4925_v52, 0.0 }
 0x556   : > { %v4922_v44 = vmul.f32 %v3824_v60, %v4748_v47  ;;  %v2545_v47 = vsel %vm2039_vm0, %v4865_v12, 0.0  ;;  %v2644_v12 = vsel %vm5368_vm3, %v4889_v45, 0.0  ;;  %v2674_v60 = vsel %vm5369_vm4, %v4874_v34, 0.0 }
 0x557   : > { %v2559_v40 = vsel %vm2321_vm13, %v2545_v47, 0.0  ;;  %v2664_v20 = vsel %vm2321_vm13, %v2644_v12, 0.0  ;;  %v3790_v47 = vld [vmem:[%s5320_s5] sm:$0x1f]  }
 0x558   : > { %v2413_v46 = vpack.c.bf16 %v4922_v44, %v4889_v45  ;;  %v2421_v61 = vsel %vm1634_vm14, %v4922_v44, 0.0  ;;  %v2453_v63 = vsel %vm1877_vm15, %v4922_v44, 0.0  ;;  %vm2797_vm14 = vcmask 1043456  }
 0x559   : > { %2499 = vadd.xlane.f32.xlu0 %v2498_v54  ;;  %2554 = vadd.xlane.f32.xlu1 %v2553_v8  ;;  %v2690_v54 = vsel %vm2321_vm13, %v2674_v60, 0.0  ;;  %v2443_v8 = vsel %vm2321_vm13, %v2421_v61, 0.0  ;;  %v2485_v36 = vsel %vm1931_vm1, %v4922_v44, 0.0  ;;  %v2549_v57 = vsel %vm2039_vm0, %v4922_v44, 0.0 }
 0x55a   : > { %3662 = vmatmul.mubr.msk.bf16.vlgmr.msra.gmra.mrb[20].mxu1 %vm2321_vm13, %v2413_v46  ;;  %v2676_v46 = vsel %vm5370_vm6, %v4889_v45, 0.0  ;;  %v2475_v45 = vsel %vm2321_vm13, %v2453_v63, 0.0  ;;  %v2581_v59 = vsel %vm2093_vm11, %v4922_v44, 0.0  ;;  %v2613_v7 = vsel %vm2147_vm10, %v4922_v44, 0.0 }
 0x55b   : > { %v2696_v38 = vsel %vm2321_vm13, %v2676_v46, 0.0  ;;  %vm2711_vm0 = vcmask 15360   ;;  %vm5371_vm15 = vcmask 64512  }
 0x55c   : > { %vm5372_vm3 = vmmov %vm5371_vm15 }
 0x55d   : > { %2505 = vadd.xlane.f32.xlu0 %v2504_v24  ;;  %2560 = vadd.xlane.f32.xlu1 %v2559_v40  ;;  %v3869_v24 = vmov 65535   ;;  %vm5373_vm4 = vmmov %vm5372_vm3 }
 0x55e   : > { %v2799_v40 = vsel %vm2797_vm14, 4294967295, %v3869_v24  ;;  %vm5374_vm6 = vmmov %vm5372_vm3 }
 0x55f   : > { %v2800_v55 = vsel %vm2798_vm5, %v2799_v40, 0  ;;  %vm5376_vm14 = vmmov %vm5372_vm3 }
 0x560   : > { %vm5377_vm5 = vmmov %vm5372_vm3 }
 0x561   : > { %2531 = vadd.xlane.f32.xlu0 %v2530_v30  ;;  %2586 = vadd.xlane.f32.xlu1 %v2585_v42  ;;  %v2802_v30 = vand.u32 %v3790_v47, %v2800_v55  ;;  %v2483_v42 = vsel %vm1931_vm1, %v4925_v52, 0.0  ;;  %vm2720_vm1 = vcmask 23552  }
 0x562   : > { %v2501_v1 = vsel %vm2321_vm13, %v2483_v42, 0.0 }
 0x563   : > { %3631 = vmatprep.subr.bf16.mxu0 %v2802_v30 }
 0x564   : > { %3632 = vmatpush3.bf16.msra.mxu0 %v2802_v30 }
 0x565   : > { %2537 = vadd.xlane.f32.xlu0 %v2536_v58  ;;  %2592 = vadd.xlane.f32.xlu1 %v2591_v13  ;;  %v2507_v13 = vsel %vm2321_vm13, %v2485_v36, 0.0 }
 0x566   : > { %3653 = vmatprep.subr.bf16.mxu0 %v3848_v0 }
 0x569   : > { %2563 = vadd.xlane.f32.xlu0 %v2562_v22  ;;  %2618 = vadd.xlane.f32.xlu1 %v2617_v25  ;;  %v2533_v22 = vsel %vm2321_vm13, %v2515_v29, 0.0  ;;  %v2517_v25 = vsel %vm1985_vm2, %v4922_v44, 0.0  ;;  %vm2729_vm2 = vcmask 31744  }
 0x56a   : > { %v2539_v5 = vsel %vm2321_vm13, %v2517_v25, 0.0 }
 0x56d   : > { %2569 = vadd.xlane.f32.xlu0 %v2568_v6  ;;  %2624 = vadd.xlane.f32.xlu1 %v2623_v31  ;;  %v2565_v31 = vsel %vm2321_vm13, %v2547_v17, 0.0 }
 0x571   : > { %v2424_v35 = vpop.xlane.xlu0 %2423  ;;  %2595 = vadd.xlane.f32.xlu0 %v2594_v43  ;;  %2650 = vadd.xlane.f32.xlu1 %v2649_v11  ;;  %v2571_v43 = vsel %vm2321_vm13, %v2549_v57, 0.0  ;;  %v2579_v11 = vsel %vm2093_vm11, %v4925_v52, 0.0  ;;  %vm2784_vm11 = vcmask 72704  }
 0x575   : > { %v2456_v26 = vpop.xlane.xlu0 %2455  ;;  %2601 = vadd.xlane.f32.xlu0 %v2600_v37  ;;  %2656 = vadd.xlane.f32.xlu1 %v2655_v15  ;;  %v2603_v37 = vsel %vm2321_vm13, %v2581_v59, 0.0  ;;  %v2611_v15 = vsel %vm2147_vm10, %v4925_v52, 0.0  ;;  %vm2756_vm10 = vcmask 56320  }
 0x576   : > { %v4997_v16 = vsel %vm2702_vm12, %v2424_v35, %v2456_v26  ;;  %v2597_v35 = vsel %vm2321_vm13, %v2579_v11, 0.0  ;;  %v2629_v56 = vsel %vm2321_vm13, %v2611_v15, 0.0 }
 0x579   : > { %2627 = vadd.xlane.f32.xlu0 %v2626_v27  ;;  %2682 = vadd.xlane.f32.xlu1 %v2681_v33  ;;  %v5031_v49 = vpop.xlane.xlu0 %2429  ;;  %v2635_v27 = vsel %vm2321_vm13, %v2613_v7, 0.0  ;;  %v2643_v33 = vsel %vm2201_vm9, %v4925_v52, 0.0 }
 0x57a   : > { %v2661_v23 = vsel %vm2321_vm13, %v2643_v33, 0.0 }
 0x57d   : > { %2633 = vadd.xlane.f32.xlu0 %v2632_v3  ;;  %2688 = vadd.xlane.f32.xlu1 %v2687_v2  ;;  %v5044_v18 = vpop.xlane.xlu0 %2461  ;;  %v2645_v3 = vsel %vm2201_vm9, %v4922_v44, 0.0  ;;  %vm2747_vm9 = vcmask 48128  }
 0x57e   : > { %v2667_v53 = vsel %vm2321_vm13, %v2645_v3, 0.0  ;;  %v2705_v7 = vsel %vm2702_vm12, %v5031_v49, %v5044_v18 }
 0x581   : > { %2659 = vadd.xlane.f32.xlu0 %v2658_v48  ;;  %2438 = vadd.xlane.f32.xlu1 %v2437_v50  ;;  %v5056_v58 = vpop.xlane.xlu0 %2487  ;;  %v2693_v48 = vsel %vm2321_vm13, %v2675_v41, 0.0  ;;  %v2677_v50 = vsel %vm2255_vm8, %v4922_v44, 0.0  ;;  %vm2738_vm8 = vcmask 39936  }
 0x582   : > { %v2699_v28 = vsel %vm2321_vm13, %v2677_v50, 0.0 }
 0x585   : > { %2665 = vadd.xlane.f32.xlu0 %v2664_v20  ;;  %2470 = vadd.xlane.f32.xlu1 %v2469_v32  ;;  %v5062_v10 = vpop.xlane.xlu0 %2493 }
 0x589   : > { %2691 = vadd.xlane.f32.xlu0 %v2690_v54  ;;  %2444 = vadd.xlane.f32.xlu1 %v2443_v8  ;;  %v5072_v6 = vpop.xlane.xlu0 %2519 }
 0x58d   : > { %2697 = vadd.xlane.f32.xlu0 %v2696_v38  ;;  %2476 = vadd.xlane.f32.xlu1 %v2475_v45  ;;  %v5078_v4 = vpop.xlane.xlu0 %2525 }
 0x591   : > { %2502 = vadd.xlane.f32.xlu1 %v2501_v1  ;;  %v5088_v62 = vpop.xlane.xlu0 %2551 }
 0x595   : > { %2508 = vadd.xlane.f32.xlu1 %v2507_v13  ;;  %v5094_v26 = vpop.xlane.xlu0 %2557  ;;  %v2427_v20 = vpop.xlane.xlu1 %2426 }
 0x599   : > { %2534 = vadd.xlane.f32.xlu1 %v2533_v22  ;;  %v2584_v14 = vpop.xlane.xlu0 %2583  ;;  %v2459_v60 = vpop.xlane.xlu1 %2458 }
 0x59a   : > { %v2704_v57 = vsel %vm2702_vm12, %v2427_v20, %v2459_v60 }
 0x59d   : > { %2540 = vadd.xlane.f32.xlu1 %v2539_v5  ;;  %v5108_v2 = vpop.xlane.xlu0 %2589 }
 0x5a1   : > { %2566 = vadd.xlane.f32.xlu1 %v2565_v31  ;;  %v2616_v12 = vpop.xlane.xlu0 %2615 }
 0x5a5   : > { %2572 = vadd.xlane.f32.xlu1 %v2571_v43  ;;  %v5119_v32 = vpop.xlane.xlu0 %2621 }
 0x5a9   : > { %2598 = vadd.xlane.f32.xlu1 %v2597_v35  ;;  %v2648_v61 = vpop.xlane.xlu0 %2647  ;;  %v2712_v35 = vsel %vm2711_vm0, %v4997_v16, %v5056_v58  ;;  %v2714_v58 = vsel %vm2711_vm0, %v2705_v7, %v5062_v10 }
 0x5aa   : > { %v2723_v18 = vsel %vm2720_vm1, %v2714_v58, %v5078_v4 }
 0x5ad   : > { %2604 = vadd.xlane.f32.xlu1 %v2603_v37  ;;  %v5121_v8 = vpop.xlane.xlu0 %2653  ;;  %v2721_v37 = vsel %vm2720_vm1, %v2712_v35, %v5072_v6 }
 0x5b1   : > { %2630 = vadd.xlane.f32.xlu1 %v2629_v56  ;;  %v2680_v63 = vpop.xlane.xlu0 %2679 }
 0x5b5   : > { %2636 = vadd.xlane.f32.xlu1 %v2635_v27  ;;  %v2686_v38 = vpop.xlane.xlu0 %2685  ;;  %v2730_v27 = vsel %vm2729_vm2, %v2721_v37, %v5088_v62 }
 0x5b6   : > { %v2739_v33 = vsel %vm2738_vm8, %v2730_v27, %v2584_v14 }
 0x5b7   : > { %v2748_v3 = vsel %vm2747_vm9, %v2739_v33, %v2616_v12 }
 0x5b8   : > { %v2757_v62 = vsel %vm2756_vm10, %v2748_v3, %v2648_v61 }
 0x5b9   : > { %2662 = vadd.xlane.f32.xlu1 %v2661_v23  ;;  %v2523_v30 = vpop.xlane.xlu0 %2522  ;;  %v2765_v50 = vsel %vm5371_vm15, %v2757_v62, %v2680_v63 }
 0x5bd   : > { %2668 = vadd.xlane.f32.xlu1 %v2667_v53 }
 0x5c1   : > { %2694 = vadd.xlane.f32.xlu1 %v2693_v48  ;;  %v2732_v48 = vsel %vm2729_vm2, %v2723_v18, %v5094_v26 }
 0x5c2   : > { %v2741_v4 = vsel %vm2738_vm8, %v2732_v48, %v5108_v2 }
 0x5c5   : > { %2700 = vadd.xlane.f32.xlu1 %v2699_v28 }
 0x5d2   : > { %v2433_v54 = vpop.xlane.xlu1 %2432 }
 0x5d6   : > { %v2465_v46 = vpop.xlane.xlu1 %2464  ;;  %v5127_v1 = vpop.xlane.xlu0 %2435 }
 0x5d7   : > { %v2706_v6 = vsel %vm2702_vm12, %v2433_v54, %v2465_v46  ;;  %v2750_v54 = vsel %vm2747_vm9, %v2741_v4, %v5119_v32 }
 0x5d8   : > { %v2759_v26 = vsel %vm2756_vm10, %v2750_v54, %v5121_v8 }
 0x5da   : > { %v2491_v47 = vpop.xlane.xlu1 %2490  ;;  %v5129_v29 = vpop.xlane.xlu0 %2467 }
 0x5db   : > { %v2713_v11 = vsel %vm2711_vm0, %v2704_v57, %v2491_v47 }
 0x5dc   : > { %v5123_v24 = vpop.f32.mrb[12].mxu1  ;;  %v2722_v15 = vsel %vm2720_vm1, %v2713_v11, %v2523_v30 }
 0x5dd   : > { %v3645_v40 = vpop.f32.mrb[13].mxu1 }
 0x5de   : > { %v5125_v21 = vpop.f32.mrb[14].mxu1  ;;  %v2497_v55 = vpop.xlane.xlu1 %2496  ;;  %v2767_v40 = vsel %vm5373_vm4, %v2759_v26, %v2686_v38 }
 0x5df   : > { %v3646_v44 = vpop.f32.mrb[15].mxu1  ;;  %v5131_v25 = vpop.xlane.xlu0 %2441  ;;  %v2715_v53 = vsel %vm2711_vm0, %v2706_v6, %v2497_v55 }
 0x5e2   : > { %v2529_v45 = vpop.xlane.xlu1 %2528 }
 0x5e3   : > { %v5133_v31 = vpop.xlane.xlu0 %2473  ;;  %v2724_v10 = vsel %vm2720_vm1, %v2715_v53, %v2529_v45 }
 0x5e6   : > { %v2555_v42 = vpop.xlane.xlu1 %2554 }
 0x5e7   : > { %v5140_v59 = vpop.xlane.xlu0 %2499  ;;  %v2731_v16 = vsel %vm2729_vm2, %v2722_v15, %v2555_v42 }
 0x5ea   : > { %v2561_v36 = vpop.xlane.xlu1 %2560 }
 0x5eb   : > { %v5167_v12 = vpop.xlane.xlu0 %2505  ;;  %v2733_v28 = vsel %vm2729_vm2, %v2724_v10, %v2561_v36 }
 0x5ee   : > { %v2587_v13 = vpop.xlane.xlu1 %2586 }
 0x5ef   : > { %v2740_v23 = vsel %vm2738_vm8, %v2731_v16, %v2587_v13  ;;  %v2532_v55 = vpop.xlane.xlu0 %2531 }
 0x5f2   : > { %v2593_v22 = vpop.xlane.xlu1 %2592 }
 0x5f3   : > { %v2742_v60 = vsel %vm2738_vm8, %v2733_v28, %v2593_v22  ;;  %v2538_v30 = vpop.xlane.xlu0 %2537 }
 0x5f6   : > { %v2619_v5 = vpop.xlane.xlu1 %2618 }
 0x5f7   : > { %v2749_v49 = vsel %vm2747_vm9, %v2740_v23, %v2619_v5  ;;  %v2564_v13 = vpop.xlane.xlu0 %2563 }
 0x5fa   : > { %v2625_v17 = vpop.xlane.xlu1 %2624 }
 0x5fb   : > { %v2751_v46 = vsel %vm2747_vm9, %v2742_v60, %v2625_v17  ;;  %v2570_v57 = vpop.xlane.xlu0 %2569 }
 0x5fe   : > { %v2651_v43 = vpop.xlane.xlu1 %2650 }
 0x5ff   : > { %v2758_v14 = vsel %vm2756_vm10, %v2749_v49, %v2651_v43  ;;  %v2596_v11 = vpop.xlane.xlu0 %2595 }
 0x602   : > { %v2657_v56 = vpop.xlane.xlu1 %2656 }
 0x603   : > { %v2760_v63 = vsel %vm2756_vm10, %v2751_v46, %v2657_v56  ;;  %v2602_v15 = vpop.xlane.xlu0 %2601 }
 0x606   : > { %v2683_v41 = vpop.xlane.xlu1 %2682 }
 0x607   : > { %v2766_v20 = vsel %vm5372_vm3, %v2758_v14, %v2683_v41  ;;  %v2628_v58 = vpop.xlane.xlu0 %2627  ;;  %v2707_v14 = vsel %vm2702_vm12, %v5127_v1, %v5129_v29  ;;  %v2709_v1 = vsel %vm2702_vm12, %v5131_v25, %v5133_v31 }
 0x608   : > { %v2773_v61 = vpack.c.bf16 %v2766_v20, %v2765_v50  ;;  %v2716_v48 = vsel %vm2711_vm0, %v2707_v14, %v5140_v59  ;;  %v2718_v26 = vsel %vm2711_vm0, %v2709_v1, %v5167_v12 }
 0x609   : > { %v2725_v28 = vsel %vm2720_vm1, %v2716_v48, %v2532_v55 }
 0x60a   : > { %3633 = vmatprep.mubr.msk.bf16.mxu0 %vm2784_vm11, %v2773_v61  ;;  %v2689_v47 = vpop.xlane.xlu1 %2688  ;;  %v2734_v61 = vsel %vm2729_vm2, %v2725_v28, %v2564_v13 }
 0x60b   : > { %v2768_v2 = vsel %vm5374_vm6, %v2760_v63, %v2689_v47  ;;  %v2634_v23 = vpop.xlane.xlu0 %2633  ;;  %v2743_v29 = vsel %vm2738_vm8, %v2734_v61, %v2596_v11 }
 0x60c   : > { %v2774_v44 = vpack.c.bf16 %v2768_v2, %v2767_v40  ;;  %v2752_v63 = vsel %vm2747_vm9, %v2743_v29, %v2628_v58  ;;  %v2727_v2 = vsel %vm2720_vm1, %v2718_v26, %v2538_v30 }
 0x60e   : > { %3634 = vmatmul.mubr.msk.bf16.vlgmr.msra.gmra.mrb[12].mxu0 %vm2784_vm11, %v2774_v44  ;;  %v2439_v45 = vpop.xlane.xlu1 %2438 }
 0x60f   : > { %3654 = vmatpush3.bf16.msra.mxu0 %v4762_v9  ;;  %v2660_v53 = vpop.xlane.xlu0 %2659 }
 0x610   : > { %v2761_v44 = vsel %vm2756_vm10, %v2752_v63, %v2660_v53 }
 0x612   : > { %v2471_v32 = vpop.xlane.xlu1 %2470 }
 0x613   : > { %v2666_v62 = vpop.xlane.xlu0 %2665  ;;  %v2708_v41 = vsel %vm2702_vm12, %v2439_v45, %v2471_v32  ;;  %v2736_v45 = vsel %vm2729_vm2, %v2727_v2, %v2570_v57 }
 0x616   : > { %v2445_v42 = vpop.xlane.xlu1 %2444 }
 0x617   : > { %v2692_v20 = vpop.xlane.xlu0 %2691 }
 0x618   : > { %v5185_v8 = vpop.f32.mrb[16].mxu1 }
 0x619   : > { %v3651_v36 = vpop.f32.mrb[17].mxu1 }
 0x61a   : > { %v5187_v22 = vpop.f32.mrb[18].mxu1  ;;  %v2477_v5 = vpop.xlane.xlu1 %2476  ;;  %v2745_v36 = vsel %vm2738_vm8, %v2736_v45, %v2602_v15 }
 0x61b   : > { %v3652_v38 = vpop.f32.mrb[19].mxu1  ;;  %v2710_v59 = vsel %vm2702_vm12, %v2445_v42, %v2477_v5  ;;  %vm5375_vm12 = vmmov %vm5372_vm3  ;;  %v2698_v13 = vpop.xlane.xlu0 %2697 }
 0x61c   : > { %v2769_v32 = vsel %vm5375_vm12, %v2761_v44, %v2692_v20  ;;  %v2754_v38 = vsel %vm2747_vm9, %v2745_v36, %v2634_v23 }
 0x61e   : > { %v2503_v17 = vpop.xlane.xlu1 %2502 }
 0x61f   : > { %v2717_v50 = vsel %vm2711_vm0, %v2708_v41, %v2503_v17 }
 0x622   : > { %v2509_v43 = vpop.xlane.xlu1 %2508 }
 0x623   : > { %v2719_v47 = vsel %vm2711_vm0, %v2710_v59, %v2509_v43  ;;  %v2763_v43 = vsel %vm2756_vm10, %v2754_v38, %v2666_v62  ;;  %vm5378_vm0 = vmmov %vm5372_vm3 }
 0x626   : > { %v2535_v35 = vpop.xlane.xlu1 %2534 }
 0x627   : > { %v2726_v4 = vsel %vm2720_vm1, %v2717_v50, %v2535_v35  ;;  %v2771_v35 = vsel %vm5377_vm5, %v2763_v43, %v2698_v13 }
 0x62a   : > { %v2541_v37 = vpop.xlane.xlu1 %2540 }
 0x62b   : > { %v2728_v25 = vsel %vm2720_vm1, %v2719_v47, %v2541_v37  ;;  %vm5380_vm1 = vmmov %vm5378_vm0 }
 0x62d   : > { %v5189_v56 = vpop.f32.mrb[20].mxu1 }
 0x62e   : > { %v3663_v9 = vpop.f32.mrb[21].mxu1  ;;  %v2567_v7 = vpop.xlane.xlu1 %2566 }
 0x62f   : > { %v5191_v27 = vpop.f32.mrb[22].mxu1  ;;  %v2735_v54 = vsel %vm2729_vm2, %v2726_v4, %v2567_v7 }
 0x630   : > { %v3664_v16 = vpop.f32.mrb[23].mxu1 }
 0x632   : > { %v2573_v33 = vpop.xlane.xlu1 %2572 }
 0x633   : > { %v2737_v12 = vsel %vm2729_vm2, %v2728_v25, %v2573_v33  ;;  %vm5381_vm2 = vmmov %vm5378_vm0 }
 0x636   : > { %v2599_v6 = vpop.xlane.xlu1 %2598 }
 0x637   : > { %v2744_v46 = vsel %vm2738_vm8, %v2735_v54, %v2599_v6 }
 0x63a   : > { %v2605_v3 = vpop.xlane.xlu1 %2604 }
 0x63b   : > { %v2746_v30 = vsel %vm2738_vm8, %v2737_v12, %v2605_v3  ;;  %vm3345_vm8 = vcmask 195584  }
 0x63e   : > { %v2631_v49 = vpop.xlane.xlu1 %2630 }
 0x63f   : > { %v2753_v40 = vsel %vm2747_vm9, %v2744_v46, %v2631_v49 }
 0x642   : > { %v2637_v18 = vpop.xlane.xlu1 %2636 }
 0x643   : > { %v2755_v17 = vsel %vm2747_vm9, %v2746_v30, %v2637_v18 }
 0x646   : > { %v2663_v10 = vpop.xlane.xlu1 %2662 }
 0x647   : > { %v2762_v31 = vsel %vm2756_vm10, %v2753_v40, %v2663_v10 }
 0x64a   : > { %v2669_v60 = vpop.xlane.xlu1 %2668 }
 0x64b   : > { %v2764_v57 = vsel %vm2756_vm10, %v2755_v17, %v2669_v60 }
 0x64e   : > { %v2695_v55 = vpop.xlane.xlu1 %2694 }
 0x64f   : > { %v2770_v42 = vsel %vm5376_vm14, %v2762_v31, %v2695_v55 }
 0x650   : > { %v2775_v5 = vpack.c.bf16 %v2770_v42, %v2769_v32 }
 0x652   : > { %3637 = vmatprep.mubr.msk.bf16.mxu0 %vm2784_vm11, %v2775_v5  ;;  %v2701_v11 = vpop.xlane.xlu1 %2700 }
 0x653   : > { %v2772_v37 = vsel %vm5378_vm0, %v2764_v57, %v2701_v11 }
 0x654   : > { %v2776_v15 = vpack.c.bf16 %v2772_v37, %v2771_v35 }
 0x656   : > { %3638 = vmatmul.mubr.msk.bf16.gmra.mrb[16].mxu0 %vm2784_vm11, %v2776_v15 }
 0x657   : > { %3655 = vmatprep.mubr.msk.bf16.mxu0 %vm5349_vm7, %v3848_v0  ;;  %vm5379_vm7 = vcmask 261120  }
 0x658   : > { %vm5382_vm9 = vmmov %vm5379_vm7 }
 0x659   : > { %vm5383_vm10 = vmmov %vm5379_vm7 }
 0x65a   : > { %vm5384_vm11 = vmmov %vm5379_vm7 }
 0x65e   : > { %3656 = vmatmul.mubr.msk.bf16.vlgmr.msra.gmra.mrb[20].mxu0 %vm2321_vm13, %v2412_v19 }
 0x6e1   : > { %v3635_v9 = vpop.f32.mrb[12].mxu0 }
 0x6e2   : > { %v2951_v7 = vadd.f32 %v3635_v9, %v5185_v8  ;;  %v2838_v16 = vpop.f32.mrb[13].mxu0 }
 0x6e3   : > { %v2907_v58 = vadd.f32 %v5123_v24, %v2838_v16  ;;  %v3636_v33 = vpop.f32.mrb[14].mxu0 }
 0x6e4   : > { %v2954_v6 = vadd.f32 %v3636_v33, %v5187_v22  ;;  %v2841_v23 = vpop.f32.mrb[15].mxu0 }
 0x6e5   : > { %v2910_v3 = vadd.f32 %v5125_v21, %v2841_v23 }
 0x729   : > { %v3639_v53 = vpop.f32.mrb[16].mxu0 }
 0x72a   : > { %v3039_v0 = vadd.f32 %v3639_v53, %v5189_v56  ;;  %v2854_v49 = vpop.f32.mrb[17].mxu0 }
 0x72b   : > { %v3640_v18 = vpop.f32.mrb[18].mxu0 }
 0x72c   : > { %v3061_v34 = vcombine.low %v2951_v7, %v3039_v0  ;;  %v3062_v52 = vcombine.high %v2951_v7, %v3039_v0  ;;  %v3042_v19 = vadd.f32 %v3640_v18, %v5191_v27  ;;  %v2857_v62 = vpop.f32.mrb[19].mxu0 }
 0x72e   : > { %v3129_v8 = vcombine.low %v2954_v6, %v3042_v19  ;;  %v3130_v10 = vcombine.high %v2954_v6, %v3042_v19  ;;  %v3069_v20 = vrot.slane %v3061_v34, %v4020_v39  ;;  %v3076_v56 = vrot.slane %v3062_v52, %v4020_v39 }
 0x730   : > { %v3137_v46 = vrot.slane %v3129_v8, %v4020_v39  ;;  %v3144_v26 = vrot.slane %v3130_v10, %v4020_v39 }
 0x731   : > { %v2994_v14 = vpop.f32.mrb[20].mxu0 }
 0x732   : > { %v2995_v24 = vadd.f32 %v2994_v14, %v2854_v49  ;;  %v3657_v41 = vpop.f32.mrb[21].mxu0 }
 0x733   : > { %v2997_v48 = vpop.f32.mrb[22].mxu0 }
 0x734   : > { %v3045_v22 = vcombine.low %v2907_v58, %v2995_v24  ;;  %v3046_v50 = vcombine.high %v2907_v58, %v2995_v24  ;;  %v2998_v28 = vadd.f32 %v2997_v48, %v2857_v62  ;;  %v3658_v21 = vpop.f32.mrb[23].mxu0 }
 0x736   : > { %v3053_v4 = vrot.slane %v3045_v22, %v4020_v39  ;;  %v3060_v60 = vrot.slane %v3046_v50, %v4020_v39  ;;  %v3113_v27 = vcombine.low %v2910_v3, %v2998_v28  ;;  %v3114_v61 = vcombine.high %v2910_v3, %v2998_v28 }
 0x738   : > { %v3077_v54 = vcombine.low %v3053_v4, %v3069_v20  ;;  %v3078_v1 = vcombine.high %v3053_v4, %v3069_v20  ;;  %v3093_v29 = vcombine.low %v3060_v60, %v3076_v56  ;;  %v3094_v59 = vcombine.high %v3060_v60, %v3076_v56  ;;  %v3791_v60 = vld [vmem:[%s5321_s6] sm:$0xff]  }
 0x739   : > { %v3121_v63 = vrot.slane %v3113_v27, %v4020_v39  ;;  %v3128_v47 = vrot.slane %v3114_v61, %v4020_v39  ;;  %3667 = vmatprep.mubr.msk.bf16.mxu0 %vm5379_vm7, %v3791_v60 }
 0x73a   : > { %v3085_v40 = vrot.slane %v3077_v54, %v4035_v51  ;;  %v3092_v2 = vrot.slane %v3078_v1, %v4035_v51  ;;  %v3101_v44 = vrot.slane %v3093_v29, %v4035_v51  ;;  %v3108_v25 = vrot.slane %v3094_v59, %v4035_v51  ;;  %v3354_v1 = vld [vmem:[%s5322_s7 + $0x8] sm:$0xff]  ;;  %v3355_v29 = vld [vmem:[%s5322_s7 + $0x10] sm:$0xff]  ;;  %v3356_v59 = vld [vmem:[%s5322_s7 + $0x18] sm:$0xff] }
 0x73b   : > { %v3145_v31 = vcombine.low %v3121_v63, %v3137_v46  ;;  %v3146_v55 = vcombine.high %v3121_v63, %v3137_v46  ;;  %v3161_v45 = vcombine.low %v3128_v47, %v3144_v26  ;;  %v3162_v32 = vcombine.high %v3128_v47, %v3144_v26 }
 0x73c   : > { %v3181_v12 = vcombine.low %v3085_v40, %v3092_v2  ;;  %v3549_v42 = vcombine.high %v3085_v40, %v3092_v2  ;;  %v3197_v36 = vcombine.low %v3101_v44, %v3108_v25  ;;  %v3550_v13 = vcombine.high %v3101_v44, %v3108_v25 }
 0x73d   : > { %v3153_v30 = vrot.slane %v3145_v31, %v4035_v51  ;;  %v3160_v5 = vrot.slane %v3146_v55, %v4035_v51  ;;  %v3169_v38 = vrot.slane %v3161_v45, %v4035_v51  ;;  %v3176_v17 = vrot.slane %v3162_v32, %v4035_v51 }
 0x73e   : > { %v3188_v43 = vrot.slane %v3181_v12, %v4020_v39  ;;  %v3196_v57 = vrot.slane %v3549_v42, %v4020_v39  ;;  %v3204_v11 = vrot.slane %v3197_v36, %v4020_v39  ;;  %v3212_v35 = vrot.slane %v3550_v13, %v4020_v39 }
 0x73f   : > { %v3249_v37 = vcombine.low %v3153_v30, %v3160_v5  ;;  %v3551_v15 = vcombine.high %v3153_v30, %v3160_v5  ;;  %v3265_v9 = vcombine.low %v3169_v38, %v3176_v17  ;;  %v3552_v7 = vcombine.high %v3169_v38, %v3176_v17  ;;  %v3792_v5 = vld [vmem:[%s5321_s6 + $0x8] sm:$0xff]  }
 0x740   : > { %v3214_v16 = vcombine.high %v3188_v43, %v3196_v57  ;;  %v3230_v58 = vcombine.high %v3204_v11, %v3212_v35  ;;  %v3213_v33 = vcombine.low %v3188_v43, %v3196_v57  ;;  %v3229_v6 = vcombine.low %v3204_v11, %v3212_v35 }
 0x741   : > { %v3256_v23 = vrot.slane %v3249_v37, %v4020_v39  ;;  %v3264_v3 = vrot.slane %v3551_v15, %v4020_v39  ;;  %v3272_v53 = vrot.slane %v3265_v9, %v4020_v39  ;;  %v3280_v0 = vrot.slane %v3552_v7, %v4020_v39 }
 0x742   : > { %v3228_v49 = vrot.slane %v3214_v16, %v4035_v51  ;;  %v3244_v18 = vrot.slane %v3230_v58, %v4035_v51  ;;  %v3221_v34 = vrot.slane %v3213_v33, %v4035_v51  ;;  %v3237_v52 = vrot.slane %v3229_v6, %v4035_v51 }
 0x743   : > { %v3282_v19 = vcombine.high %v3256_v23, %v3264_v3  ;;  %v3298_v62 = vcombine.high %v3272_v53, %v3280_v0  ;;  %v3281_v8 = vcombine.low %v3256_v23, %v3264_v3  ;;  %v3297_v10 = vcombine.low %v3272_v53, %v3280_v0 }
 0x744   : > { %v3247_v14 = vcombine.low %v3228_v49, %v3244_v18  ;;  %v3246_v24 = vcombine.high %v3221_v34, %v3237_v52  ;;  %v3248_v41 = vcombine.high %v3228_v49, %v3244_v18  ;;  %v3245_v48 = vcombine.low %v3221_v34, %v3237_v52 }
 0x745   : > { %v3296_v22 = vrot.slane %v3282_v19, %v4035_v51  ;;  %v3312_v39 = vrot.slane %v3298_v62, %v4035_v51  ;;  %v3289_v50 = vrot.slane %v3281_v8, %v4035_v51  ;;  %v3305_v28 = vrot.slane %v3297_v10, %v4035_v51  ;;  %v3353_v51 = vld [vmem:[%s5322_s7] sm:$0xff] }
 0x747   : > { %v3315_v21 = vcombine.low %v3296_v22, %v3312_v39  ;;  %v3314_v20 = vcombine.high %v3289_v50, %v3305_v28  ;;  %v3316_v56 = vcombine.high %v3296_v22, %v3312_v39  ;;  %v3313_v4 = vcombine.low %v3289_v50, %v3305_v28 }
 0x749   : > { %v3774_v27 = vpack.i.bf16 %v3315_v21, %v3247_v14  ;;  %v3769_v61 = vpack.i.bf16 %v3314_v20, %v3246_v24  ;;  %v3779_v54 = vpack.i.bf16 %v3316_v56, %v3248_v41 }
 0x74b   : > { %3775 = vrot.lane.b32.xlu1 %v3774_v27, %s3870_s19  ;;  %3770 = vrot.lane.b32.xlu0 %v3769_v61, %s3871_s20 }
 0x74f   : > { %3780 = vrot.lane.b32.xlu1 %v3779_v54, %s3872_s21  ;;  %3364 = vperm.xlu0 %3785, %v3354_v1  }
 0x753   : > { %3359 = vperm.xlu1 %3784, %v3353_v51  }
 0x757   : > { %3369 = vperm.xlu1 %3784, %v3355_v29  }
 0x75b   : > { %3374 = vperm.xlu1 %3784, %v3356_v59  }
 0x7bd   : > { %v3776_v46 = vpop.permute.xlu1 %3775  ;;  %v3771_v26 = vpop.permute.xlu0 %3770 }
 0x7be   : > { %v3773_v63 = vunpack.i.h.bf16 %v3771_v26  ;;  %v3772_v47 = vunpack.i.l.bf16 %v3771_v26  ;;  %v3778_v40 = vunpack.i.h.bf16 %v3776_v46  ;;  %v3777_v2 = vunpack.i.l.bf16 %v3776_v46 }
 0x7c0   : > { %v3341_v44 = vsel %vm5380_vm1, %v3245_v48, %v3772_v47  ;;  %v3342_v25 = vsel %vm5381_vm2, %v3313_v4, %v3773_v63 }
 0x7c1   : > { %v3781_v31 = vpop.permute.xlu1 %3780  ;;  %v3343_v32 = vsel %vm2321_vm13, %v3341_v44, %v3777_v2  ;;  %v3344_v12 = vsel %vm2321_vm13, %v3342_v25, %v3778_v40 }
 0x7c2   : > { %v3783_v55 = vunpack.i.h.bf16 %v3781_v31  ;;  %v3782_v45 = vunpack.i.l.bf16 %v3781_v31 }
 0x7c4   : > { %v3346_v42 = vsel %vm3345_vm8, %v3343_v32, %v3782_v45  ;;  %v3347_v36 = vsel %vm3345_vm8, %v3344_v12, %v3783_v55 }
 0x7c5   : > { %v3348_v13 = vpack.c.bf16 %v3347_v36, %v3346_v42 }
 0x7c7   : > { %3671 = vmatprep.subr.msk.bf16.mxu0 %vm5382_vm9, %v3348_v13  ;;  %v3394_v30 = vsel %vm5383_vm10, %v3348_v13, 0 }
 0x7c8   : > { %3666 = vmatpush3.bf16.xpose.msra.mxu0 %v3394_v30 }
 0x7ce   : > { %v3365_v35 = vpop.permute.xlu0 %3364 }
 0x7cf   : > { %3668 = vmatmul.mubr.msk.bf16.vlgmr.msra.gmra.mrb[24].mxu0 %vm5384_vm11, %v3792_v5 }
 0x7d2   : > { %v3360_v38 = vpop.permute.xlu1 %3359 }
 0x7d6   : > { %v3370_v17 = vpop.permute.xlu1 %3369 }
 0x7da   : > { %v3375_v37 = vpop.permute.xlu1 %3374 }
 0x8a2   : > { %v3669_v43 = vpop.f32.mrb[24].mxu0 }
 0x8a3   : > { %v3439_v57 = vadd.f32 %v3669_v43, %v3370_v17  ;;  %v3430_v11 = vpop.f32.mrb[25].mxu0 }
 0x8a4   : > { %v3431_v15 = vadd.f32 %v3430_v11, %v3360_v38  ;;  %v3670_v9 = vpop.f32.mrb[26].mxu0 }
 0x8a5   : > { %3447 = vst.msk [vmem:[%s285_s14 + $0x10] sm:$0xff] %vm2321_vm13, %v3439_v57  ;;  %v3442_v7 = vadd.f32 %v3670_v9, %v3375_v37  ;;  %v3433_v16 = vpop.f32.mrb[27].mxu0 }
 0x8a6   : > { %3445 = vst.msk [vmem:[%s285_s14] sm:$0xff] %vm2321_vm13, %v3431_v15  ;;  %v3434_v58 = vadd.f32 %v3433_v16, %v3365_v35 }
 0x8a7   : > { %3448 = vst.msk [vmem:[%s285_s14 + $0x18] sm:$0xff] %vm2321_vm13, %v3442_v7 }
 0x8a8   : > { %3446 = vst.msk [vmem:[%s285_s14 + $0x8] sm:$0xff] %vm2321_vm13, %v3434_v58 }
 0x8a9 PF: > { %s24_s10 = sadd.s32 1, %s3845_s10  }
 0x8aa   : > { %p21_p9 = scmp.ge.s32.totalorder %s24_s10, 4  }
 0x8ac   :  { %23 = sbr.rel (!%p21_p9) target bundleno = 16 (0x10), region = 78 }

</bundles_post_ra>
